<compile_context>
chip_gen: v7x
topology: tpu7x:2x2x1
jax: 0.10.0
libtpu: 0.0.40
codegen_flags: <defaults>
</compile_context>

<pallas_src>
import functools
import math

import jax
import jax.numpy as jnp
from jax.experimental import pallas as pl
from jax.experimental.pallas import tpu as pltpu


# ----------------------------- hardware / probes ------------------------------

def _vmem_capacity_bytes():
    try:
        return int(pltpu.get_tpu_info().vmem_capacity_bytes)
    except Exception:
        return 64 * 1024 * 1024        # conservative (v7x per-TC VMEM)


@functools.lru_cache(maxsize=None)
def _buffered_one_supported():
    """Probe: does this jax/libtpu accept pipeline_mode=pl.Buffered(1) on a BlockSpec?"""
    try:
        def k(a_ref, o_ref):
            o_ref[...] = a_ref[...] + 1.0
        x = jnp.zeros((8, 128), jnp.float32)
        out = pl.pallas_call(
            k,
            out_shape=jax.ShapeDtypeStruct((16, 128), jnp.float32),
            grid=(2,),
            in_specs=[pl.BlockSpec((8, 128), lambda i: (0, 0),
                                   pipeline_mode=pl.Buffered(1))],
            out_specs=pl.BlockSpec((8, 128), lambda i: (i, 0)),
        )(x)
        jax.block_until_ready(out)
        return True
    except Exception:
        return False


@functools.lru_cache(maxsize=None)
def _lane_concat_supported(piece_width, num_pieces):
    """Probe: minor-dim concatenation of `num_pieces` (8, piece_width) f32 tiles."""
    if num_pieces <= 1:
        return True
    try:
        def k(*refs):
            o_ref = refs[-1]
            o_ref[...] = jnp.concatenate([r[...] for r in refs[:-1]], axis=-1)
        xs = [jnp.full((8, piece_width), float(i + 1), jnp.float32)
              for i in range(num_pieces)]
        out = pl.pallas_call(
            k,
            out_shape=jax.ShapeDtypeStruct((8, piece_width * num_pieces), jnp.float32),
        )(*xs)
        jax.block_until_ready(out)
        return True
    except Exception:
        return False


def _const_spec(shape):
    """BlockSpec for a grid-invariant (weight) block; single-buffered when supported."""
    ndim = len(shape)
    index_map = lambda i: (0,) * ndim
    if _buffered_one_supported():
        return pl.BlockSpec(shape, index_map, pipeline_mode=pl.Buffered(1))
    return pl.BlockSpec(shape, index_map)


# ------------------------------ tiling helpers --------------------------------

def _target_rows():
    # 512-row activation tiles on 128-MiB-VMEM parts (v5e/v6e); 256 on 64-MiB (v7x).
    return 512 if _vmem_capacity_bytes() > (64 << 20) else 256


def _pick_sentence_block(bn, seq_len, target_rows):
    """Largest divisor T of bn with T*seq_len <= target_rows; keep >=2 grid steps."""
    best = 1
    for t in range(1, bn + 1):
        if bn % t == 0 and t * seq_len <= max(target_rows, seq_len):
            best = t
    # prefer >=2 grid steps so a 2-TC chip (v7x) can shard the 'parallel' axis
    if best == bn and bn > 1:
        best = max(t for t in range(1, bn) if bn % t == 0)
    return best


def _pick_row_tile(n, max_tile=512):
    """Largest divisor of n that is <= max_tile and 8-aligned (or equals n)."""
    best = 1
    for t in range(1, min(n, max_tile) + 1):
        if n % t == 0 and (t % 8 == 0 or t == n):
            best = t
    return best


def _layer_vmem_limit(T, L, D, Dff):
    rows = T * L
    weights = (4 * D * D + 2 * D * Dff) * 2            # wqkv+wo, w1+w2: bf16, 1-buffered
    biases = (8 * D + Dff) * 4 * 2
    io = 2 * (2 * rows * D + T * D) * 4                # x in/out (+pe), double-buffered f32
    interm = (rows * (6 * D + Dff) + T * L * L) * 4    # qkv/ctx/hdn/xn/x2 + one score tile
    est = weights + biases + io + interm + (8 << 20)
    return int(min(max(est, 32 << 20), int(_vmem_capacity_bytes() * 0.9)))


def _ffn_vmem_limit(tile, D, Dff):
    est = 2 * D * Dff * 2 + 4 * tile * D * 4 + tile * Dff * 4 + (8 << 20)
    return int(min(max(est, 32 << 20), int(_vmem_capacity_bytes() * 0.9)))


# ------------------------------ in-kernel helpers ------------------------------

def _ln(x, g, b, eps=1e-5):
    mu = jnp.mean(x, axis=-1, keepdims=True)
    var = jnp.mean(jnp.square(x - mu), axis=-1, keepdims=True)
    return (x - mu) * jax.lax.rsqrt(var + eps) * g + b


# -------------------------- fused encoder-layer kernel -------------------------

def _encoder_layer_kernel(x_ref, m_ref, wqkv_ref, bqkv_ref, wo_ref, bo_ref,
                          ln1_g_ref, ln1_b_ref, ln2_g_ref, ln2_b_ref,
                          w1_ref, b1_ref, w2_ref, b2_ref, *rest,
                          n_heads, scale, last, concat_heads):
    if last:
        pe_ref, o_ref = rest
    else:
        (o_ref,) = rest

    T, L, D = x_ref.shape
    dh = D // n_heads
    f32 = jnp.float32
    bf16 = jnp.bfloat16

    x2 = x_ref[...].astype(f32).reshape(T * L, D)              # residual stream, f32

    # ---------------- sublayer 0: x + MHA(LN1(x)) ----------------
    xn = _ln(x2, ln1_g_ref[...], ln1_b_ref[...]).astype(bf16)  # bf16 matmul operand
    # bf16 x bf16 -> f32 QKV projections; 1/sqrt(dh) folded into Q once (post-bias,
    # matching PyTorch's in-proj-then-scale).
    q = ((jnp.dot(xn, wqkv_ref[0], preferred_element_type=f32) + bqkv_ref[0])
         * f32(scale)).reshape(T, L, D)
    k = (jnp.dot(xn, wqkv_ref[1], preferred_element_type=f32)
         + bqkv_ref[1]).reshape(T, L, D)
    v = (jnp.dot(xn, wqkv_ref[2], preferred_element_type=f32)
         + bqkv_ref[2]).reshape(T, L, D)

    key_pad = m_ref[...] > 0.5                                 # (T, 1, L), True == padded
    neg = f32(-1e30)                                           # mask applied in f32

    if concat_heads:
        ctx_list = []
    else:
        attn = jnp.zeros((T * L, D), f32)
        wo_f32 = wo_ref[...].astype(f32)                       # fallback path slices f32

    for h in range(n_heads):                                   # static unroll over heads
        sl = slice(h * dh, (h + 1) * dh)
        qh = q[:, :, sl].astype(bf16)
        kh = k[:, :, sl].astype(bf16)
        vh = v[:, :, sl].astype(bf16)
        s = jnp.einsum('tqd,tkd->tqk', qh, kh,
                       preferred_element_type=f32)             # (T, L, L) f32 scores
        s = jnp.where(key_pad, neg, s)                         # broadcast over query dim
        m = jnp.max(s, axis=-1, keepdims=True)
        e = jnp.exp(s - m)
        inv = pl.reciprocal(jnp.sum(e, axis=-1, keepdims=True), approx=True)  # EUP slot
        p = (e * inv).astype(bf16)
        ctx = jnp.einsum('tqk,tkd->tqd', p, vh,
                         preferred_element_type=f32)           # (T, L, dh) f32
        if concat_heads:
            ctx_list.append(ctx.reshape(T * L, dh))
        else:
            # fallback: decomposed output projection (K=dh matmuls), known-good lowering
            attn = attn + jnp.dot(ctx.reshape(T * L, dh), wo_f32[sl, :],
                                  preferred_element_type=f32)

    if concat_heads:
        # merge heads on the lane axis, then ONE full-K output projection on the MXU
        if len(ctx_list) == 1:
            ctx_all = ctx_list[0]
        else:
            ctx_all = jnp.concatenate(ctx_list, axis=-1)       # (T*L, D) f32
        attn = jnp.dot(ctx_all.astype(bf16), wo_ref[...],
                       preferred_element_type=f32)

    x2 = x2 + attn + bo_ref[...]                               # residual add (f32)

    # ---------------- sublayer 1: x + FFN(LN2(x)) ----------------
    xn = _ln(x2, ln2_g_ref[...], ln2_b_ref[...]).astype(bf16)
    hdn = jnp.dot(xn, w1_ref[...], preferred_element_type=f32) + b1_ref[...]
    hdn = jnp.maximum(hdn, 0.0).astype(bf16)                   # ReLU
    x2 = x2 + jnp.dot(hdn, w2_ref[...], preferred_element_type=f32) + b2_ref[...]

    x3 = x2.reshape(T, L, D)
    if last:
        # final layer: write only the [CLS] (token-0) row and fuse the sentence-level PE
        o_ref[...] = (x3[:, 0:1, :] + pe_ref[...]).astype(o_ref.dtype)
    else:
        o_ref[...] = x3.astype(o_ref.dtype)


def encoder_layer(x, mask_f, lp, n_heads, block_sents, *, pe=None, last=False):
    """x: (BN, L, D) f32; mask_f: (BN, 1, L) f32 (1.0 == padded key)."""
    BN, L, D = x.shape
    Dff = lp["w1"].shape[1]
    T = block_sents
    dh = D // n_heads
    scale = 1.0 / math.sqrt(dh)
    concat_heads = _lane_concat_supported(dh, n_heads)

    kernel = functools.partial(_encoder_layer_kernel, n_heads=n_heads, scale=scale,
                               last=last, concat_heads=concat_heads)

    in_specs = [
        pl.BlockSpec((T, L, D), lambda i: (i, 0, 0)),          # x block
        pl.BlockSpec((T, 1, L), lambda i: (i, 0, 0)),          # key-padding mask block
        _const_spec((3, D, D)),                                # wqkv (bf16)
        _const_spec((3, 1, D)),                                # bqkv (f32)
        _const_spec((D, D)),                                   # wo   (bf16)
        _const_spec((1, D)),                                   # bo
        _const_spec((1, D)),                                   # ln1 gamma
        _const_spec((1, D)),                                   # ln1 beta
        _const_spec((1, D)),                                   # ln2 gamma
        _const_spec((1, D)),                                   # ln2 beta
        _const_spec((D, Dff)),                                 # w1   (bf16)
        _const_spec((1, Dff)),                                 # b1
        _const_spec((Dff, D)),                                 # w2   (bf16)
        _const_spec((1, D)),                                   # b2
    ]
    args = [x, mask_f, lp["wqkv"], lp["bqkv"], lp["wo"], lp["bo"],
            lp["ln1_g"], lp["ln1_b"], lp["ln2_g"], lp["ln2_b"],
            lp["w1"], lp["b1"], lp["w2"], lp["b2"]]

    if last:
        in_specs.append(pl.BlockSpec((T, 1, D), lambda i: (i, 0, 0)))   # PE rows
        args.append(pe)
        out_rows = 1
    else:
        out_rows = L

    return pl.pallas_call(
        kernel,
        out_shape=jax.ShapeDtypeStruct((BN, out_rows, D), x.dtype),
        grid_spec=pltpu.PrefetchScalarGridSpec(
            num_scalar_prefetch=0,
            grid=(BN // T,),
            in_specs=in_specs,
            out_specs=pl.BlockSpec((T, out_rows, D), lambda i: (i, 0, 0))),
        compiler_params=pltpu.CompilerParams(
            dimension_semantics=("parallel",),
            vmem_limit_bytes=_layer_vmem_limit(T, L, D, Dff)),
    )(*args)


# ----------------------- position-wise feed-forward head -----------------------

def _ffn_kernel(x_ref, w1_ref, b1_ref, w2_ref, b2_ref, o_ref):
    x = x_ref[...].astype(jnp.bfloat16)
    h = jnp.dot(x, w1_ref[...], preferred_element_type=jnp.float32) + b1_ref[...]
    h = jnp.maximum(h, 0.0).astype(jnp.bfloat16)               # ReLU
    y = jnp.dot(h, w2_ref[...], preferred_element_type=jnp.float32) + b2_ref[...]
    o_ref[...] = y.astype(o_ref.dtype)


def ffn(x, w1, b1, w2, b2, max_tile=512):
    N, D = x.shape
    Dff = w1.shape[1]
    tile = _pick_row_tile(N, max_tile)
    return pl.pallas_call(
        _ffn_kernel,
        out_shape=jax.ShapeDtypeStruct((N, D), x.dtype),
        grid_spec=pltpu.PrefetchScalarGridSpec(
            num_scalar_prefetch=0,
            grid=(N // tile,),
            in_specs=[pl.BlockSpec((tile, D), lambda i: (i, 0)),
                      _const_spec((D, Dff)),
                      _const_spec((1, Dff)),
                      _const_spec((Dff, D)),
                      _const_spec((1, D))],
            out_specs=pl.BlockSpec((tile, D), lambda i: (i, 0))),
        compiler_params=pltpu.CompilerParams(
            dimension_semantics=("parallel",),
            vmem_limit_bytes=_ffn_vmem_limit(tile, D, Dff)),
    )(x, w1, b1, w2, b2)


# -------------------------------- Encoder forward ------------------------------

def encoder_forward(token_ids, sent_mask, params, n_heads):
    """token_ids: (B, S, L) int32; sent_mask: (B, S, L) bool (True == pad)."""
    B, S, L = token_ids.shape
    D = params["emb"].shape[1]

    # Embeddings: lut(x) * sqrt(d_model); sqrt(D) pre-folded into the table at init so
    # no per-forward rescale of the table or the (B,S,L,D) activation happens.
    # TODO(synk): the embedding gather is data-dependent and stays in plain XLA.
    x = params["emb"][token_ids]                               # (B, S, L, D) f32

    BN = B * S
    x = x.reshape(BN, L, D)
    mask_f = sent_mask.reshape(BN, 1, L).astype(jnp.float32)   # key_padding_mask, 1.0==pad
    T = _pick_sentence_block(BN, L, _target_rows())

    # PE rows for the [CLS] token of each sentence, pre-expanded to (BN, 1, D) so the
    # last layer can fuse the PE add while writing only token 0 per sentence.
    pe_rows = jnp.broadcast_to(params["pe"][:S][None, :, :], (B, S, D)).reshape(BN, 1, D)

    n_layers = len(params["layers"])
    for li, lp in enumerate(params["layers"]):
        is_last = (li == n_layers - 1)
        x = encoder_layer(x, mask_f, lp, n_heads, T,
                          pe=pe_rows if is_last else None, last=is_last)

    # last layer already selected token 0 and added the positional encoding: (BN, 1, D)
    x = x.reshape(BN, D)

    # 'hier_lin' head: PositionwiseFeedForward
    out = ffn(x, params["lin_w1"], params["lin_b1"], params["lin_w2"], params["lin_b2"])
    return out.reshape(B, S, D)


# -------------------------------- Parameter init -------------------------------

def init_params(key, vocab, D, Dff, n_layers, max_len):
    keys = jax.random.split(key, 3 + n_layers)
    bf16 = jnp.bfloat16
    params = {
        # sqrt(D) embedding scale folded into the table once at init (not per forward).
        "emb": (jax.random.normal(keys[0], (vocab, D), jnp.float32) * 0.1
                * jnp.float32(math.sqrt(D))),
        "lin_w1": (jax.random.normal(keys[1], (D, Dff), jnp.float32) * 0.05).astype(bf16),
        "lin_b1": jnp.zeros((1, Dff), jnp.float32),
        "lin_w2": (jax.random.normal(keys[2], (Dff, D), jnp.float32) * 0.05).astype(bf16),
        "lin_b2": jnp.zeros((1, D), jnp.float32),
    }
    layers = []
    for l in range(n_layers):
        k = jax.random.split(keys[3 + l], 4)
        layers.append(dict(
            ln1_g=jnp.ones((1, D), jnp.float32), ln1_b=jnp.zeros((1, D), jnp.float32),
            ln2_g=jnp.ones((1, D), jnp.float32), ln2_b=jnp.zeros((1, D), jnp.float32),
            wqkv=(jax.random.normal(k[0], (3, D, D), jnp.float32) * 0.05).astype(bf16),
            bqkv=jnp.zeros((3, 1, D), jnp.float32),
            wo=(jax.random.normal(k[1], (D, D), jnp.float32) * 0.05).astype(bf16),
            bo=jnp.zeros((1, D), jnp.float32),
            w1=(jax.random.normal(k[2], (D, Dff), jnp.float32) * 0.05).astype(bf16),
            b1=jnp.zeros((1, Dff), jnp.float32),
            w2=(jax.random.normal(k[3], (Dff, D), jnp.float32) * 0.05).astype(bf16),
            b2=jnp.zeros((1, D), jnp.float32),
        ))
    params["layers"] = layers

    # sinusoidal positional encoding table (max_len, D)
    pos = jnp.arange(max_len, dtype=jnp.float32)[:, None]
    div = jnp.exp(jnp.arange(0, D, 2, dtype=jnp.float32) * (-math.log(10000.0) / D))
    pe = jnp.zeros((max_len, D), jnp.float32)
    pe = pe.at[:, 0::2].set(jnp.sin(pos * div))
    pe = pe.at[:, 1::2].set(jnp.cos(pos * div))
    params["pe"] = pe
    return params


# -------------------------------------- main ------------------------------------

if __name__ == "__main__":
    # small config consistent with the module
    B, S, L = 2, 4, 8          # batch, sentences per doc, tokens per sentence
    D, H, Dff = 32, 4, 64      # hidden_dim, n_heads, pff inner dim
    n_layers, vocab = 2, 50

    key = jax.random.PRNGKey(0)
    kp, kt = jax.random.split(key)
    params = init_params(kp, vocab, D, Dff, n_layers, max_len=S)

    token_ids = jax.random.randint(kt, (B, S, L), 0, vocab, dtype=jnp.int32)
    # key_padding_mask: True == padded token (last 2 positions of every sentence)
    sent_mask = jnp.broadcast_to(jnp.arange(L) >= L - 2, (B, S, L))

    out = encoder_forward(token_ids, sent_mask, params, n_heads=H)
    out = jax.block_until_ready(out)

    assert out.shape == (B, S, D)
    assert bool(jnp.all(jnp.isfinite(out)))
    print("KERNEL_OK")
</pallas_src>

<mosaic_0001>
module attributes {stable_mosaic.version = 11 : i64} {
  func.func @k(%arg0: memref<8x8xf32, #tpu.memory_space<vmem>>, %arg1: memref<8x8xf32, #tpu.memory_space<vmem>>, %arg2: memref<8x8xf32, #tpu.memory_space<vmem>>, %arg3: memref<8x8xf32, #tpu.memory_space<vmem>>, %arg4: memref<8x32xf32, #tpu.memory_space<vmem>>) attributes {dimension_semantics = [], scalar_prefetch = 0 : i64, scratch_operands = 0 : i64, tpu.core_type = #tpu.core_type<tc>} {
    %c0 = arith.constant 0 : index
    %c0_0 = arith.constant 0 : index
    %0 = vector.load %arg0[%c0, %c0_0] : memref<8x8xf32, #tpu.memory_space<vmem>>, vector<8x8xf32>
    %c0_1 = arith.constant 0 : index
    %c0_2 = arith.constant 0 : index
    %1 = vector.load %arg1[%c0_1, %c0_2] : memref<8x8xf32, #tpu.memory_space<vmem>>, vector<8x8xf32>
    %c0_3 = arith.constant 0 : index
    %c0_4 = arith.constant 0 : index
    %2 = vector.load %arg2[%c0_3, %c0_4] : memref<8x8xf32, #tpu.memory_space<vmem>>, vector<8x8xf32>
    %c0_5 = arith.constant 0 : index
    %c0_6 = arith.constant 0 : index
    %3 = vector.load %arg3[%c0_5, %c0_6] : memref<8x8xf32, #tpu.memory_space<vmem>>, vector<8x8xf32>
    %4 = tpu.concatenate %0, %1, %2, %3 in 1 : vector<8x8xf32>, vector<8x8xf32>, vector<8x8xf32>, vector<8x8xf32> -> vector<8x32xf32>
    %c0_7 = arith.constant 0 : index
    %c0_8 = arith.constant 0 : index
    %5 = vector.load %arg4[%c0_7, %c0_8] : memref<8x32xf32, #tpu.memory_space<vmem>>, vector<8x32xf32>
    tpu.vector_store %arg4[%c0_7, %c0_8], %4 {strides = array<i32>} : memref<8x32xf32, #tpu.memory_space<vmem>>, vector<8x32xf32>,
    return
  }
}

module attributes {stable_mosaic.version = 11 : i64} {
  func.func @k(%arg0: i32, %arg1: memref<8x128xf32, #tpu.memory_space<vmem>>, %arg2: memref<8x128xf32, #tpu.memory_space<vmem>>) attributes {dimension_semantics = [#tpu.dimension_semantics<arbitrary>], iteration_bounds = array<i64: 2>, scalar_prefetch = 0 : i64, scratch_operands = 0 : i64, tpu.core_type = #tpu.core_type<tc>, window_params = [{pipeline_mode = #tpu.pipeline_mode<synchronous>, transform_indices = @transform_0, window_bounds = array<i64: 8, 128>}, {transform_indices = @transform_1, window_bounds = array<i64: 8, 128>}]} {
    %c0 = arith.constant 0 : index
    %c0_0 = arith.constant 0 : index
    %0 = vector.load %arg1[%c0, %c0_0] : memref<8x128xf32, #tpu.memory_space<vmem>>, vector<8x128xf32>
    %cst = arith.constant 1.000000e+00 : f32
    %1 = vector.broadcast %cst : f32 to vector<8x128xf32>
    %2 = arith.addf %0, %1 : vector<8x128xf32>
    %c0_1 = arith.constant 0 : index
    %c0_2 = arith.constant 0 : index
    %3 = vector.load %arg2[%c0_1, %c0_2] : memref<8x128xf32, #tpu.memory_space<vmem>>, vector<8x128xf32>
    tpu.vector_store %arg2[%c0_1, %c0_2], %2 {strides = array<i32>} : memref<8x128xf32, #tpu.memory_space<vmem>>, vector<8x128xf32>,
    return
  }
  func.func @transform_0(%arg0: i32) -> (i32, i32) {
    %c0_i32 = arith.constant 0 : i32
    %c0_i32_0 = arith.constant 0 : i32
    %c0_i32_1 = arith.constant 0 : i32
    return %c0_i32, %c0_i32_0 : i32, i32
  }
  func.func @transform_1(%arg0: i32) -> (i32, i32) {
    %c0_i32 = arith.constant 0 : i32
    %c0_i32_0 = arith.constant 0 : i32
    return %arg0, %c0_i32 : i32, i32
  }
}

module attributes {stable_mosaic.version = 11 : i64} {
  func.func @_encoder_layer_kernel(%arg0: i32, %arg1: memref<4x8x32xf32, #tpu.memory_space<vmem>>, %arg2: memref<4x1x8xf32, #tpu.memory_space<vmem>>, %arg3: memref<3x32x32xbf16, #tpu.memory_space<vmem>>, %arg4: memref<3x1x32xf32, #tpu.memory_space<vmem>>, %arg5: memref<32x32xbf16, #tpu.memory_space<vmem>>, %arg6: memref<1x32xf32, #tpu.memory_space<vmem>>, %arg7: memref<1x32xf32, #tpu.memory_space<vmem>>, %arg8: memref<1x32xf32, #tpu.memory_space<vmem>>, %arg9: memref<1x32xf32, #tpu.memory_space<vmem>>, %arg10: memref<1x32xf32, #tpu.memory_space<vmem>>, %arg11: memref<32x64xbf16, #tpu.memory_space<vmem>>, %arg12: memref<1x64xf32, #tpu.memory_space<vmem>>, %arg13: memref<64x32xbf16, #tpu.memory_space<vmem>>, %arg14: memref<1x32xf32, #tpu.memory_space<vmem>>, %arg15: memref<4x8x32xf32, #tpu.memory_space<vmem>>) attributes {dimension_semantics = [#tpu.dimension_semantics<parallel>], iteration_bounds = array<i64: 2>, scalar_prefetch = 0 : i64, scratch_operands = 0 : i64, tpu.core_type = #tpu.core_type<tc>, window_params = [{transform_indices = @transform_0, window_bounds = array<i64: 4, 8, 32>}, {transform_indices = @transform_1, window_bounds = array<i64: 4, 1, 8>}, {pipeline_mode = #tpu.pipeline_mode<synchronous>, transform_indices = @transform_2, window_bounds = array<i64: 3, 32, 32>}, {pipeline_mode = #tpu.pipeline_mode<synchronous>, transform_indices = @transform_3, window_bounds = array<i64: 3, 1, 32>}, {pipeline_mode = #tpu.pipeline_mode<synchronous>, transform_indices = @transform_4, window_bounds = array<i64: 32, 32>}, {pipeline_mode = #tpu.pipeline_mode<synchronous>, transform_indices = @transform_5, window_bounds = array<i64: 1, 32>}, {pipeline_mode = #tpu.pipeline_mode<synchronous>, transform_indices = @transform_6, window_bounds = array<i64: 1, 32>}, {pipeline_mode = #tpu.pipeline_mode<synchronous>, transform_indices = @transform_7, window_bounds = array<i64: 1, 32>}, {pipeline_mode = #tpu.pipeline_mode<synchronous>, transform_indices = @transform_8, window_bounds = array<i64: 1, 32>}, {pipeline_mode = #tpu.pipeline_mode<synchronous>, transform_indices = @transform_9, window_bounds = array<i64: 1, 32>}, {pipeline_mode = #tpu.pipeline_mode<synchronous>, transform_indices = @transform_10, window_bounds = array<i64: 32, 64>}, {pipeline_mode = #tpu.pipeline_mode<synchronous>, transform_indices = @transform_11, window_bounds = array<i64: 1, 64>}, {pipeline_mode = #tpu.pipeline_mode<synchronous>, transform_indices = @transform_12, window_bounds = array<i64: 64, 32>}, {pipeline_mode = #tpu.pipeline_mode<synchronous>, transform_indices = @transform_13, window_bounds = array<i64: 1, 32>}, {transform_indices = @transform_14, window_bounds = array<i64: 4, 8, 32>}]} {
    %c0 = arith.constant 0 : index
    %c0_0 = arith.constant 0 : index
    %c0_1 = arith.constant 0 : index
    %0 = vector.load %arg1[%c0, %c0_0, %c0_1] : memref<4x8x32xf32, #tpu.memory_space<vmem>>, vector<4x8x32xf32>
    %1 = vector.shape_cast %0 : vector<4x8x32xf32> to vector<32x32xf32>
    %c0_2 = arith.constant 0 : index
    %c0_3 = arith.constant 0 : index
    %2 = vector.load %arg7[%c0_2, %c0_3] : memref<1x32xf32, #tpu.memory_space<vmem>>, vector<1x32xf32>
    %c0_4 = arith.constant 0 : index
    %c0_5 = arith.constant 0 : index
    %3 = vector.load %arg8[%c0_4, %c0_5] : memref<1x32xf32, #tpu.memory_space<vmem>>, vector<1x32xf32>
    %cst = arith.constant dense<0.000000e+00> : vector<32xf32>
    %4 = vector.multi_reduction <add>, %1, %cst [1] : vector<32x32xf32> to vector<32xf32>
    %5 = vector.shape_cast %4 : vector<32xf32> to vector<32x1xf32>
    %cst_6 = arith.constant 3.200000e+01 : f32
    %6 = vector.broadcast %cst_6 : f32 to vector<32x1xf32>
    %7 = arith.divf %5, %6 : vector<32x1xf32>
    %8 = vector.broadcast %7 : vector<32x1xf32> to vector<32x32xf32>
    %9 = arith.subf %1, %8 : vector<32x32xf32>
    %10 = arith.mulf %9, %9 : vector<32x32xf32>
    %cst_7 = arith.constant dense<0.000000e+00> : vector<32xf32>
    %11 = vector.multi_reduction <add>, %10, %cst_7 [1] : vector<32x32xf32> to vector<32xf32>
    %12 = vector.shape_cast %11 : vector<32xf32> to vector<32x1xf32>
    %cst_8 = arith.constant 3.200000e+01 : f32
    %13 = vector.broadcast %cst_8 : f32 to vector<32x1xf32>
    %14 = arith.divf %12, %13 : vector<32x1xf32>
    %15 = vector.broadcast %7 : vector<32x1xf32> to vector<32x32xf32>
    %16 = arith.subf %1, %15 : vector<32x32xf32>
    %cst_9 = arith.constant 9.99999974E-6 : f32
    %17 = vector.broadcast %cst_9 : f32 to vector<32x1xf32>
    %18 = arith.addf %14, %17 : vector<32x1xf32>
    %19 = math.rsqrt %18 : vector<32x1xf32>
    %20 = vector.broadcast %19 : vector<32x1xf32> to vector<32x32xf32>
    %21 = arith.mulf %16, %20 : vector<32x32xf32>
    %22 = vector.broadcast %2 : vector<1x32xf32> to vector<32x32xf32>
    %23 = arith.mulf %21, %22 : vector<32x32xf32>
    %24 = vector.broadcast %3 : vector<1x32xf32> to vector<32x32xf32>
    %25 = arith.addf %23, %24 : vector<32x32xf32>
    %26 = arith.truncf %25 : vector<32x32xf32> to vector<32x32xbf16>
    %c0_10 = arith.constant 0 : index
    %c0_11 = arith.constant 0 : index
    %c0_12 = arith.constant 0 : index
    %27 = vector.load %arg3[%c0_10, %c0_11, %c0_12] : memref<3x32x32xbf16, #tpu.memory_space<vmem>>, vector<1x32x32xbf16>
    %28 = vector.shape_cast %27 : vector<1x32x32xbf16> to vector<32x32xbf16>
    %cst_13 = arith.constant dense<0.000000e+00> : vector<32x32xf32>
    %29 = tpu.matmul %26, %28, %cst_13 {dimension_numbers = #tpu.dot_dimension_numbers<[1], [0], [0], [1], [0, 0, 1, 1], [], []>} : vector<32x32xbf16>, vector<32x32xbf16>, vector<32x32xf32> -> vector<32x32xf32>
    %c0_14 = arith.constant 0 : index
    %c0_15 = arith.constant 0 : index
    %c0_16 = arith.constant 0 : index
    %30 = vector.load %arg4[%c0_14, %c0_15, %c0_16] : memref<3x1x32xf32, #tpu.memory_space<vmem>>, vector<1x1x32xf32>
    %31 = vector.shape_cast %30 : vector<1x1x32xf32> to vector<1x32xf32>
    %32 = vector.broadcast %31 : vector<1x32xf32> to vector<32x32xf32>
    %33 = arith.addf %29, %32 : vector<32x32xf32>
    %cst_17 = arith.constant 0.353553385 : f32
    %34 = vector.broadcast %cst_17 : f32 to vector<32x32xf32>
    %35 = arith.mulf %33, %34 : vector<32x32xf32>
    %36 = vector.shape_cast %35 : vector<32x32xf32> to vector<4x8x32xf32>
    %c1 = arith.constant 1 : index
    %c0_18 = arith.constant 0 : index
    %c0_19 = arith.constant 0 : index
    %37 = vector.load %arg3[%c1, %c0_18, %c0_19] : memref<3x32x32xbf16, #tpu.memory_space<vmem>>, vector<1x32x32xbf16>
    %38 = vector.shape_cast %37 : vector<1x32x32xbf16> to vector<32x32xbf16>
    %cst_20 = arith.constant dense<0.000000e+00> : vector<32x32xf32>
    %39 = tpu.matmul %26, %38, %cst_20 {dimension_numbers = #tpu.dot_dimension_numbers<[1], [0], [0], [1], [0, 0, 1, 1], [], []>} : vector<32x32xbf16>, vector<32x32xbf16>, vector<32x32xf32> -> vector<32x32xf32>
    %c1_21 = arith.constant 1 : index
    %c0_22 = arith.constant 0 : index
    %c0_23 = arith.constant 0 : index
    %40 = vector.load %arg4[%c1_21, %c0_22, %c0_23] : memref<3x1x32xf32, #tpu.memory_space<vmem>>, vector<1x1x32xf32>
    %41 = vector.shape_cast %40 : vector<1x1x32xf32> to vector<1x32xf32>
    %42 = vector.broadcast %41 : vector<1x32xf32> to vector<32x32xf32>
    %43 = arith.addf %39, %42 : vector<32x32xf32>
    %44 = vector.shape_cast %43 : vector<32x32xf32> to vector<4x8x32xf32>
    %c2 = arith.constant 2 : index
    %c0_24 = arith.constant 0 : index
    %c0_25 = arith.constant 0 : index
    %45 = vector.load %arg3[%c2, %c0_24, %c0_25] : memref<3x32x32xbf16, #tpu.memory_space<vmem>>, vector<1x32x32xbf16>
    %46 = vector.shape_cast %45 : vector<1x32x32xbf16> to vector<32x32xbf16>
    %cst_26 = arith.constant dense<0.000000e+00> : vector<32x32xf32>
    %47 = tpu.matmul %26, %46, %cst_26 {dimension_numbers = #tpu.dot_dimension_numbers<[1], [0], [0], [1], [0, 0, 1, 1], [], []>} : vector<32x32xbf16>, vector<32x32xbf16>, vector<32x32xf32> -> vector<32x32xf32>
    %c2_27 = arith.constant 2 : index
    %c0_28 = arith.constant 0 : index
    %c0_29 = arith.constant 0 : index
    %48 = vector.load %arg4[%c2_27, %c0_28, %c0_29] : memref<3x1x32xf32, #tpu.memory_space<vmem>>, vector<1x1x32xf32>
    %49 = vector.shape_cast %48 : vector<1x1x32xf32> to vector<1x32xf32>
    %50 = vector.broadcast %49 : vector<1x32xf32> to vector<32x32xf32>
    %51 = arith.addf %47, %50 : vector<32x32xf32>
    %52 = vector.shape_cast %51 : vector<32x32xf32> to vector<4x8x32xf32>
    %c0_30 = arith.constant 0 : index
    %c0_31 = arith.constant 0 : index
    %c0_32 = arith.constant 0 : index
    %53 = vector.load %arg2[%c0_30, %c0_31, %c0_32] : memref<4x1x8xf32, #tpu.memory_space<vmem>>, vector<4x1x8xf32>
    %cst_33 = arith.constant 5.000000e-01 : f32
    %54 = vector.broadcast %cst_33 : f32 to vector<4x1x8xf32>
    %55 = arith.cmpf ogt, %53, %54 : vector<4x1x8xf32>
    %cst_34 = arith.constant 0.000000e+00 : f32
    %56 = vector.broadcast %cst_34 : f32 to vector<32x32xf32>
    %c0_35 = arith.constant 0 : index
    %c0_36 = arith.constant 0 : index
    %57 = vector.load %arg5[%c0_35, %c0_36] : memref<32x32xbf16, #tpu.memory_space<vmem>>, vector<32x32xbf16>
    %58 = arith.extf %57 : vector<32x32xbf16> to vector<32x32xf32>
    %59 = vector.extract_strided_slice %36 {offsets = [0, 0, 0], sizes = [4, 8, 8], strides = [1, 1, 1]} : vector<4x8x32xf32> to vector<4x8x8xf32>
    %60 = arith.truncf %59 : vector<4x8x8xf32> to vector<4x8x8xbf16>
    %61 = vector.extract_strided_slice %44 {offsets = [0, 0, 0], sizes = [4, 8, 8], strides = [1, 1, 1]} : vector<4x8x32xf32> to vector<4x8x8xf32>
    %62 = arith.truncf %61 : vector<4x8x8xf32> to vector<4x8x8xbf16>
    %63 = vector.extract_strided_slice %52 {offsets = [0, 0, 0], sizes = [4, 8, 8], strides = [1, 1, 1]} : vector<4x8x32xf32> to vector<4x8x8xf32>
    %64 = arith.truncf %63 : vector<4x8x8xf32> to vector<4x8x8xbf16>
    "tpu.trace_start"() <{level = 10 : i32, message = "tqd,tkd->tqk"}> : () -> ()
    %cst_37 = arith.constant dense<0.000000e+00> : vector<4x8x8xf32>
    %65 = tpu.matmul %60, %62, %cst_37 {dimension_numbers = #tpu.dot_dimension_numbers<[2], [2], [1], [1], [0, 0, 0, 1, 1, 1], [0], [0]>} : vector<4x8x8xbf16>, vector<4x8x8xbf16>, vector<4x8x8xf32> -> vector<4x8x8xf32>
    %cst_38 = arith.constant -1.000000e+30 : f32
    "tpu.trace_stop"() : () -> ()
    %66 = vector.shape_cast %55 : vector<4x1x8xi1> to vector<4x1x8xi1>
    %67 = vector.broadcast %66 : vector<4x1x8xi1> to vector<4x8x8xi1>
    %68 = vector.broadcast %cst_38 : f32 to vector<4x8x8xf32>
    %69 = arith.select %67, %68, %65 : vector<4x8x8xi1>, vector<4x8x8xf32>
    %cst_39 = arith.constant dense<0xFF800000> : vector<4x8xf32>
    %70 = vector.multi_reduction <maximumf>, %69, %cst_39 [2] : vector<4x8x8xf32> to vector<4x8xf32>
    %71 = vector.shape_cast %70 : vector<4x8xf32> to vector<4x8x1xf32>
    %72 = vector.broadcast %71 : vector<4x8x1xf32> to vector<4x8x8xf32>
    %73 = arith.subf %69, %72 : vector<4x8x8xf32>
    %74 = math.exp %73 : vector<4x8x8xf32>
    %cst_40 = arith.constant dense<0.000000e+00> : vector<4x8xf32>
    %75 = vector.multi_reduction <add>, %74, %cst_40 [2] : vector<4x8x8xf32> to vector<4x8xf32>
    %76 = vector.shape_cast %75 : vector<4x8xf32> to vector<4x8x1xf32>
    %77 = tpu.reciprocal %76 {approx = true} : vector<4x8x1xf32> -> vector<4x8x1xf32>
    %78 = vector.broadcast %77 : vector<4x8x1xf32> to vector<4x8x8xf32>
    %79 = arith.mulf %74, %78 : vector<4x8x8xf32>
    %80 = arith.truncf %79 : vector<4x8x8xf32> to vector<4x8x8xbf16>
    "tpu.trace_start"() <{level = 10 : i32, message = "tqk,tkd->tqd"}> : () -> ()
    %cst_41 = arith.constant dense<0.000000e+00> : vector<4x8x8xf32>
    %81 = tpu.matmul %80, %64, %cst_41 {dimension_numbers = #tpu.dot_dimension_numbers<[2], [1], [1], [2], [0, 0, 0, 1, 1, 2], [0], [0]>} : vector<4x8x8xbf16>, vector<4x8x8xbf16>, vector<4x8x8xf32> -> vector<4x8x8xf32>
    "tpu.trace_stop"() : () -> ()
    %82 = vector.shape_cast %81 : vector<4x8x8xf32> to vector<32x8xf32>
    %83 = vector.extract_strided_slice %58 {offsets = [0, 0], sizes = [8, 32], strides = [1, 1]} : vector<32x32xf32> to vector<8x32xf32>
    %cst_42 = arith.constant dense<0.000000e+00> : vector<32x32xf32>
    %84 = tpu.matmul %82, %83, %cst_42 {dimension_numbers = #tpu.dot_dimension_numbers<[1], [0], [0], [1], [0, 0, 1, 1], [], []>} : vector<32x8xf32>, vector<8x32xf32>, vector<32x32xf32> -> vector<32x32xf32>
    %85 = arith.addf %56, %84 : vector<32x32xf32>
    %86 = vector.extract_strided_slice %36 {offsets = [0, 0, 8], sizes = [4, 8, 8], strides = [1, 1, 1]} : vector<4x8x32xf32> to vector<4x8x8xf32>
    %87 = arith.truncf %86 : vector<4x8x8xf32> to vector<4x8x8xbf16>
    %88 = vector.extract_strided_slice %44 {offsets = [0, 0, 8], sizes = [4, 8, 8], strides = [1, 1, 1]} : vector<4x8x32xf32> to vector<4x8x8xf32>
    %89 = arith.truncf %88 : vector<4x8x8xf32> to vector<4x8x8xbf16>
    %90 = vector.extract_strided_slice %52 {offsets = [0, 0, 8], sizes = [4, 8, 8], strides = [1, 1, 1]} : vector<4x8x32xf32> to vector<4x8x8xf32>
    %91 = arith.truncf %90 : vector<4x8x8xf32> to vector<4x8x8xbf16>
    "tpu.trace_start"() <{level = 10 : i32, message = "tqd,tkd->tqk"}> : () -> ()
    %cst_43 = arith.constant dense<0.000000e+00> : vector<4x8x8xf32>
    %92 = tpu.matmul %87, %89, %cst_43 {dimension_numbers = #tpu.dot_dimension_numbers<[2], [2], [1], [1], [0, 0, 0, 1, 1, 1], [0], [0]>} : vector<4x8x8xbf16>, vector<4x8x8xbf16>, vector<4x8x8xf32> -> vector<4x8x8xf32>
    %cst_44 = arith.constant -1.000000e+30 : f32
    "tpu.trace_stop"() : () -> ()
    %93 = vector.shape_cast %55 : vector<4x1x8xi1> to vector<4x1x8xi1>
    %94 = vector.broadcast %93 : vector<4x1x8xi1> to vector<4x8x8xi1>
    %95 = vector.broadcast %cst_44 : f32 to vector<4x8x8xf32>
    %96 = arith.select %94, %95, %92 : vector<4x8x8xi1>, vector<4x8x8xf32>
    %cst_45 = arith.constant dense<0xFF800000> : vector<4x8xf32>
    %97 = vector.multi_reduction <maximumf>, %96, %cst_45 [2] : vector<4x8x8xf32> to vector<4x8xf32>
    %98 = vector.shape_cast %97 : vector<4x8xf32> to vector<4x8x1xf32>
    %99 = vector.broadcast %98 : vector<4x8x1xf32> to vector<4x8x8xf32>
    %100 = arith.subf %96, %99 : vector<4x8x8xf32>
    %101 = math.exp %100 : vector<4x8x8xf32>
    %cst_46 = arith.constant dense<0.000000e+00> : vector<4x8xf32>
    %102 = vector.multi_reduction <add>, %101, %cst_46 [2] : vector<4x8x8xf32> to vector<4x8xf32>
    %103 = vector.shape_cast %102 : vector<4x8xf32> to vector<4x8x1xf32>
    %104 = tpu.reciprocal %103 {approx = true} : vector<4x8x1xf32> -> vector<4x8x1xf32>
    %105 = vector.broadcast %104 : vector<4x8x1xf32> to vector<4x8x8xf32>
    %106 = arith.mulf %101, %105 : vector<4x8x8xf32>
    %107 = arith.truncf %106 : vector<4x8x8xf32> to vector<4x8x8xbf16>
    "tpu.trace_start"() <{level = 10 : i32, message = "tqk,tkd->tqd"}> : () -> ()
    %cst_47 = arith.constant dense<0.000000e+00> : vector<4x8x8xf32>
    %108 = tpu.matmul %107, %91, %cst_47 {dimension_numbers = #tpu.dot_dimension_numbers<[2], [1], [1], [2], [0, 0, 0, 1, 1, 2], [0], [0]>} : vector<4x8x8xbf16>, vector<4x8x8xbf16>, vector<4x8x8xf32> -> vector<4x8x8xf32>
    "tpu.trace_stop"() : () -> ()
    %109 = vector.shape_cast %108 : vector<4x8x8xf32> to vector<32x8xf32>
    %110 = vector.extract_strided_slice %58 {offsets = [8, 0], sizes = [8, 32], strides = [1, 1]} : vector<32x32xf32> to vector<8x32xf32>
    %cst_48 = arith.constant dense<0.000000e+00> : vector<32x32xf32>
    %111 = tpu.matmul %109, %110, %cst_48 {dimension_numbers = #tpu.dot_dimension_numbers<[1], [0], [0], [1], [0, 0, 1, 1], [], []>} : vector<32x8xf32>, vector<8x32xf32>, vector<32x32xf32> -> vector<32x32xf32>
    %112 = arith.addf %85, %111 : vector<32x32xf32>
    %113 = vector.extract_strided_slice %36 {offsets = [0, 0, 16], sizes = [4, 8, 8], strides = [1, 1, 1]} : vector<4x8x32xf32> to vector<4x8x8xf32>
    %114 = arith.truncf %113 : vector<4x8x8xf32> to vector<4x8x8xbf16>
    %115 = vector.extract_strided_slice %44 {offsets = [0, 0, 16], sizes = [4, 8, 8], strides = [1, 1, 1]} : vector<4x8x32xf32> to vector<4x8x8xf32>
    %116 = arith.truncf %115 : vector<4x8x8xf32> to vector<4x8x8xbf16>
    %117 = vector.extract_strided_slice %52 {offsets = [0, 0, 16], sizes = [4, 8, 8], strides = [1, 1, 1]} : vector<4x8x32xf32> to vector<4x8x8xf32>
    %118 = arith.truncf %117 : vector<4x8x8xf32> to vector<4x8x8xbf16>
    "tpu.trace_start"() <{level = 10 : i32, message = "tqd,tkd->tqk"}> : () -> ()
    %cst_49 = arith.constant dense<0.000000e+00> : vector<4x8x8xf32>
    %119 = tpu.matmul %114, %116, %cst_49 {dimension_numbers = #tpu.dot_dimension_numbers<[2], [2], [1], [1], [0, 0, 0, 1, 1, 1], [0], [0]>} : vector<4x8x8xbf16>, vector<4x8x8xbf16>, vector<4x8x8xf32> -> vector<4x8x8xf32>
    %cst_50 = arith.constant -1.000000e+30 : f32
    "tpu.trace_stop"() : () -> ()
    %120 = vector.shape_cast %55 : vector<4x1x8xi1> to vector<4x1x8xi1>
    %121 = vector.broadcast %120 : vector<4x1x8xi1> to vector<4x8x8xi1>
    %122 = vector.broadcast %cst_50 : f32 to vector<4x8x8xf32>
    %123 = arith.select %121, %122, %119 : vector<4x8x8xi1>, vector<4x8x8xf32>
    %cst_51 = arith.constant dense<0xFF800000> : vector<4x8xf32>
    %124 = vector.multi_reduction <maximumf>, %123, %cst_51 [2] : vector<4x8x8xf32> to vector<4x8xf32>
    %125 = vector.shape_cast %124 : vector<4x8xf32> to vector<4x8x1xf32>
    %126 = vector.broadcast %125 : vector<4x8x1xf32> to vector<4x8x8xf32>
    %127 = arith.subf %123, %126 : vector<4x8x8xf32>
    %128 = math.exp %127 : vector<4x8x8xf32>
    %cst_52 = arith.constant dense<0.000000e+00> : vector<4x8xf32>
    %129 = vector.multi_reduction <add>, %128, %cst_52 [2] : vector<4x8x8xf32> to vector<4x8xf32>
    %130 = vector.shape_cast %129 : vector<4x8xf32> to vector<4x8x1xf32>
    %131 = tpu.reciprocal %130 {approx = true} : vector<4x8x1xf32> -> vector<4x8x1xf32>
    %132 = vector.broadcast %131 : vector<4x8x1xf32> to vector<4x8x8xf32>
    %133 = arith.mulf %128, %132 : vector<4x8x8xf32>
    %134 = arith.truncf %133 : vector<4x8x8xf32> to vector<4x8x8xbf16>
    "tpu.trace_start"() <{level = 10 : i32, message = "tqk,tkd->tqd"}> : () -> ()
    %cst_53 = arith.constant dense<0.000000e+00> : vector<4x8x8xf32>
    %135 = tpu.matmul %134, %118, %cst_53 {dimension_numbers = #tpu.dot_dimension_numbers<[2], [1], [1], [2], [0, 0, 0, 1, 1, 2], [0], [0]>} : vector<4x8x8xbf16>, vector<4x8x8xbf16>, vector<4x8x8xf32> -> vector<4x8x8xf32>
    "tpu.trace_stop"() : () -> ()
    %136 = vector.shape_cast %135 : vector<4x8x8xf32> to vector<32x8xf32>
    %137 = vector.extract_strided_slice %58 {offsets = [16, 0], sizes = [8, 32], strides = [1, 1]} : vector<32x32xf32> to vector<8x32xf32>
    %cst_54 = arith.constant dense<0.000000e+00> : vector<32x32xf32>
    %138 = tpu.matmul %136, %137, %cst_54 {dimension_numbers = #tpu.dot_dimension_numbers<[1], [0], [0], [1], [0, 0, 1, 1], [], []>} : vector<32x8xf32>, vector<8x32xf32>, vector<32x32xf32> -> vector<32x32xf32>
    %139 = arith.addf %112, %138 : vector<32x32xf32>
    %140 = vector.extract_strided_slice %36 {offsets = [0, 0, 24], sizes = [4, 8, 8], strides = [1, 1, 1]} : vector<4x8x32xf32> to vector<4x8x8xf32>
    %141 = arith.truncf %140 : vector<4x8x8xf32> to vector<4x8x8xbf16>
    %142 = vector.extract_strided_slice %44 {offsets = [0, 0, 24], sizes = [4, 8, 8], strides = [1, 1, 1]} : vector<4x8x32xf32> to vector<4x8x8xf32>
    %143 = arith.truncf %142 : vector<4x8x8xf32> to vector<4x8x8xbf16>
    %144 = vector.extract_strided_slice %52 {offsets = [0, 0, 24], sizes = [4, 8, 8], strides = [1, 1, 1]} : vector<4x8x32xf32> to vector<4x8x8xf32>
    %145 = arith.truncf %144 : vector<4x8x8xf32> to vector<4x8x8xbf16>
    "tpu.trace_start"() <{level = 10 : i32, message = "tqd,tkd->tqk"}> : () -> ()
    %cst_55 = arith.constant dense<0.000000e+00> : vector<4x8x8xf32>
    %146 = tpu.matmul %141, %143, %cst_55 {dimension_numbers = #tpu.dot_dimension_numbers<[2], [2], [1], [1], [0, 0, 0, 1, 1, 1], [0], [0]>} : vector<4x8x8xbf16>, vector<4x8x8xbf16>, vector<4x8x8xf32> -> vector<4x8x8xf32>
    %cst_56 = arith.constant -1.000000e+30 : f32
    "tpu.trace_stop"() : () -> ()
    %147 = vector.shape_cast %55 : vector<4x1x8xi1> to vector<4x1x8xi1>
    %148 = vector.broadcast %147 : vector<4x1x8xi1> to vector<4x8x8xi1>
    %149 = vector.broadcast %cst_56 : f32 to vector<4x8x8xf32>
    %150 = arith.select %148, %149, %146 : vector<4x8x8xi1>, vector<4x8x8xf32>
    %cst_57 = arith.constant dense<0xFF800000> : vector<4x8xf32>
    %151 = vector.multi_reduction <maximumf>, %150, %cst_57 [2] : vector<4x8x8xf32> to vector<4x8xf32>
    %152 = vector.shape_cast %151 : vector<4x8xf32> to vector<4x8x1xf32>
    %153 = vector.broadcast %152 : vector<4x8x1xf32> to vector<4x8x8xf32>
    %154 = arith.subf %150, %153 : vector<4x8x8xf32>
    %155 = math.exp %154 : vector<4x8x8xf32>
    %cst_58 = arith.constant dense<0.000000e+00> : vector<4x8xf32>
    %156 = vector.multi_reduction <add>, %155, %cst_58 [2] : vector<4x8x8xf32> to vector<4x8xf32>
    %157 = vector.shape_cast %156 : vector<4x8xf32> to vector<4x8x1xf32>
    %158 = tpu.reciprocal %157 {approx = true} : vector<4x8x1xf32> -> vector<4x8x1xf32>
    %159 = vector.broadcast %158 : vector<4x8x1xf32> to vector<4x8x8xf32>
    %160 = arith.mulf %155, %159 : vector<4x8x8xf32>
    %161 = arith.truncf %160 : vector<4x8x8xf32> to vector<4x8x8xbf16>
    "tpu.trace_start"() <{level = 10 : i32, message = "tqk,tkd->tqd"}> : () -> ()
    %cst_59 = arith.constant dense<0.000000e+00> : vector<4x8x8xf32>
    %162 = tpu.matmul %161, %145, %cst_59 {dimension_numbers = #tpu.dot_dimension_numbers<[2], [1], [1], [2], [0, 0, 0, 1, 1, 2], [0], [0]>} : vector<4x8x8xbf16>, vector<4x8x8xbf16>, vector<4x8x8xf32> -> vector<4x8x8xf32>
    "tpu.trace_stop"() : () -> ()
    %163 = vector.shape_cast %162 : vector<4x8x8xf32> to vector<32x8xf32>
    %164 = vector.extract_strided_slice %58 {offsets = [24, 0], sizes = [8, 32], strides = [1, 1]} : vector<32x32xf32> to vector<8x32xf32>
    %cst_60 = arith.constant dense<0.000000e+00> : vector<32x32xf32>
    %165 = tpu.matmul %163, %164, %cst_60 {dimension_numbers = #tpu.dot_dimension_numbers<[1], [0], [0], [1], [0, 0, 1, 1], [], []>} : vector<32x8xf32>, vector<8x32xf32>, vector<32x32xf32> -> vector<32x32xf32>
    %166 = arith.addf %139, %165 : vector<32x32xf32>
    %167 = arith.addf %1, %166 : vector<32x32xf32>
    %c0_61 = arith.constant 0 : index
    %c0_62 = arith.constant 0 : index
    %168 = vector.load %arg6[%c0_61, %c0_62] : memref<1x32xf32, #tpu.memory_space<vmem>>, vector<1x32xf32>
    %169 = vector.broadcast %168 : vector<1x32xf32> to vector<32x32xf32>
    %170 = arith.addf %167, %169 : vector<32x32xf32>
    %c0_63 = arith.constant 0 : index
    %c0_64 = arith.constant 0 : index
    %171 = vector.load %arg9[%c0_63, %c0_64] : memref<1x32xf32, #tpu.memory_space<vmem>>, vector<1x32xf32>
    %c0_65 = arith.constant 0 : index
    %c0_66 = arith.constant 0 : index
    %172 = vector.load %arg10[%c0_65, %c0_66] : memref<1x32xf32, #tpu.memory_space<vmem>>, vector<1x32xf32>
    %cst_67 = arith.constant dense<0.000000e+00> : vector<32xf32>
    %173 = vector.multi_reduction <add>, %170, %cst_67 [1] : vector<32x32xf32> to vector<32xf32>
    %174 = vector.shape_cast %173 : vector<32xf32> to vector<32x1xf32>
    %cst_68 = arith.constant 3.200000e+01 : f32
    %175 = vector.broadcast %cst_68 : f32 to vector<32x1xf32>
    %176 = arith.divf %174, %175 : vector<32x1xf32>
    %177 = vector.broadcast %176 : vector<32x1xf32> to vector<32x32xf32>
    %178 = arith.subf %170, %177 : vector<32x32xf32>
    %179 = arith.mulf %178, %178 : vector<32x32xf32>
    %cst_69 = arith.constant dense<0.000000e+00> : vector<32xf32>
    %180 = vector.multi_reduction <add>, %179, %cst_69 [1] : vector<32x32xf32> to vector<32xf32>
    %181 = vector.shape_cast %180 : vector<32xf32> to vector<32x1xf32>
    %cst_70 = arith.constant 3.200000e+01 : f32
    %182 = vector.broadcast %cst_70 : f32 to vector<32x1xf32>
    %183 = arith.divf %181, %182 : vector<32x1xf32>
    %184 = vector.broadcast %176 : vector<32x1xf32> to vector<32x32xf32>
    %185 = arith.subf %170, %184 : vector<32x32xf32>
    %cst_71 = arith.constant 9.99999974E-6 : f32
    %186 = vector.broadcast %cst_71 : f32 to vector<32x1xf32>
    %187 = arith.addf %183, %186 : vector<32x1xf32>
    %188 = math.rsqrt %187 : vector<32x1xf32>
    %189 = vector.broadcast %188 : vector<32x1xf32> to vector<32x32xf32>
    %190 = arith.mulf %185, %189 : vector<32x32xf32>
    %191 = vector.broadcast %171 : vector<1x32xf32> to vector<32x32xf32>
    %192 = arith.mulf %190, %191 : vector<32x32xf32>
    %193 = vector.broadcast %172 : vector<1x32xf32> to vector<32x32xf32>
    %194 = arith.addf %192, %193 : vector<32x32xf32>
    %195 = arith.truncf %194 : vector<32x32xf32> to vector<32x32xbf16>
    %c0_72 = arith.constant 0 : index
    %c0_73 = arith.constant 0 : index
    %196 = vector.load %arg11[%c0_72, %c0_73] : memref<32x64xbf16, #tpu.memory_space<vmem>>, vector<32x64xbf16>
    %cst_74 = arith.constant dense<0.000000e+00> : vector<32x64xf32>
    %197 = tpu.matmul %195, %196, %cst_74 {dimension_numbers = #tpu.dot_dimension_numbers<[1], [0], [0], [1], [0, 0, 1, 1], [], []>} : vector<32x32xbf16>, vector<32x64xbf16>, vector<32x64xf32> -> vector<32x64xf32>
    %c0_75 = arith.constant 0 : index
    %c0_76 = arith.constant 0 : index
    %198 = vector.load %arg12[%c0_75, %c0_76] : memref<1x64xf32, #tpu.memory_space<vmem>>, vector<1x64xf32>
    %199 = vector.broadcast %198 : vector<1x64xf32> to vector<32x64xf32>
    %200 = arith.addf %197, %199 : vector<32x64xf32>
    %cst_77 = arith.constant 0.000000e+00 : f32
    %201 = vector.broadcast %cst_77 : f32 to vector<32x64xf32>
    %202 = arith.maximumf %200, %201 : vector<32x64xf32>
    %203 = arith.truncf %202 : vector<32x64xf32> to vector<32x64xbf16>
    %c0_78 = arith.constant 0 : index
    %c0_79 = arith.constant 0 : index
    %204 = vector.load %arg13[%c0_78, %c0_79] : memref<64x32xbf16, #tpu.memory_space<vmem>>, vector<64x32xbf16>
    %cst_80 = arith.constant dense<0.000000e+00> : vector<32x32xf32>
    %205 = tpu.matmul %203, %204, %cst_80 {dimension_numbers = #tpu.dot_dimension_numbers<[1], [0], [0], [1], [0, 0, 1, 1], [], []>} : vector<32x64xbf16>, vector<64x32xbf16>, vector<32x32xf32> -> vector<32x32xf32>
    %206 = arith.addf %170, %205 : vector<32x32xf32>
    %c0_81 = arith.constant 0 : index
    %c0_82 = arith.constant 0 : index
    %207 = vector.load %arg14[%c0_81, %c0_82] : memref<1x32xf32, #tpu.memory_space<vmem>>, vector<1x32xf32>
    %208 = vector.broadcast %207 : vector<1x32xf32> to vector<32x32xf32>
    %209 = arith.addf %206, %208 : vector<32x32xf32>
    %210 = vector.shape_cast %209 : vector<32x32xf32> to vector<4x8x32xf32>
    %c0_83 = arith.constant 0 : index
    %c0_84 = arith.constant 0 : index
    %c0_85 = arith.constant 0 : index
    %211 = vector.load %arg15[%c0_83, %c0_84, %c0_85] : memref<4x8x32xf32, #tpu.memory_space<vmem>>, vector<4x8x32xf32>
    tpu.vector_store %arg15[%c0_83, %c0_84, %c0_85], %210 {strides = array<i32>} : memref<4x8x32xf32, #tpu.memory_space<vmem>>, vector<4x8x32xf32>,
    return
  }
  func.func @transform_0(%arg0: i32) -> (i32, i32, i32) {
    %c0_i32 = arith.constant 0 : i32
    %c0_i32_0 = arith.constant 0 : i32
    %c0_i32_1 = arith.constant 0 : i32
    return %arg0, %c0_i32, %c0_i32_0 : i32, i32, i32
  }
  func.func @transform_1(%arg0: i32) -> (i32, i32, i32) {
    %c0_i32 = arith.constant 0 : i32
    %c0_i32_0 = arith.constant 0 : i32
    %c0_i32_1 = arith.constant 0 : i32
    return %arg0, %c0_i32, %c0_i32_0 : i32, i32, i32
  }
  func.func @transform_2(%arg0: i32) -> (i32, i32, i32) {
    %c0_i32 = arith.constant 0 : i32
    %c0_i32_0 = arith.constant 0 : i32
    %c0_i32_1 = arith.constant 0 : i32
    %c0_i32_2 = arith.constant 0 : i32
    return %c0_i32, %c0_i32_0, %c0_i32_1 : i32, i32, i32
  }
  func.func @transform_3(%arg0: i32) -> (i32, i32, i32) {
    %c0_i32 = arith.constant 0 : i32
    %c0_i32_0 = arith.constant 0 : i32
    %c0_i32_1 = arith.constant 0 : i32
    %c0_i32_2 = arith.constant 0 : i32
    return %c0_i32, %c0_i32_0, %c0_i32_1 : i32, i32, i32
  }
  func.func @transform_4(%arg0: i32) -> (i32, i32) {
    %c0_i32 = arith.constant 0 : i32
    %c0_i32_0 = arith.constant 0 : i32
    %c0_i32_1 = arith.constant 0 : i32
    return %c0_i32, %c0_i32_0 : i32, i32
  }
  func.func @transform_5(%arg0: i32) -> (i32, i32) {
    %c0_i32 = arith.constant 0 : i32
    %c0_i32_0 = arith.constant 0 : i32
    %c0_i32_1 = arith.constant 0 : i32
    return %c0_i32, %c0_i32_0 : i32, i32
  }
  func.func @transform_6(%arg0: i32) -> (i32, i32) {
    %c0_i32 = arith.constant 0 : i32
    %c0_i32_0 = arith.constant 0 : i32
    %c0_i32_1 = arith.constant 0 : i32
    return %c0_i32, %c0_i32_0 : i32, i32
  }
  func.func @transform_7(%arg0: i32) -> (i32, i32) {
    %c0_i32 = arith.constant 0 : i32
    %c0_i32_0 = arith.constant 0 : i32
    %c0_i32_1 = arith.constant 0 : i32
    return %c0_i32, %c0_i32_0 : i32, i32
  }
  func.func @transform_8(%arg0: i32) -> (i32, i32) {
    %c0_i32 = arith.constant 0 : i32
    %c0_i32_0 = arith.constant 0 : i32
    %c0_i32_1 = arith.constant 0 : i32
    return %c0_i32, %c0_i32_0 : i32, i32
  }
  func.func @transform_9(%arg0: i32) -> (i32, i32) {
    %c0_i32 = arith.constant 0 : i32
    %c0_i32_0 = arith.constant 0 : i32
    %c0_i32_1 = arith.constant 0 : i32
    return %c0_i32, %c0_i32_0 : i32, i32
  }
  func.func @transform_10(%arg0: i32) -> (i32, i32) {
    %c0_i32 = arith.constant 0 : i32
    %c0_i32_0 = arith.constant 0 : i32
    %c0_i32_1 = arith.constant 0 : i32
    return %c0_i32, %c0_i32_0 : i32, i32
  }
  func.func @transform_11(%arg0: i32) -> (i32, i32) {
    %c0_i32 = arith.constant 0 : i32
    %c0_i32_0 = arith.constant 0 : i32
    %c0_i32_1 = arith.constant 0 : i32
    return %c0_i32, %c0_i32_0 : i32, i32
  }
  func.func @transform_12(%arg0: i32) -> (i32, i32) {
    %c0_i32 = arith.constant 0 : i32
    %c0_i32_0 = arith.constant 0 : i32
    %c0_i32_1 = arith.constant 0 : i32
    return %c0_i32, %c0_i32_0 : i32, i32
  }
  func.func @transform_13(%arg0: i32) -> (i32, i32) {
    %c0_i32 = arith.constant 0 : i32
    %c0_i32_0 = arith.constant 0 : i32
    %c0_i32_1 = arith.constant 0 : i32
    return %c0_i32, %c0_i32_0 : i32, i32
  }
  func.func @transform_14(%arg0: i32) -> (i32, i32, i32) {
    %c0_i32 = arith.constant 0 : i32
    %c0_i32_0 = arith.constant 0 : i32
    %c0_i32_1 = arith.constant 0 : i32
    return %arg0, %c0_i32, %c0_i32_0 : i32, i32, i32
  }
}

</mosaic_0001>

<bundles_post_ra>
// kernel: tpu_custom_call.1
= control target key start
LH: loop header
LB: loop body
LE: loop exit
PB: predicated region body
PF: predicated region fallthrough
CT: control target
= control target key end

     0   :  { %9 = vsyncpa [#allocation3], 0  ;;  %s277_s0 = inlined_call_operand.hbm [shape: f32[8,8], index: 0, kind: input, shape index: {}]   ;;  %s278_s1 = inlined_call_operand.hbm [shape: f32[8,8], index: 1, kind: input, shape index: {}]   ;;  %s279_s2 = inlined_call_operand.hbm [shape: f32[8,8], index: 2, kind: input, shape index: {}]   ;;  %s280_s3 = inlined_call_operand.vmem [shape: f32[8,8], index: 3, kind: input, shape index: {}]   ;;  %s281_s4 = inlined_call_operand.hbm [shape: f32[8,32], index: 4, kind: output, shape index: {}]  }
   0x1   :  { %10 = vsyncpa [#allocation6], 0 }
   0x2   :  { %11 = vsyncpa [#allocation4], 0  ;;  %s194_s15 = smov [#allocation5]   ;;  %s195_s17 = smov [#allocation2]  }
   0x3   :  { %s28_s16 = sshll.u32 %s194_s15, 4  ;;  %s18_s18 = sshll.u32 %s195_s17, 4  ;;  %s29_s16 = int_to_ptr.vmem [resolvable:$true] %s28_s16  ;;  %s19_s18 = int_to_ptr.vmem [resolvable:$true] %s18_s18 }
   0x4   :  { %s100_s21 = scalar_lea.hbm %s278_s1, 128 }
   0x5   :  { %p101_p0 = scmp.ne.s32.totalorder %s278_s1, %s100_s21  ;;  %p104_p1 = scmp.lt.u32.totalorder %s100_s21, %s278_s1 }
   0x7   :  { %p106_p2 = pnand %p104_p1, %p101_p0 }
   0x9   :  { %109 = shalt.err (!%p106_p2)
}
   0xa   :  { %s110_s26 = scalar_lea.vmem %s29_s16, 128  ;;  %p115_p4 = scmp.lt.s32.totalorder %s29_s16, %s29_s16 }
   0xb   :  { %p111_p3 = scmp.ne.s32.totalorder %s29_s16, %s110_s26  ;;  %p116_p5 = scmp.lt.s32.totalorder %s110_s26, %s110_s26 }
   0xd   :  { %p117_p6 = por %p116_p5, %p115_p4 }
   0xf   :  { %p118_p7 = pnand %p117_p6, %p111_p3 }
  0x11   :  { %121 = shalt.err (!%p118_p7)
}
  0x12   :  { %31 = dma.hbm_to_vmem [thread:$0]  %s278_s1, 128, %s29_s16, [#allocation6]  }
  0x13   :  { %s122_s5 = scalar_lea.hbm %s277_s0, 128 }
  0x14   :  { %p123_p8 = scmp.ne.s32.totalorder %s277_s0, %s122_s5  ;;  %p126_p9 = scmp.lt.u32.totalorder %s122_s5, %s277_s0 }
  0x16   :  { %p128_p10 = pnand %p126_p9, %p123_p8 }
  0x18   :  { %131 = shalt.err (!%p128_p10)
}
  0x19   :  { %s132_s10 = scalar_lea.vmem %s19_s18, 128  ;;  %p137_p12 = scmp.lt.s32.totalorder %s19_s18, %s19_s18 }
  0x1a   :  { %p133_p11 = scmp.ne.s32.totalorder %s19_s18, %s132_s10  ;;  %p138_p13 = scmp.lt.s32.totalorder %s132_s10, %s132_s10 }
  0x1c   :  { %p139_p0 = por %p138_p13, %p137_p12 }
  0x1e   :  { %p140_p1 = pnand %p139_p0, %p133_p11 }
  0x20   :  { %143 = shalt.err (!%p140_p1)
}
  0x21   :  { %21 = dma.hbm_to_vmem [thread:$0]  %s277_s0, 128, %s19_s18, [#allocation3]  }
  0x22   :  { %s196_s12 = smov [#allocation7]   ;;  %s144_s16 = scalar_lea.hbm %s279_s2, 128 }
  0x23   :  { %s38_s13 = sshll.u32 %s196_s12, 4  ;;  %p145_p2 = scmp.ne.s32.totalorder %s279_s2, %s144_s16  ;;  %s39_s13 = int_to_ptr.vmem [resolvable:$true] %s38_s13 }
  0x24   :  { %p148_p3 = scmp.lt.u32.totalorder %s144_s16, %s279_s2 }
  0x26   :  { %p150_p4 = pnand %p148_p3, %p145_p2 }
  0x28   :  { %153 = shalt.err (!%p150_p4)
}
  0x29   :  { %s154_s22 = scalar_lea.vmem %s39_s13, 128  ;;  %p159_p6 = scmp.lt.s32.totalorder %s39_s13, %s39_s13 }
  0x2a   :  { %p155_p5 = scmp.ne.s32.totalorder %s39_s13, %s154_s22  ;;  %p160_p7 = scmp.lt.s32.totalorder %s154_s22, %s154_s22 }
  0x2c   :  { %p161_p8 = por %p160_p7, %p159_p6 }
  0x2e   :  { %p162_p9 = pnand %p161_p8, %p155_p5 }
  0x30   :  { %165 = shalt.err (!%p162_p9)
}
  0x31   :  { %41 = dma.hbm_to_vmem [thread:$0]  %s279_s2, 128, %s39_s13, [#allocation6]  }
  0x32   :  { %188 = dma.done.wait [#allocation3], 128  }
  0x33   :  { %189 = vsyncadd [#allocation3], 4294967168 }
  0x34   :  { %190 = dma.done.wait [#allocation6], 256  }
  0x35   :  { %191 = vsyncadd [#allocation6], 4294967040  ;;  %v54_v0 = vld [vmem:[#allocation5] sm:$0xff]  ;;  %v56_v1 = vld [vmem:[%s280_s3] sm:$0xff]  ;;  %s197_s25 = smov 8   ;;  %s198_s26 = smov 24  }
  0x36   :  { %58 = vrot.lane.b32.xlu0 %v54_v0, %s197_s25  ;;  %66 = vrot.lane.b32.xlu1 %v56_v1, %s198_s26  ;;  %v55_v2 = vld [vmem:[#allocation7] sm:$0xff]  ;;  %s199_s27 = smov 16   ;;  %vm69_vm0 = vcmask 64512   ;;  %v53_v4 = vld [vmem:[#allocation2] sm:$0xff]  ;;  %vm71_vm1 = vcmask 130048   ;;  %s200_s2 = smov [#allocation8]  }
  0x37   :  { %s83_s28 = sshll.u32 %s200_s2, 4  ;;  %vm73_vm2 = vcmask 195584   ;;  %vm75_vm3 = vcmask 261120   ;;  %s84_s28 = int_to_ptr.vmem [resolvable:$true] %s83_s28 }
  0x38   :  { %s166_s3 = scalar_lea.vmem %s84_s28, 128  ;;  %p171_p11 = scmp.lt.s32.totalorder %s84_s28, %s84_s28 }
  0x39   :  { %p167_p10 = scmp.ne.s32.totalorder %s84_s28, %s166_s3  ;;  %p172_p12 = scmp.lt.s32.totalorder %s166_s3, %s166_s3 }
  0x3a   :  { %62 = vrot.lane.b32.xlu0 %v55_v2, %s199_s27 }
  0x3b   :  { %p173_p13 = por %p172_p12, %p171_p11 }
  0x3d   :  { %p174_p0 = pnand %p173_p13, %p167_p10 }
  0xa8   :  { %v59_v3 = vpop.permute.xlu0 %58  ;;  %v67_v5 = vpop.permute.xlu1 %66 }
  0xa9   :  { %v70_v6 = vsel %vm69_vm0, %v53_v4, %v59_v3 }
  0xac   :  { %v63_v7 = vpop.permute.xlu0 %62 }
  0xad   :  { %v72_v8 = vsel %vm71_vm1, %v70_v6, %v63_v7 }
  0xae   :  { %v74_v9 = vsel %vm73_vm2, %v72_v8, %v67_v5 }
  0xaf   :  { %76 = vst.msk [vmem:[#allocation8] sm:$0xff] %vm75_vm3, %v74_v9 }
  0xb0   :  { %177 = shalt.err (!%p174_p0)
}
  0xb1   :  { %s178_s5 = scalar_lea.hbm %s281_s4, 128 }
  0xb2   :  { %p179_p1 = scmp.ne.s32.totalorder %s281_s4, %s178_s5  ;;  %p182_p2 = scmp.lt.u32.totalorder %s178_s5, %s281_s4 }
  0xb4   :  { %p184_p3 = pnand %p182_p2, %p179_p1 }
  0xb6   :  { %187 = shalt.err (!%p184_p3)
}
  0xb7   :  { %86 = dma.vmem_to_hbm [thread:$0]  %s84_s28, 128, %s281_s4, [#allocation4]  }
  0xb8   :  { %192 = dma.done.wait [#allocation4], 128  }
  0xb9   :  { %193 = vsyncadd [#allocation4], 4294967168 }
  0xba   :  { %90 = vsyncpa [#allocation3], 1 }
  0xbb   :  { %91 = vsyncpa [#allocation6], 1 }
  0xbc   :  { %92 = vsyncpa [#allocation4], 1 }

// kernel: tpu_custom_call.1
= control target key start
LH: loop header
LB: loop body
LE: loop exit
PB: predicated region body
PF: predicated region fallthrough
CT: control target
= control target key end

     0   :  { %6 = vsyncpa [#allocation3], 0  ;;  %s482_s0 = inlined_call_operand.hbm [shape: f32[8,128], index: 0, kind: input, shape index: {}]   ;;  %s483_s1 = inlined_call_operand.hbm [shape: f32[16,128], index: 1, kind: output, shape index: {}]  }
   0x1   :  { %7 = vsyncpa [#allocation4], 0 }
   0x2   :  { %9 = vsyncpa [#allocation4 + $0x1], 0  ;;  %s352_s6 = smov 0   ;;  %s354_s7 = smov 0  }
   0x3   :  { %s356_s8 = smov 0   ;;  %s358_s9 = smov 0  }
   0x4 LB: > { %s373_s10 = sadd.s32 4294967295, %s338_s9   ;;  %s184_s11 = sadd.s32 4294967294, %s338_s9   ;;  %s338_s9 = sphi %s358_s9, %s499_s9   ;;  %s334_s8 = sphi %s356_s8, %s498_s8   ;;  %s330_s7 = sphi %s354_s7, %s497_s7   ;;  %s326_s6 = sphi %s352_s6, %s496_s6  }
   0x5   : > { %s377_s12 = sadd.s32 1, %s338_s9   ;;  %s43_s13 = sadd.s32 1, %s334_s8 }
   0x6   : > { %s40_s14 = ssub.s32 %s338_s9, %s377_s12  ;;  %p53_p0 = scmp.ne.s32.totalorder %s334_s8, %s330_s7 }
   0x7   : > { %p41_p1 = scmp.eq.s32.totalorder %s40_s14, 0  ;;  %p54_p2 = scmp.eq.s32.totalorder %s373_s10, 1 }
   0x8   : > { %p59_p3 = scmp.ne.s32.totalorder %s330_s7, %s326_s6  ;;  %p60_p4 = scmp.eq.s32.totalorder %s184_s11, 1 }
   0x9   : > { %s388_s15 = scalar_select %p41_p1, %s334_s8, %s43_s13  }
   0xa   : > { %p390_p5 = por %p54_p2, %p53_p0  ;;  %p394_p6 = por %p60_p4, %p59_p3 }
   0xb   : > { %p185_p7 = scmp.ge.s32.totalorder %s338_s9, 1  ;;  %p67_p8 = scmp.lt.s32.totalorder %s338_s9, 3 }
   0xc   : > { %s487_s16 = scalar_select %p390_p5, 1, 0 }
   0xd   : > { %s488_s17 = scalar_select %p394_p6, 1, 0 }
   0xe   : > { %p484_p9 = scmp.eq.s32.totalorder %s373_s10, 0  ;;  %p401_p10 = pnand %p185_p7, %p67_p8 }
   0xf   : > { %s340_s19 = smov [#allocation2]   ;;  %s244_s24 = scalar_lea.hbm %s482_s0, 128 }
  0x10   : > { %s489_s18 = scalar_select %p401_p10, 1, 0 }
  0x11   : > { %s80_s20 = sshll.u32 %s340_s19, 4  ;;  %p200_p11 = pneg %p401_p10  ;;  %s81_s20 = int_to_ptr.vmem [resolvable:$true] %s80_s20 }
  0x12   : > { %p245_p13 = scmp.ne.s32.totalorder %s482_s0, %s244_s24  ;;  %p251_p3 = scmp.lt.u32.totalorder %s244_s24, %s482_s0 }
  0x13   : > { %p409_p12 = pnand %p484_p9, %p200_p11 }
  0x15   : > { %p246_p0 = pneg %p409_p12 }
  0x17   : > { %p247_p1 = pnand %p246_p0, %p245_p13 }
  0x19   : > { %p248_p2 = pneg %p247_p1 }
  0x1b   : > { %p253_p4 = pnand %p251_p3, %p248_p2 }
  0x1d   : > { %256 = shalt.err (!%p253_p4)
}
  0x1e   : > { %s257_s29 = scalar_lea.vmem %s81_s20, 128  ;;  %p265_p9 = scmp.lt.s32.totalorder %s81_s20, %s81_s20 }
  0x1f   : > { %p258_p7 = scmp.ne.s32.totalorder %s81_s20, %s257_s29  ;;  %p266_p6 = scmp.lt.s32.totalorder %s257_s29, %s257_s29 }
  0x21   : > { %p260_p8 = pnand %p258_p7, %p246_p0  ;;  %p267_p5 = por %p266_p6, %p265_p9 }
  0x23   : > { %p261_p11 = pneg %p260_p8 }
  0x25   : > { %p268_p10 = pnand %p267_p5, %p261_p11 }
  0x27   : > { %271 = shalt.err (!%p268_p10)
}
  0x28   : > { %203 = dma.hbm_to_vmem [thread:$0]  (!%p409_p12), %s482_s0, 128, %s81_s20, [#allocation3]  }
  0x29   : > { %p491_p13 = scmp.ne.s32.totalorder %s489_s18, 0 }
  0x2a   : > { %p492_p1 = scmp.eq.s32.totalorder (!%p491_p13), %s373_s10, 0 }
  0x2b   : > { %93 = sbr.rel (%p491_p13) target bundleno = 77 (0x4d), region = 24 }
  0x32   : > { %317 = dma.done.wait (%p492_p1), [#allocation3], 128   ;;  %p493_p0 = pmov %p492_p1 }
  0x33   : > { %s105_s3 = sand.u32 1, %s330_s7   ;;  %s191_s13 = sshll.u32 %s373_s10, 7  ;;  %v108_v0 = vld [vmem:[#allocation2] sm:$0xff] }
  0x34   : > { %319 = vsyncadd (%p493_p0), [#allocation3], 4294967168  ;;  %s189_s4 = sshll.u32 %s105_s3, 3  ;;  %v109_v1 = vadd.f32 1.0, %v108_v0  ;;  %s442_s19 = scalar_lea.hbm %s483_s1, %s191_s13 }
  0x35   : > { %s107_s5 = scalar_lea.vmem [#allocation5], %s189_s4  ;;  %s112_s20 = scalar_lea.sflag [#allocation4], %s105_s3 }
  0x36   : > { %s125_s11 = sshll.u32 %s107_s5, 4  ;;  %110 = vst [vmem:[%s107_s5] sm:$0xff] %v109_v1  ;;  %p494_p6 = scmp.ne.s32.totalorder %s487_s16, 0  ;;  %s437_s11 = int_to_ptr.vmem [resolvable:$true] %s125_s11 }
  0x37   : > { %s272_s21 = scalar_lea.vmem %s437_s11, 128  ;;  %s341_s10 = smov [#allocation5]  }
  0x38   : > { %p273_p5 = scmp.ne.s32.totalorder %s437_s11, %s272_s21  ;;  %s276_s22 = sshll.u32 %s341_s10, 4  ;;  %s277_s22 = int_to_ptr.vmem [resolvable:$false] %s276_s22 }
  0x39   : > { %s278_s23 = scalar_lea.vmem %s277_s22, 256  ;;  %p279_p12 = scmp.lt.s32.totalorder %s437_s11, %s277_s22 }
  0x3a   : > { %p274_p9 = pnand %p273_p5, %p494_p6  ;;  %p280_p2 = scmp.lt.s32.totalorder %s278_s23, %s272_s21 }
  0x3c   : > { %p275_p10 = pneg %p274_p9  ;;  %p281_p3 = por %p280_p2, %p279_p12 }
  0x3e   : > { %p282_p4 = pnand %p281_p3, %p275_p10 }
  0x40   : > { %285 = shalt.err (!%p282_p4)
}
  0x41   : > { %s286_s24 = scalar_lea.hbm %s442_s19, 128  ;;  %s290_s27 = scalar_lea.hbm %s483_s1, 256 }
  0x42   : > { %p287_p7 = scmp.ne.s32.totalorder %s442_s19, %s286_s24  ;;  %p291_p13 = scmp.lt.u32.totalorder %s442_s19, %s483_s1 }
  0x43   : > { %p292_p1 = scmp.lt.u32.totalorder %s290_s27, %s286_s24  ;;  %p294_p5 = scmp.lt.u32.totalorder %s286_s24, %s442_s19 }
  0x44   : > { %p288_p8 = pnand %p287_p7, %p494_p6 }
  0x45   : > { %p293_p0 = por %p292_p1, %p291_p13 }
  0x46   : > { %p289_p11 = pneg %p288_p8 }
  0x47   : > { %p295_p9 = por %p294_p5, %p293_p0 }
  0x49   : > { %p296_p10 = pnand %p295_p9, %p289_p11 }
  0x4b   : > { %299 = shalt.err (!%p296_p10)
}
  0x4c   : > { %198 = dma.vmem_to_hbm [thread:$0]  (%p494_p6), %s437_s11, 128, %s442_s19, %s112_s20  }
  0x4d PF: > { %p210_p12 = scmp.ge.s32.totalorder %s338_s9, 2  ;;  %s137_s30 = sand.u32 1, %s326_s6  }
  0x4e   : > { %p495_p2 = scmp.ne.s32.totalorder %s488_s17, 0  ;;  %s138_s2 = scalar_lea.sflag [#allocation4], %s137_s30 }
  0x50   : > { %p205_p3 = pnand %p210_p12, %p495_p2 }
  0x52   : > { %321 = dma.done.wait (!%p205_p3), %s138_s2, 128  }
  0x53   : > { %323 = vsyncadd (!%p205_p3), %s138_s2, 4294967168  ;;  %p12_p4 = scmp.ge.s32.totalorder %s377_s12, 4   ;;  %s496_s6 = smov %s330_s7 }
  0x54   : > { %s497_s7 = smov %s334_s8  ;;  %s498_s8 = smov %s388_s15 }
  0x55   : > { %s499_s9 = smov %s377_s12  ;;  %14 = sbr.rel (!%p12_p4) target bundleno = 4 (0x4), region = 61 }
  0x5c   :  { %143 = vsyncpa [#allocation3], 1 }
  0x5d   :  { %145 = vsyncpa [#allocation3 + $0x1], 1 }
  0x5e   :  { %146 = vsyncpa [#allocation4], 1 }
  0x5f   :  { %148 = vsyncpa [#allocation4 + $0x1], 1 }

// kernel: tpu_custom_call.1
= control target key start
LH: loop header
LB: loop body
LE: loop exit
PB: predicated region body
PF: predicated region fallthrough
CT: control target
= control target key end

     0   :  { %s5521_s0 = inlined_call_operand.hbm [shape: f32[8,8,32], index: 0, kind: input, shape index: {}]   ;;  %s5522_s1 = inlined_call_operand.hbm [shape: f32[8,1,8], index: 1, kind: input, shape index: {}]   ;;  %s5523_s2 = inlined_call_operand.vmem [shape: bf16[3,32,32], index: 2, kind: input, shape index: {}]   ;;  %s5524_s3 = inlined_call_operand.hbm [shape: f32[3,1,32], index: 3, kind: input, shape index: {}]   ;;  %s5525_s4 = inlined_call_operand.hbm [shape: bf16[32,32], index: 4, kind: input, shape index: {}]   ;;  %s5526_s5 = inlined_call_operand.vmem [shape: f32[1,32], index: 5, kind: input, shape index: {}]   ;;  %s5527_s6 = inlined_call_operand.vmem [shape: f32[1,32], index: 6, kind: input, shape index: {}]   ;;  %s5528_s7 = inlined_call_operand.hbm [shape: f32[1,32], index: 7, kind: input, shape index: {}]   ;;  %s5529_s8 = inlined_call_operand.hbm [shape: f32[1,32], index: 8, kind: input, shape index: {}]   ;;  %s5530_s9 = inlined_call_operand.hbm [shape: f32[1,32], index: 9, kind: input, shape index: {}]   ;;  %s5531_s10 = inlined_call_operand.vmem [shape: bf16[32,64], index: 10, kind: input, shape index: {}]   ;;  %s5532_s11 = inlined_call_operand.vmem [shape: f32[1,64], index: 11, kind: input, shape index: {}]   ;;  %s5533_s12 = inlined_call_operand.vmem [shape: bf16[64,32], index: 12, kind: input, shape index: {}]   ;;  %s5534_s13 = inlined_call_operand.vmem [shape: f32[1,32], index: 13, kind: input, shape index: {}]   ;;  %s5535_s14 = inlined_call_operand.hbm [shape: f32[8,8,32], index: 14, kind: output, shape index: {}]  }
   0x1   :  { %5544 = sst [smem:[#allocation21_spill]] %s5521_s0 }
   0x2   :  { %5545 = sst [smem:[#allocation22_spill]] %s5524_s3 }
   0x3   :  { %5546 = sst [smem:[#allocation23_spill]] %s5525_s4 }
   0x4   :  { %5547 = sst [smem:[#allocation24_spill]] %s5526_s5 }
   0x5   :  { %5548 = sst [smem:[#allocation25_spill]] %s5528_s7 }
   0x6   :  { %5549 = sst [smem:[#allocation26_spill]] %s5529_s8 }
   0x7   :  { %5550 = sst [smem:[#allocation27_spill]] %s5530_s9 }
   0x8   :  { %5551 = sst [smem:[#allocation28_spill]] %s5531_s10 }
   0x9   :  { %5552 = sst [smem:[#allocation29_spill]] %s5532_s11 }
   0xa   :  { %5553 = sst [smem:[#allocation30_spill]] %s5533_s12 }
   0xb   :  { %5554 = sst [smem:[#allocation31_spill]] %s5534_s13 }
   0xc   :  { %5555 = sst [smem:[#allocation32_spill]] %s5535_s14 }
   0xd   :  { %19 = vsyncpa [#allocation3], 0 }
   0xe   :  { %21 = vsyncpa [#allocation3 + $0x1], 0 }
   0xf   :  { %22 = vsyncpa [#allocation6], 0 }
  0x10   :  { %24 = vsyncpa [#allocation6 + $0x1], 0 }
  0x11   :  { %25 = vsyncpa [#allocation9], 0 }
  0x12   :  { %26 = vsyncpa [#allocation12], 0 }
  0x13   :  { %27 = vsyncpa [#allocation4], 0 }
  0x14   :  { %29 = vsyncpa [#allocation4 + $0x1], 0  ;;  %s4668_s29 = smov 0   ;;  %s4670_s30 = smov 0  }
  0x15   :  { %s4672_s15 = smov 0   ;;  %s4674_s16 = smov 0  }
  0x16 LB: > { %s4571_s17 = smov [#allocation7]   ;;  %s4689_s19 = sadd.s32 4294967295, %s4569_s16   ;;  %s4569_s16 = sphi %s4674_s16, %s5600_s16   ;;  %s4565_s15 = sphi %s4672_s15, %s5599_s15   ;;  %s4561_s30 = sphi %s4670_s30, %s5598_s30   ;;  %s4557_s29 = sphi %s4668_s29, %s5597_s29  }
  0x17   : > { %s385_s18 = sshll.u32 %s4571_s17, 4  ;;  %p3562_p0 = scmp.ge.s32.totalorder %s4569_s16, 1  ;;  %s4694_s18 = int_to_ptr.vmem [resolvable:$true] %s385_s18 }
  0x18   : > { %p5540_p1 = scmp.eq.s32.totalorder %s4689_s19, 0  ;;  %p370_p2 = scmp.lt.s32.totalorder %s4569_s16, 3 }
  0x19   : > { %s4572_s21 = smov [#allocation8]   ;;  %s4573_s24 = smov [#allocation11]  }
  0x1a   : > { %p4696_p3 = pnand %p3562_p0, %p370_p2  ;;  %s398_s22 = sshll.u32 %s4572_s21, 4  ;;  %s4709_s22 = int_to_ptr.vmem [resolvable:$true] %s398_s22 }
  0x1b   : > { %s4711_s25 = sshll.u32 %s4573_s24, 4  ;;  %s5558_s3 = sld [smem:[#allocation22_spill]]  ;;  %s430_s25 = int_to_ptr.vmem [resolvable:$true] %s4711_s25 }
  0x1c   : > { %s5556_s20 = scalar_select %p4696_p3, 1, 0 }
  0x1d   : > { %p4101_p5 = pneg %p4696_p3 }
  0x1f   : > { %p4705_p6 = pnand %p4101_p5, %p5540_p1 }
  0x21   : > { %s4287_s28 = scalar_lea.hbm %s5558_s3, 48  ;;  %p4721_p8 = pneg %p4705_p6 }
  0x22   : > { %p4288_p7 = scmp.ne.s32.totalorder %s5558_s3, %s4287_s28  ;;  %p4294_p11 = scmp.lt.u32.totalorder %s4287_s28, %s5558_s3 }
  0x24   : > { %p4290_p9 = pnand %p4721_p8, %p4288_p7 }
  0x26   : > { %p4291_p10 = pneg %p4290_p9 }
  0x28   : > { %p4296_p12 = pnand %p4294_p11, %p4291_p10 }
  0x2a   : > { %4299 = shalt.err (!%p4296_p12)
}
  0x2b   : > { %s4300_s14 = scalar_lea.vmem %s4694_s18, 48  ;;  %s4307_s26 = scalar_lea.vmem %s4694_s18, 64 }
  0x2c   : > { %p4301_p13 = scmp.ne.s32.totalorder %s4694_s18, %s4300_s14  ;;  %p4308_p5 = scmp.lt.s32.totalorder %s4694_s18, %s4694_s18 }
  0x2d   : > { %p4309_p7 = scmp.lt.s32.totalorder %s4307_s26, %s4300_s14 }
  0x2e   : > { %p4303_p0 = pnand %p4301_p13, %p4721_p8 }
  0x2f   : > { %p4310_p9 = por %p4309_p7, %p4308_p5 }
  0x30   : > { %p4304_p2 = pneg %p4303_p0 }
  0x32   : > { %p4311_p4 = pnand %p4310_p9, %p4304_p2 }
  0x34   : > { %4314 = shalt.err (!%p4311_p4)
}
  0x35   : > { %s5539_s13 = smov 16   ;;  %s5542_s27 = smov 1  }
  0x36   : > { %4104 = dma.hbm_to_vmem [thread:$0]  (!%p4705_p6), %s5558_s3, 48, %s4694_s18, [#allocation6], %s5539_s13, %s5539_s13, %s5542_s27  }
  0x37   : > { %s5560_s4 = sld [smem:[#allocation23_spill]] }
  0x3d   : > { %s4315_s14 = scalar_lea.hbm %s5560_s4, 256 }
  0x3e   : > { %p4316_p4 = scmp.ne.s32.totalorder %s5560_s4, %s4315_s14  ;;  %p4322_p12 = scmp.lt.u32.totalorder %s4315_s14, %s5560_s4 }
  0x40   : > { %p4318_p10 = pnand %p4316_p4, %p4721_p8 }
  0x42   : > { %p4319_p11 = pneg %p4318_p10 }
  0x44   : > { %p4324_p13 = pnand %p4322_p12, %p4319_p11 }
  0x46   : > { %4327 = shalt.err (!%p4324_p13)
}
  0x47   : > { %s4328_s18 = scalar_lea.vmem %s4709_s22, 256  ;;  %p4336_p7 = scmp.lt.s32.totalorder %s4709_s22, %s4709_s22 }
  0x48   : > { %p4329_p0 = scmp.ne.s32.totalorder %s4709_s22, %s4328_s18  ;;  %p4337_p9 = scmp.lt.s32.totalorder %s4328_s18, %s4328_s18 }
  0x4a   : > { %p4331_p2 = pnand %p4329_p0, %p4721_p8  ;;  %p4338_p4 = por %p4337_p9, %p4336_p7 }
  0x4c   : > { %p4332_p5 = pneg %p4331_p2 }
  0x4e   : > { %p4339_p10 = pnand %p4338_p4, %p4332_p5 }
  0x50   : > { %4342 = shalt.err (!%p4339_p10)
}
  0x51   : > { %s4576_s11 = smov 64   ;;  %s4577_s5 = smov 4  }
  0x52   : > { %4107 = dma.hbm_to_vmem [thread:$0]  (!%p4705_p6), %s5560_s4, 256, %s4709_s22, [#allocation9], %s4576_s11, %s4576_s11, %s4577_s5  }
  0x53   : > { %s5561_s8 = sld [smem:[#allocation26_spill]] }
  0x59   : > { %s4343_s24 = scalar_lea.hbm %s5561_s8, 16 }
  0x5a   : > { %p4344_p11 = scmp.ne.s32.totalorder %s5561_s8, %s4343_s24  ;;  %p4350_p0 = scmp.lt.u32.totalorder %s4343_s24, %s5561_s8 }
  0x5c   : > { %p4346_p12 = pnand %p4344_p11, %p4721_p8 }
  0x5e   : > { %p4347_p13 = pneg %p4346_p12 }
  0x60   : > { %p4352_p2 = pnand %p4350_p0, %p4347_p13 }
  0x62   : > { %4355 = shalt.err (!%p4352_p2)
}
  0x63   : > { %s4356_s10 = scalar_lea.vmem %s430_s25, 16  ;;  %s4363_s22 = scalar_lea.vmem %s430_s25, 32 }
  0x64   : > { %p4357_p5 = scmp.ne.s32.totalorder %s430_s25, %s4356_s10  ;;  %p4364_p4 = scmp.lt.s32.totalorder %s430_s25, %s430_s25 }
  0x65   : > { %p4365_p10 = scmp.lt.s32.totalorder %s4363_s22, %s4356_s10 }
  0x66   : > { %p4359_p7 = pnand %p4357_p5, %p4721_p8 }
  0x67   : > { %p4366_p1 = por %p4365_p10, %p4364_p4 }
  0x68   : > { %p4360_p9 = pneg %p4359_p7 }
  0x6a   : > { %p4367_p3 = pnand %p4366_p1, %p4360_p9 }
  0x6c   : > { %4370 = shalt.err (!%p4367_p3)
}
  0x6d   : > { %4113 = dma.hbm_to_vmem [thread:$0]  (!%p4705_p6), %s5561_s8, 16, %s430_s25, [#allocation12]  }
  0x6e   : > { %s4578_s13 = smov [#allocation10]   ;;  %s4579_s28 = smov [#allocation13]  }
  0x6f   : > { %s418_s12 = sshll.u32 %s4578_s13, 4  ;;  %s440_s17 = sshll.u32 %s4579_s28, 4  ;;  %s419_s12 = int_to_ptr.vmem [resolvable:$true] %s418_s12  ;;  %s441_s17 = int_to_ptr.vmem [resolvable:$true] %s440_s17 }
  0x70   : > { %s5562_s7 = sld [smem:[#allocation25_spill]] }
  0x76   : > { %s4371_s26 = scalar_lea.hbm %s5562_s7, 16 }
  0x77   : > { %p4372_p1 = scmp.ne.s32.totalorder %s5562_s7, %s4371_s26  ;;  %p4378_p12 = scmp.lt.u32.totalorder %s4371_s26, %s5562_s7 }
  0x79   : > { %p4374_p3 = pnand %p4372_p1, %p4721_p8 }
  0x7b   : > { %p4375_p11 = pneg %p4374_p3 }
  0x7d   : > { %p4380_p13 = pnand %p4378_p12, %p4375_p11 }
  0x7f   : > { %4383 = shalt.err (!%p4380_p13)
}
  0x80   : > { %s4384_s25 = scalar_lea.vmem %s419_s12, 16  ;;  %s4391_s5 = scalar_lea.vmem %s419_s12, 32 }
  0x81   : > { %p4385_p0 = scmp.ne.s32.totalorder %s419_s12, %s4384_s25  ;;  %p4392_p7 = scmp.lt.s32.totalorder %s419_s12, %s419_s12 }
  0x82   : > { %p4393_p9 = scmp.lt.s32.totalorder %s4391_s5, %s4384_s25 }
  0x83   : > { %p4387_p2 = pnand %p4385_p0, %p4721_p8 }
  0x84   : > { %p4394_p4 = por %p4393_p9, %p4392_p7 }
  0x85   : > { %p4388_p5 = pneg %p4387_p2 }
  0x87   : > { %p4395_p10 = pnand %p4394_p4, %p4388_p5 }
  0x89   : > { %4398 = shalt.err (!%p4395_p10)
}
  0x8a   : > { %4110 = dma.hbm_to_vmem [thread:$0]  (!%p4705_p6), %s5562_s7, 16, %s419_s12, [#allocation9]  }
  0x8b   : > { %s5563_s9 = sld [smem:[#allocation27_spill]] }
  0x91   : > { %s4399_s26 = scalar_lea.hbm %s5563_s9, 16 }
  0x92   : > { %p4400_p1 = scmp.ne.s32.totalorder %s5563_s9, %s4399_s26  ;;  %p4406_p12 = scmp.lt.u32.totalorder %s4399_s26, %s5563_s9 }
  0x94   : > { %p4402_p3 = pnand %p4400_p1, %p4721_p8 }
  0x96   : > { %p4403_p11 = pneg %p4402_p3 }
  0x98   : > { %p4408_p13 = pnand %p4406_p12, %p4403_p11 }
  0x9a   : > { %4411 = shalt.err (!%p4408_p13)
}
  0x9b   : > { %s4412_s25 = scalar_lea.vmem %s441_s17, 16  ;;  %s4419_s12 = scalar_lea.vmem %s441_s17, 32 }
  0x9c   : > { %p4413_p0 = scmp.ne.s32.totalorder %s441_s17, %s4412_s25  ;;  %p4420_p7 = scmp.lt.s32.totalorder %s441_s17, %s441_s17 }
  0x9d   : > { %p4421_p9 = scmp.lt.s32.totalorder %s4419_s12, %s4412_s25 }
  0x9e   : > { %p4415_p2 = pnand %p4413_p0, %p4721_p8 }
  0x9f   : > { %p4422_p4 = por %p4421_p9, %p4420_p7 }
  0xa0   : > { %p4416_p5 = pneg %p4415_p2 }
  0xa2   : > { %p4423_p10 = pnand %p4422_p4, %p4416_p5 }
  0xa4   : > { %4426 = shalt.err (!%p4423_p10)
}
  0xa5   : > { %4116 = dma.hbm_to_vmem [thread:$0]  (!%p4705_p6), %s5563_s9, 16, %s441_s17, [#allocation12]  }
  0xa6   : > { %s3561_s21 = sadd.s32 4294967294, %s4569_s16   ;;  %s4826_s23 = sadd.s32 1, %s4569_s16  }
  0xa7   : > { %s42_s28 = sadd.s32 1, %s4565_s15  ;;  %s39_s24 = ssub.s32 %s4569_s16, %s4826_s23 }
  0xa8   : > { %p49_p8 = scmp.ne.s32.totalorder %s4565_s15, %s4561_s30  ;;  %p40_p1 = scmp.eq.s32.totalorder %s39_s24, 0 }
  0xa9   : > { %p50_p3 = scmp.eq.s32.totalorder %s4569_s16, 0  ;;  %p55_p11 = scmp.ne.s32.totalorder %s4561_s30, %s4557_s29 }
  0xaa   : > { %p357_p12 = scmp.eq.s32.totalorder %s4689_s19, 1  ;;  %p5564_p0 = scmp.eq.s32.totalorder %s4689_s19, 0 }
  0xab   : > { %s4838_s14 = scalar_select %p40_p1, %s4565_s15, %s42_s28  }
  0xac   : > { %p51_p13 = por %p50_p3, %p49_p8  ;;  %p4842_p2 = por %p5564_p0, %p55_p11 }
  0xad   : > { %p4846_p6 = por %p357_p12, %p49_p8  ;;  %p363_p5 = scmp.eq.s32.totalorder %s3561_s21, 1 }
  0xae   : > { %p4133_p7 = scmp.lt.s32.totalorder %s4569_s16, 2  ;;  %s4852_s18 = sand.u32 1, %s4565_s15  }
  0xaf   : > { %s5566_s17 = scalar_select %p4846_p6, 1, 0 }
  0xb0   : > { %p4854_p9 = por %p363_p5, %p55_p11  ;;  %s3569_s22 = sshll.u32 %s4852_s18, 5 }
  0xb1   : > { %s3677_s11 = sshll.u32 %s4569_s16, 9  ;;  %s5568_s0 = sld [smem:[#allocation21_spill]] }
  0xb2   : > { %s5567_s10 = scalar_select %p4854_p9, 1, 0 }
  0xb3   : > { %s467_s13 = scalar_lea.vmem [#allocation2], %s3569_s22  ;;  %p4865_p4 = pnand %p4133_p7, %p51_p13 }
  0xb4   : > { %s474_s21 = sshll.u32 %s467_s13, 4  ;;  %s4869_s21 = int_to_ptr.vmem [resolvable:$true] %s474_s21 }
  0xb5   : > { %p4429_p8 = pneg %p4865_p4 }
  0xb7   : > { %s4863_s5 = scalar_lea.hbm %s5568_s0, %s3677_s11  ;;  %s4432_s25 = scalar_lea.hbm %s5568_s0, 1024 }
  0xb8   : > { %s4427_s27 = scalar_lea.hbm %s4863_s5, 512  ;;  %p4433_p11 = scmp.lt.u32.totalorder %s4863_s5, %s5568_s0 }
  0xb9   : > { %p4428_p10 = scmp.ne.s32.totalorder %s4863_s5, %s4427_s27  ;;  %p4434_p12 = scmp.lt.u32.totalorder %s4432_s25, %s4427_s27 }
  0xba   : > { %p4436_p0 = scmp.lt.u32.totalorder %s4427_s27, %s4863_s5 }
  0xbb   : > { %p4430_p1 = pnand %p4429_p8, %p4428_p10  ;;  %p4435_p13 = por %p4434_p12, %p4433_p11 }
  0xbd   : > { %p4431_p3 = pneg %p4430_p1  ;;  %p4437_p5 = por %p4436_p0, %p4435_p13 }
  0xbf   : > { %p4438_p7 = pnand %p4437_p5, %p4431_p3 }
  0xc1   : > { %4441 = shalt.err (!%p4438_p7)
}
  0xc2   : > { %s4442_s24 = scalar_lea.vmem %s4869_s21, 512  ;;  %s4580_s11 = smov [#allocation2]  }
  0xc3   : > { %p4443_p10 = scmp.ne.s32.totalorder %s4869_s21, %s4442_s24  ;;  %s4447_s22 = sshll.u32 %s4580_s11, 4  ;;  %s4448_s22 = int_to_ptr.vmem [resolvable:$false] %s4447_s22 }
  0xc4   : > { %s4449_s12 = scalar_lea.vmem %s4448_s22, 1024  ;;  %p4450_p6 = scmp.lt.s32.totalorder %s4869_s21, %s4448_s22 }
  0xc5   : > { %p4445_p1 = pnand %p4443_p10, %p4429_p8  ;;  %p4451_p11 = scmp.lt.s32.totalorder %s4449_s12, %s4442_s24 }
  0xc7   : > { %p4446_p9 = pneg %p4445_p1  ;;  %p4452_p12 = por %p4451_p11, %p4450_p6 }
  0xc9   : > { %p4453_p13 = pnand %p4452_p12, %p4446_p9 }
  0xcb   : > { %4456 = shalt.err (!%p4453_p13)
}
  0xcc   : > { %s4581_s27 = smov 128   ;;  %s4582_s25 = smov 8  }
  0xcd   : > { %s5570_s13 = scalar_lea.sflag [#allocation3], %s4852_s18  ;;  %s484_s11 = sand.u32 1, %s4569_s16  }
  0xce   : > { %4120 = dma.hbm_to_vmem [thread:$0]  (!%p4865_p4), %s4863_s5, 512, %s4869_s21, %s5570_s13, %s4581_s27, %s4581_s27, %s4582_s25  }
  0xcf   : > { %s3572_s0 = sshll.u32 %s4852_s18, 2  ;;  %s3678_s22 = sshll.u32 %s4569_s16, 6 }
  0xd0   : > { %s488_s24 = scalar_lea.vmem [#allocation5], %s3572_s0  ;;  %s4905_s7 = scalar_lea.hbm %s5522_s1, %s3678_s22 }
  0xd1   : > { %s495_s12 = sshll.u32 %s488_s24, 4  ;;  %s4909_s8 = scalar_lea.sflag [#allocation6], %s484_s11  ;;  %s4907_s12 = int_to_ptr.vmem [resolvable:$true] %s495_s12 }
  0xd2   : > { %s4457_s9 = scalar_lea.hbm %s4905_s7, 64  ;;  %s4462_s3 = scalar_lea.hbm %s5522_s1, 128 }
  0xd3   : > { %p4458_p6 = scmp.ne.s32.totalorder %s4905_s7, %s4457_s9  ;;  %p4463_p0 = scmp.lt.u32.totalorder %s4905_s7, %s5522_s1 }
  0xd4   : > { %p4464_p5 = scmp.lt.u32.totalorder %s4462_s3, %s4457_s9  ;;  %p4466_p10 = scmp.lt.u32.totalorder %s4457_s9, %s4905_s7 }
  0xd5   : > { %p4460_p9 = pnand %p4458_p6, %p4429_p8 }
  0xd6   : > { %p4465_p7 = por %p4464_p5, %p4463_p0 }
  0xd7   : > { %p4461_p3 = pneg %p4460_p9 }
  0xd8   : > { %p4467_p1 = por %p4466_p10, %p4465_p7 }
  0xda   : > { %p4468_p11 = pnand %p4467_p1, %p4461_p3 }
  0xdc   : > { %4471 = shalt.err (!%p4468_p11)
}
  0xdd   : > { %s4472_s21 = scalar_lea.vmem %s4907_s12, 64  ;;  %s4583_s27 = smov [#allocation5]  }
  0xde   : > { %p4473_p12 = scmp.ne.s32.totalorder %s4907_s12, %s4472_s21  ;;  %s4477_s25 = sshll.u32 %s4583_s27, 4  ;;  %s4478_s25 = int_to_ptr.vmem [resolvable:$false] %s4477_s25 }
  0xdf   : > { %s4479_s13 = scalar_lea.vmem %s4478_s25, 128  ;;  %p4480_p9 = scmp.lt.s32.totalorder %s4907_s12, %s4478_s25 }
  0xe0   : > { %p4475_p13 = pnand %p4473_p12, %p4429_p8  ;;  %p4481_p0 = scmp.lt.s32.totalorder %s4479_s13, %s4472_s21 }
  0xe2   : > { %p4476_p6 = pneg %p4475_p13  ;;  %p4482_p5 = por %p4481_p0, %p4480_p9 }
  0xe4   : > { %p4483_p7 = pnand %p4482_p5, %p4476_p6 }
  0xe6   : > { %4486 = shalt.err (!%p4483_p7)
}
  0xe7   : > { %s5571_s9 = smov 1   ;;  %s5572_s11 = smov 16  }
  0xe8   : > { %4123 = dma.hbm_to_vmem [thread:$0]  (!%p4865_p4), %s4905_s7, 64, %s4907_s12, %s4909_s8, %s5572_s11, %s5572_s11, %s5571_s9  }
  0xe9   : > { %p5573_p8 = scmp.ne.s32.totalorder %s5556_s20, 0 }
  0xea   : > { %s4941_s22 = sand.u32 (!%p5573_p8), 1, %s4561_s30  }
  0xeb   : > { %507 = sbr.rel (%p5573_p8) target bundleno = 4710 (0x1266), region = 76  ;;  %s3576_s24 = sshll.u32 (!%p5573_p8), %s4941_s22, 5 }
  0xec   : > { %s510_s0 = scalar_lea.sflag (!%p5573_p8), [#allocation3], %s4941_s22  ;;  %s4947_s28 = scalar_lea.vmem (!%p5573_p8), [#allocation2], %s3576_s24 }
  0xf2   : > { %4532 = dma.done.wait (%p4842_p2), %s510_s0, 512  }
  0xf3   : > { %4534 = vsyncadd (%p4842_p2), %s510_s0, 4294966784  ;;  %s518_s7 = sand.u32 1, %s4689_s19   ;;  %s3577_s8 = sshll.u32 %s4941_s22, 2 }
  0xf4   : > { %s519_s20 = scalar_lea.sflag [#allocation6], %s518_s7  ;;  %s4955_s12 = scalar_lea.vmem [#allocation5], %s3577_s8 }
  0xf5   : > { %4536 = dma.done.wait (%p4842_p2), %s519_s20, 64  }
  0xf6   : > { %4538 = vsyncadd (%p4842_p2), %s519_s20, 4294967232  ;;  %p5574_p4 = scmp.eq.s32.totalorder %s4689_s19, 0 }
  0xf8   : > { %4540 = dma.done.wait (%p5574_p4), [#allocation6], 48   ;;  %p5575_p3 = pmov %p5574_p4 }
  0xfa   : > { %4542 = vsyncadd (%p5575_p3), [#allocation6], 4294967248  ;;  %p5576_p10 = pmov %p5575_p3 }
  0xfb   : > { %p5577_p1 = pmov %p5575_p3 }
  0xfc   : > { %4544 = dma.done.wait (%p5576_p10), [#allocation9], 272  }
  0xfd   : > { %4546 = vsyncadd (%p5577_p1), [#allocation9], 4294967024  ;;  %p5578_p11 = pmov %p5577_p1 }
  0xfe   : > { %p5579_p12 = pmov %p5577_p1 }
  0xff   : > { %4548 = dma.done.wait (%p5578_p11), [#allocation12], 32  }
 0x100   : > { %4550 = vsyncadd (%p5579_p12), [#allocation12], 4294967264  ;;  %vm602_vm0 = vcmask 261120   ;;  %v596_v0 = vld [vmem:[%s4947_s28] sm:$0xff]  ;;  %v598_v1 = vld [vmem:[%s4947_s28 + $0x10] sm:$0xff]  ;;  %vm4585_vm1 = vmmov 0  }
 0x101   : > { %v597_v2 = vld [vmem:[%s4947_s28 + $0x8] sm:$0xff]  ;;  %v603_v3 = vsel %vm602_vm0, %v596_v0, 0.0  ;;  %v609_v4 = vsel %vm602_vm0, %v598_v1, 0.0  ;;  %v599_v5 = vld [vmem:[%s4947_s28 + $0x18] sm:$0xff]  ;;  %v4191_v28 = vld [vmem:[%s5523_s2] sm:$0xff]   ;;  %vm936_vm2 = vcmask 64512  }
 0x102   : > { %604 = vadd.xlane.f32.xlu0 %v603_v3  ;;  %610 = vadd.xlane.f32.xlu1 %v609_v4  ;;  %v606_v6 = vsel %vm602_vm0, %v597_v2, 0.0  ;;  %v612_v7 = vsel %vm602_vm0, %v599_v5, 0.0  ;;  %v4192_v29 = vld [vmem:[%s5523_s2 + $0x20] sm:$0xff]   ;;  %v4193_v30 = vld [vmem:[%s5523_s2 + $0x8] sm:$0xff]   ;;  %v4195_v32 = vld [vmem:[%s5523_s2 + $0x10] sm:$0xff]   ;;  %vm1200_vm3 = vcmask 1043456  }
 0x103   : > { %3795 = vmatprep.subr.bf16.mxu1 %v4191_v28  ;;  %3811 = vmatprep.subr.bf16.mxu0 %v4192_v29  ;;  %v4194_v31 = vld [vmem:[%s5523_s2 + $0x28] sm:$0xff]   ;;  %v3584_v47 = vld [vmem:[%s5527_s6] ss:$0 sm:$0xff]  ;;  %v3585_v53 = vld [vmem:[#allocation10] ss:$0 sm:$0xff]  ;;  %s4587_s20 = smov 120  }
 0x104   : > { %3796 = vmatpush3.bf16.msra.mxu1 %v4191_v28  ;;  %3812 = vmatpush3.bf16.msra.mxu0 %v4192_v29  ;;  %v3604_v3 = vld [vmem:[#allocation7 + $0x2] ss:$0 sm:$0xff]  ;;  %s4589_s26 = smov 104   ;;  %s5588_s4 = sld [smem:[#allocation24_spill]]  ;;  %vm3329_vm12 = vcmask 523264  }
 0x105   : > { %3797 = vmatprep.subr.bf16.mxu1 %v4193_v30  ;;  %3813 = vmatprep.subr.bf16.mxu0 %v4194_v31  ;;  %s5589_s21 = sld [smem:[#allocation28_spill]]  ;;  %s5590_s11 = sld [smem:[#allocation30_spill]] }
 0x106   : > { %607 = vadd.xlane.f32.xlu0 %v606_v6  ;;  %613 = vadd.xlane.f32.xlu1 %v612_v7  ;;  %s5592_s27 = sld [smem:[#allocation31_spill]]  ;;  %s591_s25 = scalar_lea.vmem [#allocation14], %s3576_s24 }
 0x107   : > { %s3418_s13 = sshll.u32 %s591_s25, 4  ;;  %s3679_s9 = sshll.u32 %s4689_s19, 9  ;;  %s5467_s13 = int_to_ptr.vmem [resolvable:$true] %s3418_s13 }
 0x108   : > { %3798 = vmatpush3.bf16.msra.mxu1 %v4193_v30  ;;  %3814 = vmatpush3.bf16.msra.mxu0 %v4194_v31  ;;  %s5593_s7 = sld [smem:[#allocation32_spill]]  ;;  %s3405_s8 = scalar_lea.sflag [#allocation4], %s4941_s22 }
 0x109   : > { %3803 = vmatprep.subr.bf16.mxu1 %v4195_v32  ;;  %p5594_p13 = scmp.ne.s32.totalorder %s5566_s17, 0 }
 0x10e   : > { %s5474_s19 = scalar_lea.hbm %s5593_s7, %s3679_s9 }
 0x18f   : > { %v605_v8 = vpop.xlane.xlu0 %604  ;;  %v611_v9 = vpop.xlane.xlu1 %610 }
 0x190   : > { %v616_v10 = vmul.f32 0.03125, %v605_v8  ;;  %v618_v11 = vmul.f32 0.03125, %v611_v9 }
 0x192   : > { %v620_v12 = vsub.f32 %v596_v0, %v616_v10  ;;  %v622_v13 = vsub.f32 %v598_v1, %v618_v11  ;;  %v4196_v1 = vld [vmem:[%s5523_s2 + $0x18] sm:$0xff]  }
 0x193   : > { %v608_v14 = vpop.xlane.xlu0 %607  ;;  %v614_v15 = vpop.xlane.xlu1 %613 }
 0x194   : > { %v617_v16 = vmul.f32 0.03125, %v608_v14  ;;  %v619_v17 = vmul.f32 0.03125, %v614_v15  ;;  %v624_v18 = vmul.f32 %v620_v12, %v620_v12  ;;  %v626_v19 = vmul.f32 %v622_v13, %v622_v13  ;;  %v3595_v14 = vld [vmem:[#allocation7 + $0x1] ss:$0 sm:$0xff] }
 0x196   : > { %v621_v20 = vsub.f32 %v597_v2, %v617_v16  ;;  %v623_v21 = vsub.f32 %v599_v5, %v619_v17  ;;  %v628_v22 = vsel %vm602_vm0, %v624_v18, 0.0  ;;  %v634_v23 = vsel %vm602_vm0, %v626_v19, 0.0  ;;  %v3586_v16 = vld [vmem:[#allocation7] ss:$0 sm:$0xff] }
 0x197   : > { %629 = vadd.xlane.f32.xlu0 %v628_v22  ;;  %v4584_v2 = vmov 0.0  }
 0x198   : > { %v625_v24 = vmul.f32 %v621_v20, %v621_v20  ;;  %v627_v25 = vmul.f32 %v623_v21, %v623_v21  ;;  %3825 = vmatprep.subr.bf16.mxu0 %v4584_v2 }
 0x19a   : > { %v631_v26 = vsel %vm602_vm0, %v625_v24, 0.0  ;;  %v637_v27 = vsel %vm602_vm0, %v627_v25, 0.0 }
 0x19b   : > { %635 = vadd.xlane.f32.xlu0 %v634_v23  ;;  %632 = vadd.xlane.f32.xlu1 %v631_v26 }
 0x19f   : > { %638 = vadd.xlane.f32.xlu1 %v637_v27 }
 0x224   : > { %v630_v33 = vpop.xlane.xlu0 %629 }
 0x225   : > { %v640_v34 = vmul.f32 0.03125, %v630_v33 }
 0x227   : > { %v644_v35 = vadd.f32 1e-05, %v640_v34 }
 0x228   : > { %v633_v36 = vpop.xlane.xlu1 %632  ;;  %v636_v37 = vpop.xlane.xlu0 %635 }
 0x229   : > { %4203 = vrsqrt.f32 %v644_v35  ;;  %v641_v38 = vmul.f32 0.03125, %v633_v36  ;;  %v642_v39 = vmul.f32 0.03125, %v636_v37 }
 0x22b   : > { %v645_v40 = vadd.f32 1e-05, %v641_v38  ;;  %v646_v41 = vadd.f32 1e-05, %v642_v39 }
 0x22c   : > { %v639_v42 = vpop.xlane.xlu1 %638 }
 0x22d   : > { %4205 = vrsqrt.f32 %v645_v40  ;;  %v643_v43 = vmul.f32 0.03125, %v639_v42 }
 0x22e   : > { %4207 = vrsqrt.f32 %v646_v41 }
 0x22f   : > { %v647_v44 = vadd.f32 1e-05, %v643_v43 }
 0x231   : > { %4209 = vrsqrt.f32 %v647_v44 }
 0x233   : > { %v4204_v45 = vpop.eup %4203 }
 0x234   : > { %v652_v46 = vmul.f32 %v4204_v45, %v620_v12 }
 0x236   : > { %v662_v51 = vmul.f32 %v3584_v47, %v652_v46 }
 0x237   : > { %v4206_v48 = vpop.eup %4205 }
 0x238   : > { %v4208_v49 = vpop.eup %4207  ;;  %v653_v50 = vmul.f32 %v4206_v48, %v621_v20  ;;  %v672_v57 = vadd.f32 %v3585_v53, %v662_v51  ;;  %v908_v51 = vld [vmem:[%s4955_s12] sm:$0x1] }
 0x239   : > { %v654_v52 = vmul.f32 %v4208_v49, %v622_v13  ;;  %vm912_vm4 = vcmp.gt.f32.partialorder %v908_v51, 0.5 }
 0x23a   : > { %v663_v54 = vmul.f32 %v3584_v47, %v653_v50  ;;  %v1125_v50 = vlaneseq }
 0x23b   : > { %v4210_v55 = vpop.eup %4209  ;;  %v664_v59 = vmul.f32 %v3584_v47, %v654_v52 }
 0x23c   : > { %v655_v56 = vmul.f32 %v4210_v55, %v623_v21  ;;  %v673_v58 = vadd.f32 %v3585_v53, %v663_v54  ;;  %v1126_v52 = vshrl.u32 %v1125_v50, 7  ;;  %v4586_v55 = vmov 0  }
 0x23d   : > { %v674_v62 = vadd.f32 %v3585_v53, %v664_v59 }
 0x23e   : > { %v676_v60 = vpack.c.bf16 %v673_v58, %v672_v57  ;;  %v665_v61 = vmul.f32 %v3584_v47, %v655_v56  ;;  %v1127_v54 = vsub.s32 0, %v1126_v52  ;;  %v1121_v56 = vsel %vm912_vm4, 1, %v4586_v55  ;;  %v910_v58 = vld [vmem:[%s4955_s12 + $0x2] sm:$0x1] }
 0x23f   : > { %vm914_vm6 = vcmp.gt.f32.partialorder %v910_v58, 0.5 }
 0x240   : > { %3799 = vmatprep.mubr.msk.bf16.mxu1 %vm602_vm0, %v676_v60  ;;  %3815 = vmatprep.mubr.msk.bf16.mxu0 %vm602_vm0, %v676_v60  ;;  %v675_v63 = vadd.f32 %v3585_v53, %v665_v61  ;;  %v909_v53 = vld [vmem:[%s4955_s12 + $0x1] sm:$0x1]  ;;  %v1128_v59 = vrot.slane %v1121_v56, %v1127_v54 }
 0x241   : > { %vm913_vm5 = vcmp.gt.f32.partialorder %v909_v53, 0.5 }
 0x242   : > { %v677_v0 = vpack.c.bf16 %v675_v63, %v674_v62  ;;  %v1122_v57 = vsel %vm913_vm5, 1, %v4586_v55  ;;  %vm5080_vm7 = vcmp.eq.s32.totalorder %v1128_v59, 1  ;;  %v1123_v63 = vsel %vm914_vm6, 1, %v4586_v55 }
 0x243   : > { %v1132_v61 = vrot.slane %v1122_v57, %v1127_v54 }
 0x244   : > { %3800 = vmatmul.mubr.msk.bf16.vlgmr.msra.gmra.mrb[0].mxu1 %vm602_vm0, %v677_v0  ;;  %3816 = vmatmul.mubr.msk.bf16.vlgmr.msra.gmra.mrb[0].mxu0 %vm602_vm0, %v677_v0 }
 0x245   : > { %3804 = vmatpush3.bf16.msra.mxu1 %v4195_v32  ;;  %3807 = vmatprep.mubr.msk.bf16.mxu1 %vm602_vm0, %v676_v60  ;;  %v911_v60 = vld [vmem:[%s4955_s12 + $0x3] sm:$0x1]  ;;  %vm5084_vm9 = vcmp.eq.s32.totalorder %v1132_v61, 1  ;;  %s4588_s12 = smov 112  }
 0x246   : > { %3805 = vmatprep.subr.bf16.mxu1 %v4196_v1  ;;  %3827 = vmatprep.mubr.msk.bf16.mxu0 %vm4585_vm1, %v4584_v2  ;;  %vm915_vm8 = vcmp.gt.f32.partialorder %v911_v60, 0.5 }
 0x249   : > { %3806 = vmatpush3.bf16.msra.mxu1 %v4196_v1 }
 0x24a   : > { %3819 = vmatprep.subr.bf16.mxu1 %v4584_v2 }
 0x24c   : > { %3808 = vmatmul.mubr.msk.bf16.vlgmr.msra.gmra.mrb[4].mxu1 %vm602_vm0, %v677_v0 }
 0x24d   : > { %3821 = vmatprep.mubr.msk.bf16.mxu1 %vm4585_vm1, %v4584_v2 }
 0x317   : > { %v3801_v4 = vpop.f32.mrb[0].mxu1  ;;  %v3817_v5 = vpop.f32.mrb[0].mxu0 }
 0x318   : > { %v5018_v6 = vadd.f32 %v3817_v5, %v3604_v3  ;;  %v741_v7 = vpop.f32.mrb[1].mxu1  ;;  %v893_v8 = vpop.f32.mrb[1].mxu0  ;;  %v750_v33 = vadd.f32 %v3801_v4, %v3586_v16  ;;  %v1124_v5 = vsel %vm915_vm8, 1, %v4586_v55 }
 0x319   : > { %v3802_v9 = vpop.f32.mrb[2].mxu1  ;;  %v3818_v10 = vpop.f32.mrb[2].mxu0  ;;  %v742_v21 = vadd.f32 %v3586_v16, %v741_v7  ;;  %v894_v36 = vadd.f32 %v3604_v3, %v893_v8 }
 0x31a   : > { %v5020_v11 = vadd.f32 %v3818_v10, %v3604_v3  ;;  %v744_v12 = vpop.f32.mrb[3].mxu1  ;;  %v896_v13 = vpop.f32.mrb[3].mxu0  ;;  %v753_v37 = vadd.f32 %v3802_v9, %v3586_v16  ;;  %v758_v40 = vmul.f32 0.35355338, %v750_v33  ;;  %v1136_v10 = vrot.slane %v1123_v63, %v1127_v54 }
 0x31b   : > { %v745_v24 = vadd.f32 %v3586_v16, %v744_v12  ;;  %v756_v28 = vmul.f32 0.35355338, %v742_v21  ;;  %v897_v41 = vadd.f32 %v3604_v3, %v896_v13  ;;  %v5053_v43 = vpack.c.bf16 %v894_v36, %v894_v36 }
 0x31c   : > { %v759_v44 = vmul.f32 0.35355338, %v753_v37  ;;  %v5056_v45 = vpack.c.bf16 %v758_v40, %v758_v40  ;;  %vm5094_vm10 = vcmp.eq.s32.totalorder %v1136_v10, 1  ;;  %v5134_v10 = vpack.c.bf16 %v5020_v11, %v5020_v11 }
 0x31d   : > { %v757_v31 = vmul.f32 0.35355338, %v745_v24  ;;  %v5034_v34 = vpack.c.bf16 %v756_v28, %v756_v28  ;;  %v5058_v46 = vpack.c.bf16 %v897_v41, %v897_v41  ;;  %v1202_v48 = vsel %vm1200_vm3, %v5053_v43, 0 }
 0x31e   : > { %v5060_v47 = vpack.c.bf16 %v759_v44, %v759_v44 }
 0x31f   : > { %v3809_v15 = vpop.f32.mrb[4].mxu1  ;;  %v5038_v38 = vpack.c.bf16 %v757_v31, %v757_v31  ;;  %v1248_v49 = vsel %vm1200_vm3, %v5058_v46, 0 }
 0x320   : > { %v819_v17 = vpop.f32.mrb[5].mxu1  ;;  %v828_v25 = vadd.f32 %v3809_v15, %v3595_v14 }
 0x321   : > { %v820_v18 = vadd.f32 %v3595_v14, %v819_v17  ;;  %v3810_v19 = vpop.f32.mrb[6].mxu1  ;;  %v1140_v17 = vrot.slane %v1124_v5, %v1127_v54 }
 0x322   : > { %v822_v20 = vpop.f32.mrb[7].mxu1  ;;  %v831_v29 = vadd.f32 %v3810_v19, %v3595_v14  ;;  %v5031_v32 = vpack.c.bf16 %v828_v25, %v828_v25 }
 0x323   : > { %v5022_v22 = vpack.c.bf16 %v820_v18, %v820_v18  ;;  %v823_v23 = vadd.f32 %v3595_v14, %v822_v20  ;;  %vm5098_vm11 = vcmp.eq.s32.totalorder %v1140_v17, 1 }
 0x324   : > { %v5036_v35 = vpack.c.bf16 %v831_v29, %v831_v29  ;;  %v1033_v39 = vsel %vm936_vm2, %v5031_v32, 0 }
 0x325   : > { %v5024_v26 = vpack.c.bf16 %v823_v23, %v823_v23  ;;  %v941_v27 = vsel %vm936_vm2, %v5022_v22, 0 }
 0x326   : > { %3820 = vmatpush3.bf16.xpose.msra.mxu1 %v941_v27  ;;  %v1079_v42 = vsel %vm936_vm2, %v5036_v35, 0 }
 0x327   : > { %v987_v30 = vsel %vm936_vm2, %v5024_v26, 0  ;;  %3831 = vmatprep.subr.bf16.mxu1 %v4584_v2 }
 0x328   : > { %3826 = vmatpush3.bf16.xpose.msra.mxu0 %v987_v30 }
 0x329   : > { %3837 = vmatprep.subr.bf16.mxu0 %v4584_v2 }
 0x32d   : > { %3822 = vmatmul.mubr.msk.bf16.vlgmr.msra.gmra.mrb[8].mxu1 %vm936_vm2, %v5034_v34 }
 0x32e   : > { %3832 = vmatpush3.bf16.xpose.msra.mxu1 %v1033_v39  ;;  %3833 = vmatprep.mubr.msk.bf16.mxu1 %vm4585_vm1, %v4584_v2 }
 0x32f   : > { %3828 = vmatmul.mubr.msk.bf16.vlgmr.msra.gmra.mrb[4].mxu0 %vm936_vm2, %v5038_v38  ;;  %3843 = vmatprep.subr.bf16.mxu1 %v4584_v2 }
 0x330   : > { %3838 = vmatpush3.bf16.xpose.msra.mxu0 %v1079_v42  ;;  %3839 = vmatprep.mubr.msk.bf16.mxu0 %vm4585_vm1, %v4584_v2 }
 0x331   : > { %3849 = vmatprep.subr.bf16.mxu0 %v4584_v2 }
 0x335   : > { %3834 = vmatmul.mubr.msk.bf16.vlgmr.msra.gmra.mrb[12].mxu1 %vm936_vm2, %v5056_v45 }
 0x336   : > { %3844 = vmatpush3.bf16.msra.mxu1 %v1202_v48  ;;  %3845 = vmatprep.mubr.msk.bf16.mxu1 %vm4585_vm1, %v4584_v2 }
 0x337   : > { %3840 = vmatmul.mubr.msk.bf16.vlgmr.msra.gmra.mrb[8].mxu0 %vm936_vm2, %v5060_v47  ;;  %3855 = vmatprep.subr.bf16.mxu1 %v4584_v2 }
 0x338   : > { %3850 = vmatpush3.bf16.msra.mxu0 %v1248_v49  ;;  %3851 = vmatprep.mubr.msk.bf16.mxu0 %vm4585_vm1, %v4584_v2 }
 0x339   : > { %3861 = vmatprep.subr.bf16.mxu0 %v4584_v2 }
 0x400   : > { %v977_v0 = vpop.f32.mrb[8].mxu1 }
 0x401   : > { %v1145_v3 = vsel %vm5080_vm7, -1e+30, %v977_v0  ;;  %v3823_v4 = vpop.f32.mrb[9].mxu1 }
 0x402   : > { %v980_v7 = vpop.f32.mrb[10].mxu1  ;;  %v1023_v8 = vpop.f32.mrb[4].mxu0  ;;  %v1149_v9 = vsel %vm936_vm2, %v1145_v3, -inf }
 0x403   : > { %v1146_v12 = vsel %vm5084_vm9, -1e+30, %v1023_v8  ;;  %v3829_v13 = vpop.f32.mrb[5].mxu0  ;;  %1150 = vmax.xlane.f32.xlu0 %v1149_v9  ;;  %v3824_v14 = vpop.f32.mrb[11].mxu1  ;;  %v5130_v7 = vpack.c.bf16 %v5018_v6, %v5018_v6  ;;  %v1340_v6 = vsel %vm1200_vm3, %v5134_v10, 0 }
 0x404   : > { %v1026_v15 = vpop.f32.mrb[6].mxu0  ;;  %v1152_v16 = vsel %vm936_vm2, %v1146_v12, -inf }
 0x405   : > { %1153 = vmax.xlane.f32.xlu1 %v1152_v16  ;;  %v3830_v18 = vpop.f32.mrb[7].mxu0  ;;  %v1294_v14 = vsel %vm1200_vm3, %v5130_v7, 0 }
 0x408   : > { %v1069_v20 = vpop.f32.mrb[12].mxu1 }
 0x409   : > { %v1147_v23 = vsel %vm5094_vm10, -1e+30, %v1069_v20  ;;  %v3835_v24 = vpop.f32.mrb[13].mxu1 }
 0x40a   : > { %v1072_v25 = vpop.f32.mrb[14].mxu1  ;;  %v1115_v27 = vpop.f32.mrb[8].mxu0  ;;  %v1155_v28 = vsel %vm936_vm2, %v1147_v23, -inf }
 0x40b   : > { %v1148_v29 = vsel %vm5098_vm11, -1e+30, %v1115_v27  ;;  %v3841_v30 = vpop.f32.mrb[9].mxu0  ;;  %1156 = vmax.xlane.f32.xlu0 %v1155_v28  ;;  %v3836_v31 = vpop.f32.mrb[15].mxu1 }
 0x40c   : > { %v1118_v33 = vpop.f32.mrb[10].mxu0  ;;  %v1158_v36 = vsel %vm936_vm2, %v1148_v29, -inf }
 0x40d   : > { %1159 = vmax.xlane.f32.xlu1 %v1158_v36  ;;  %v3842_v37 = vpop.f32.mrb[11].mxu0 }
 0x490   : > { %v1151_v39 = vpop.xlane.xlu0 %1150 }
 0x491   : > { %v1161_v40 = vsub.f32 %v1145_v3, %v1151_v39 }
 0x492   : > { %v1154_v41 = vpop.xlane.xlu1 %1153 }
 0x493   : > { %v1165_v42 = vmul.f32 1.442695, %v1161_v40  ;;  %v1162_v44 = vsub.f32 %v1146_v12, %v1154_v41 }
 0x495   : > { %4211 = vpow2.f32 %v1165_v42  ;;  %v1167_v48 = vmul.f32 1.442695, %v1162_v44 }
 0x497   : > { %4213 = vpow2.f32 %v1167_v48 }
 0x498   : > { %v1157_v49 = vpop.xlane.xlu0 %1156 }
 0x499   : > { %v1163_v50 = vsub.f32 %v1147_v23, %v1157_v49 }
 0x49a   : > { %v1160_v58 = vpop.xlane.xlu1 %1159 }
 0x49b   : > { %v1169_v51 = vmul.f32 1.442695, %v1163_v50  ;;  %v1164_v59 = vsub.f32 %v1148_v29, %v1160_v58 }
 0x49d   : > { %4215 = vpow2.f32 %v1169_v51  ;;  %v1171_v60 = vmul.f32 1.442695, %v1164_v59 }
 0x49f   : > { %v4212_v52 = vpop.eup %4211  ;;  %4217 = vpow2.f32 %v1171_v60 }
 0x4a0   : > { %v1173_v53 = vsel %vm936_vm2, %v4212_v52, 0.0 }
 0x4a1   : > { %v4214_v54 = vpop.eup %4213  ;;  %1174 = vadd.xlane.f32.xlu0 %v1173_v53 }
 0x4a2   : > { %v1176_v55 = vsel %vm936_vm2, %v4214_v54, 0.0 }
 0x4a3   : > { %1177 = vadd.xlane.f32.xlu1 %v1176_v55 }
 0x4a7   : > { %v4216_v56 = vpop.eup %4215 }
 0x4a8   : > { %v1179_v57 = vsel %vm936_vm2, %v4216_v56, 0.0 }
 0x4a9   : > { %1180 = vadd.xlane.f32.xlu0 %v1179_v57  ;;  %v4218_v61 = vpop.eup %4217 }
 0x4aa   : > { %v1182_v63 = vsel %vm936_vm2, %v4218_v61, 0.0 }
 0x4b4   : > { %1438 = vrot.lane.b32.xlu1 %v5024_v26, %s4587_s20 }
 0x4b8   : > { %1383 = vrot.lane.b32.xlu1 %v5034_v34, %s4587_s20 }
 0x4bf   : > { %1386 = vrot.lane.b32.xlu0 %v5022_v22, %s4587_s20 }
 0x4c3   : > { %1435 = vrot.lane.b32.xlu0 %v5038_v38, %s4587_s20 }
 0x4c7   : > { %1487 = vrot.lane.b32.xlu0 %v5056_v45, %s4587_s20 }
 0x4dc   : > { %1183 = vadd.xlane.f32.xlu1 %v1182_v63 }
 0x4ed   : > { %1490 = vrot.lane.b32.xlu1 %v5031_v32, %s4587_s20 }
 0x4f1   : > { %1542 = vrot.lane.b32.xlu1 %v5036_v35, %s4587_s20 }
 0x4f5   : > { %1539 = vrot.lane.b32.xlu1 %v5060_v47, %s4587_s20 }
 0x52e   : > { %v1175_v0 = vpop.xlane.xlu0 %1174 }
 0x52f   : > { %4219 = vrcp.f32 %v1175_v0 }
 0x530   : > { %v1178_v3 = vpop.xlane.xlu1 %1177 }
 0x531   : > { %4221 = vrcp.f32 %v1178_v3 }
 0x534   : > { %v1439_v23 = vpop.permute.xlu1 %1438 }
 0x535   : > { %v1444_v37 = vsel %vm936_vm2, %v1439_v23, 0 }
 0x536   : > { %v1181_v4 = vpop.xlane.xlu0 %1180 }
 0x537   : > { %4223 = vrcp.f32 %v1181_v4 }
 0x538   : > { %v1384_v24 = vpop.permute.xlu1 %1383 }
 0x539   : > { %v4220_v5 = vpop.eup %4219 }
 0x53a   : > { %v1189_v8 = vmul.f32 %v4220_v5, %v4212_v52  ;;  %v1387_v17 = vpop.permute.xlu0 %1386 }
 0x53b   : > { %v4222_v9 = vpop.eup %4221  ;;  %v1392_v20 = vsel %vm936_vm2, %v1387_v17, 0 }
 0x53c   : > { %v1190_v12 = vmul.f32 %v4222_v9, %v4214_v54  ;;  %v1193_v13 = vpack.c.bf16 %v1189_v8, %v1189_v8 }
 0x53e   : > { %3846 = vmatmul.mubr.msk.bf16.vlgmr.msra.gmra.mrb[16].mxu1 %vm936_vm2, %v1193_v13  ;;  %v1194_v15 = vpack.c.bf16 %v1190_v12, %v1190_v12  ;;  %v1436_v29 = vpop.permute.xlu0 %1435 }
 0x53f   : > { %3856 = vmatpush3.bf16.msra.mxu1 %v1294_v14  ;;  %3857 = vmatprep.mubr.msk.bf16.mxu1 %vm4585_vm1, %v4584_v2 }
 0x540   : > { %3852 = vmatmul.mubr.msk.bf16.vlgmr.msra.gmra.mrb[12].mxu0 %vm936_vm2, %v1194_v15  ;;  %3867 = vmatprep.subr.bf16.mxu1 %v4584_v2 }
 0x541   : > { %v4224_v11 = vpop.eup %4223  ;;  %3862 = vmatpush3.bf16.msra.mxu0 %v1340_v6  ;;  %3863 = vmatprep.mubr.msk.bf16.mxu0 %vm4585_vm1, %v4584_v2 }
 0x542   : > { %v1191_v16 = vmul.f32 %v4224_v11, %v4216_v56  ;;  %3873 = vmatprep.subr.bf16.mxu0 %v4584_v2  ;;  %v1488_v31 = vpop.permute.xlu0 %1487 }
 0x544   : > { %v1195_v18 = vpack.c.bf16 %v1191_v16, %v1191_v16 }
 0x546   : > { %3858 = vmatmul.mubr.msk.bf16.vlgmr.msra.gmra.mrb[20].mxu1 %vm936_vm2, %v1195_v18 }
 0x547   : > { %3869 = vmatprep.mubr.msk.bf16.mxu1 %vm4585_vm1, %v4584_v2 }
 0x548   : > { %3868 = vmatpush3.bf16.xpose.msra.mxu1 %v1392_v20 }
 0x549   : > { %3879 = vmatprep.subr.bf16.mxu1 %v4584_v2 }
 0x54f   : > { %3870 = vmatmul.mubr.msk.bf16.vlgmr.msra.gmra.mrb[24].mxu1 %vm936_vm2, %v1384_v24 }
 0x550   : > { %3881 = vmatprep.mubr.msk.bf16.mxu1 %vm4585_vm1, %v4584_v2 }
 0x569   : > { %v1184_v25 = vpop.xlane.xlu1 %1183 }
 0x56a   : > { %4225 = vrcp.f32 %v1184_v25 }
 0x56d   : > { %v1491_v27 = vpop.permute.xlu1 %1490 }
 0x56e   : > { %v1496_v28 = vsel %vm936_vm2, %v1491_v27, 0 }
 0x56f   : > { %3880 = vmatpush3.bf16.xpose.msra.mxu1 %v1496_v28 }
 0x570   : > { %3891 = vmatprep.subr.bf16.mxu1 %v4584_v2 }
 0x571   : > { %v1543_v39 = vpop.permute.xlu1 %1542 }
 0x572   : > { %v1548_v40 = vsel %vm936_vm2, %v1543_v39, 0 }
 0x574   : > { %v4226_v30 = vpop.eup %4225 }
 0x575   : > { %v1192_v33 = vmul.f32 %v4226_v30, %v4218_v61  ;;  %v1540_v41 = vpop.permute.xlu1 %1539 }
 0x576   : > { %3882 = vmatmul.mubr.msk.bf16.vlgmr.msra.gmra.mrb[28].mxu1 %vm936_vm2, %v1488_v31 }
 0x577   : > { %v1196_v36 = vpack.c.bf16 %v1192_v33, %v1192_v33  ;;  %3893 = vmatprep.mubr.msk.bf16.mxu1 %vm4585_vm1, %v4584_v2 }
 0x579   : > { %3864 = vmatmul.mubr.msk.bf16.vlgmr.msra.gmra.mrb[16].mxu0 %vm936_vm2, %v1196_v36 }
 0x57a   : > { %3874 = vmatpush3.bf16.xpose.msra.mxu0 %v1444_v37  ;;  %3875 = vmatprep.mubr.msk.bf16.mxu0 %vm4585_vm1, %v4584_v2 }
 0x57b   : > { %3885 = vmatprep.subr.bf16.mxu0 %v4584_v2 }
 0x581   : > { %3876 = vmatmul.mubr.msk.bf16.vlgmr.msra.gmra.mrb[20].mxu0 %vm936_vm2, %v1436_v29 }
 0x582   : > { %3886 = vmatpush3.bf16.xpose.msra.mxu0 %v1548_v40  ;;  %3887 = vmatprep.mubr.msk.bf16.mxu0 %vm4585_vm1, %v4584_v2 }
 0x583   : > { %3897 = vmatprep.subr.bf16.mxu0 %v4584_v2 }
 0x589   : > { %3888 = vmatmul.mubr.msk.bf16.vlgmr.msra.gmra.mrb[24].mxu0 %vm936_vm2, %v1540_v41 }
 0x58a   : > { %3899 = vmatprep.mubr.msk.bf16.mxu0 %vm4585_vm1, %v4584_v2 }
 0x611   : > { %v5174_v42 = vpop.f32.mrb[16].mxu1 }
 0x612   : > { %v3847_v44 = vpop.f32.mrb[17].mxu1 }
 0x613   : > { %v1241_v48 = vpop.f32.mrb[18].mxu1  ;;  %v5176_v49 = vpop.f32.mrb[12].mxu0 }
 0x614   : > { %v3848_v50 = vpop.f32.mrb[19].mxu1  ;;  %v3853_v51 = vpop.f32.mrb[13].mxu0 }
 0x615   : > { %v1287_v52 = vpop.f32.mrb[14].mxu0 }
 0x616   : > { %v3854_v53 = vpop.f32.mrb[15].mxu0 }
 0x619   : > { %v5178_v54 = vpop.f32.mrb[20].mxu1 }
 0x61a   : > { %v3859_v55 = vpop.f32.mrb[21].mxu1 }
 0x61b   : > { %v1333_v56 = vpop.f32.mrb[22].mxu1 }
 0x61c   : > { %v3860_v57 = vpop.f32.mrb[23].mxu1 }
 0x622   : > { %v1428_v58 = vpop.f32.mrb[24].mxu1 }
 0x623   : > { %v1590_v59 = vsel %vm5080_vm7, -1e+30, %v1428_v58  ;;  %v3871_v60 = vpop.f32.mrb[25].mxu1 }
 0x624   : > { %v1431_v61 = vpop.f32.mrb[26].mxu1  ;;  %v1594_v63 = vsel %vm936_vm2, %v1590_v59, -inf }
 0x625   : > { %1595 = vmax.xlane.f32.xlu0 %v1594_v63  ;;  %v3872_v0 = vpop.f32.mrb[27].mxu1 }
 0x649   : > { %v1532_v3 = vpop.f32.mrb[28].mxu1 }
 0x64a   : > { %v1592_v4 = vsel %vm5094_vm10, -1e+30, %v1532_v3  ;;  %v3883_v5 = vpop.f32.mrb[29].mxu1 }
 0x64b   : > { %v1535_v8 = vpop.f32.mrb[30].mxu1  ;;  %v1600_v9 = vsel %vm936_vm2, %v1592_v4, -inf }
 0x64c   : > { %v5186_v12 = vpop.f32.mrb[16].mxu0  ;;  %1601 = vmax.xlane.f32.xlu0 %v1600_v9  ;;  %v3884_v13 = vpop.f32.mrb[31].mxu1 }
 0x64d   : > { %v3865_v14 = vpop.f32.mrb[17].mxu0 }
 0x64e   : > { %v1379_v15 = vpop.f32.mrb[18].mxu0 }
 0x64f   : > { %v3866_v6 = vpop.f32.mrb[19].mxu0 }
 0x654   : > { %v1480_v11 = vpop.f32.mrb[20].mxu0 }
 0x655   : > { %v1591_v16 = vsel %vm5084_vm9, -1e+30, %v1480_v11  ;;  %v3877_v17 = vpop.f32.mrb[21].mxu0 }
 0x656   : > { %v1483_v18 = vpop.f32.mrb[22].mxu0  ;;  %v1597_v20 = vsel %vm936_vm2, %v1591_v16, -inf }
 0x657   : > { %1598 = vmax.xlane.f32.xlu1 %v1597_v20  ;;  %v3878_v23 = vpop.f32.mrb[23].mxu0 }
 0x65c   : > { %v1584_v24 = vpop.f32.mrb[24].mxu0 }
 0x65d   : > { %v1593_v25 = vsel %vm5098_vm11, -1e+30, %v1584_v24  ;;  %v3889_v27 = vpop.f32.mrb[25].mxu0 }
 0x65e   : > { %v1587_v28 = vpop.f32.mrb[26].mxu0  ;;  %v1603_v29 = vsel %vm936_vm2, %v1593_v25, -inf }
 0x65f   : > { %v3890_v30 = vpop.f32.mrb[27].mxu0  ;;  %1604 = vmax.xlane.f32.xlu0 %v1603_v29 }
 0x6b2   : > { %v1596_v31 = vpop.xlane.xlu0 %1595 }
 0x6b3   : > { %v1606_v33 = vsub.f32 %v1590_v59, %v1596_v31 }
 0x6b5   : > { %v1610_v36 = vmul.f32 1.442695, %v1606_v33 }
 0x6b7   : > { %4227 = vpow2.f32 %v1610_v36 }
 0x6c1   : > { %v4228_v37 = vpop.eup %4227 }
 0x6c2   : > { %v1618_v39 = vsel %vm936_vm2, %v4228_v37, 0.0 }
 0x6c3   : > { %1619 = vadd.xlane.f32.xlu0 %v1618_v39 }
 0x6d9   : > { %v1602_v40 = vpop.xlane.xlu0 %1601 }
 0x6da   : > { %v1608_v41 = vsub.f32 %v1592_v4, %v1602_v40 }
 0x6dc   : > { %v1614_v44 = vmul.f32 1.442695, %v1608_v41 }
 0x6de   : > { %4229 = vpow2.f32 %v1614_v44 }
 0x6e4   : > { %v1599_v48 = vpop.xlane.xlu1 %1598 }
 0x6e5   : > { %v1607_v50 = vsub.f32 %v1591_v16, %v1599_v48 }
 0x6e7   : > { %v1612_v51 = vmul.f32 1.442695, %v1607_v50 }
 0x6e8   : > { %v4230_v52 = vpop.eup %4229 }
 0x6e9   : > { %4231 = vpow2.f32 %v1612_v51  ;;  %v1624_v53 = vsel %vm936_vm2, %v4230_v52, 0.0 }
 0x6ea   : > { %1625 = vadd.xlane.f32.xlu0 %v1624_v53 }
 0x6ec   : > { %v1605_v57 = vpop.xlane.xlu0 %1604 }
 0x6ed   : > { %v1609_v58 = vsub.f32 %v1593_v25, %v1605_v57 }
 0x6ef   : > { %v1616_v59 = vmul.f32 1.442695, %v1609_v58 }
 0x6f1   : > { %4233 = vpow2.f32 %v1616_v59 }
 0x6f3   : > { %v4232_v55 = vpop.eup %4231 }
 0x6f4   : > { %v1621_v56 = vsel %vm936_vm2, %v4232_v55, 0.0 }
 0x6f5   : > { %1622 = vadd.xlane.f32.xlu1 %v1621_v56 }
 0x6fb   : > { %v4234_v60 = vpop.eup %4233 }
 0x6fc   : > { %v1627_v61 = vsel %vm936_vm2, %v4234_v60, 0.0 }
 0x700   : > { %1643 = vrot.lane.b32.xlu0 %v5053_v43, %s4587_s20 }
 0x704   : > { %2034 = vrot.lane.b32.xlu0 %v5022_v22, %s4588_s12 }
 0x706   : > { %1692 = vrot.lane.b32.xlu1 %v5058_v46, %s4587_s20 }
 0x708   : > { %2084 = vrot.lane.b32.xlu0 %v5024_v26, %s4588_s12 }
 0x70a   : > { %1741 = vrot.lane.b32.xlu1 %v5130_v7, %s4587_s20 }
 0x70c   : > { %2082 = vrot.lane.b32.xlu0 %v5038_v38, %s4588_s12 }
 0x710   : > { %2132 = vrot.lane.b32.xlu0 %v5056_v45, %s4588_s12 }
 0x72e   : > { %1628 = vadd.xlane.f32.xlu1 %v1627_v61 }
 0x73f   : > { %1790 = vrot.lane.b32.xlu1 %v5134_v10, %s4587_s20  ;;  %s4487_s20 = scalar_lea.vmem %s5467_s13, 512 }
 0x740   : > { %p4488_p2 = scmp.ne.s32.totalorder %s5467_s13, %s4487_s20 }
 0x742   : > { %p4489_p6 = pnand %p4488_p2, %p5594_p13 }
 0x743   : > { %2032 = vrot.lane.b32.xlu1 %v5034_v34, %s4588_s12 }
 0x744   : > { %p4490_p9 = pneg %p4489_p6 }
 0x747   : > { %2134 = vrot.lane.b32.xlu1 %v5031_v32, %s4588_s12 }
 0x74b   : > { %2184 = vrot.lane.b32.xlu1 %v5036_v35, %s4588_s12 }
 0x74f   : > { %2182 = vrot.lane.b32.xlu1 %v5060_v47, %s4588_s12 }
 0x750   : > { %v1620_v63 = vpop.xlane.xlu0 %1619 }
 0x751   : > { %4235 = vrcp.f32 %v1620_v63 }
 0x75b   : > { %v4236_v0 = vpop.eup %4235 }
 0x75c   : > { %v1634_v4 = vmul.f32 %v4236_v0, %v4228_v37 }
 0x75e   : > { %v1638_v9 = vpack.c.bf16 %v1634_v4, %v1634_v4 }
 0x777   : > { %v1626_v3 = vpop.xlane.xlu0 %1625 }
 0x778   : > { %4237 = vrcp.f32 %v1626_v3 }
 0x77b   : > { %v1644_v5 = vpop.permute.xlu0 %1643 }
 0x77c   : > { %v1649_v8 = vsel %vm1200_vm3, %v1644_v5, 0 }
 0x77d   : > { %3892 = vmatpush3.bf16.msra.mxu1 %v1649_v8 }
 0x77e   : > { %3903 = vmatprep.subr.bf16.mxu1 %v4584_v2 }
 0x77f   : > { %v2035_v31 = vpop.permute.xlu0 %2034 }
 0x780   : > { %3894 = vmatmul.mubr.msk.bf16.vlgmr.msra.gmra.mrb[32].mxu1 %vm936_vm2, %v1638_v9  ;;  %v2040_v36 = vsel %vm936_vm2, %v2035_v31, 0 }
 0x781   : > { %3905 = vmatprep.mubr.msk.bf16.mxu1 %vm4585_vm1, %v4584_v2 }
 0x782   : > { %v1623_v13 = vpop.xlane.xlu1 %1622  ;;  %v4238_v14 = vpop.eup %4237 }
 0x783   : > { %4239 = vrcp.f32 %v1623_v13  ;;  %v1636_v11 = vmul.f32 %v4238_v14, %v4230_v52  ;;  %v2085_v39 = vpop.permute.xlu0 %2084  ;;  %v3681_v52 = vld [vmem:[#allocation8] sm:$0xff]  }
 0x784   : > { %v2090_v41 = vsel %vm936_vm2, %v2085_v39, 0  ;;  %v3683_v53 = vunpack.c.h.bf16 %v3681_v52 }
 0x785   : > { %v1640_v20 = vpack.c.bf16 %v1636_v11, %v1636_v11 }
 0x786   : > { %v1693_v15 = vpop.permute.xlu1 %1692 }
 0x787   : > { %v1698_v6 = vsel %vm1200_vm3, %v1693_v15, 0  ;;  %v2083_v48 = vpop.permute.xlu0 %2082 }
 0x788   : > { %3898 = vmatpush3.bf16.msra.mxu0 %v1698_v6 }
 0x789   : > { %3909 = vmatprep.subr.bf16.mxu0 %v4584_v2 }
 0x78a   : > { %v1742_v16 = vpop.permute.xlu1 %1741 }
 0x78b   : > { %v1747_v17 = vsel %vm1200_vm3, %v1742_v16, 0 }
 0x78c   : > { %3904 = vmatpush3.bf16.msra.mxu1 %v1747_v17 }
 0x78d   : > { %v4240_v18 = vpop.eup %4239  ;;  %3915 = vmatprep.subr.mxu1 %v3683_v53 }
 0x78e   : > { %v1635_v23 = vmul.f32 %v4240_v18, %v4232_v55  ;;  %v3682_v55 = vunpack.c.l.bf16 %v3681_v52 }
 0x78f   : > { %3906 = vmatmul.mubr.msk.bf16.vlgmr.msra.gmra.mrb[36].mxu1 %vm936_vm2, %v1640_v20  ;;  %v2133_v20 = vpop.permute.xlu0 %2132 }
 0x790   : > { %v1639_v24 = vpack.c.bf16 %v1635_v23, %v1635_v23  ;;  %3916 = vmatpush3.msra.mxu1 %v3683_v53 }
 0x791   : > { %3923 = vmatprep.subr.mxu1 %v3682_v55 }
 0x792   : > { %3900 = vmatmul.mubr.msk.bf16.vlgmr.msra.gmra.mrb[28].mxu0 %vm936_vm2, %v1639_v24 }
 0x793   : > { %3911 = vmatprep.mubr.msk.bf16.mxu0 %vm4585_vm1, %v4584_v2 }
 0x7bb   : > { %v1629_v25 = vpop.xlane.xlu1 %1628 }
 0x7bc   : > { %4241 = vrcp.f32 %v1629_v25 }
 0x7bf   : > { %v1791_v27 = vpop.permute.xlu1 %1790 }
 0x7c0   : > { %v1796_v28 = vsel %vm1200_vm3, %v1791_v27, 0 }
 0x7c1   : > { %3910 = vmatpush3.bf16.msra.mxu0 %v1796_v28 }
 0x7c2   : > { %3931 = vmatprep.subr.bf16.mxu0 %v4584_v2 }
 0x7c3   : > { %v2033_v37 = vpop.permute.xlu1 %2032 }
 0x7c6   : > { %v4242_v29 = vpop.eup %4241 }
 0x7c7   : > { %v1637_v30 = vmul.f32 %v4242_v29, %v4234_v60  ;;  %v2135_v40 = vpop.permute.xlu1 %2134 }
 0x7c8   : > { %v2140_v6 = vsel %vm936_vm2, %v2135_v40, 0 }
 0x7c9   : > { %v1641_v33 = vpack.c.bf16 %v1637_v30, %v1637_v30 }
 0x7cb   : > { %3912 = vmatmul.mubr.msk.bf16.vlgmr.msra.gmra.mrb[32].mxu0 %vm936_vm2, %v1641_v33  ;;  %v2185_v44 = vpop.permute.xlu1 %2184 }
 0x7cc   : > { %3932 = vmatpush3.bf16.xpose.msra.mxu0 %v2040_v36  ;;  %3933 = vmatprep.mubr.msk.bf16.mxu0 %vm4585_vm1, %v4584_v2  ;;  %v2190_v50 = vsel %vm936_vm2, %v2185_v44, 0 }
 0x7cd   : > { %3937 = vmatprep.subr.bf16.mxu0 %v4584_v2 }
 0x7cf   : > { %v2183_v51 = vpop.permute.xlu1 %2182 }
 0x7d3   : > { %3934 = vmatmul.mubr.msk.bf16.vlgmr.msra.gmra.mrb[36].mxu0 %vm936_vm2, %v2033_v37 }
 0x7d4   : > { %3938 = vmatpush3.bf16.xpose.msra.mxu0 %v2090_v41  ;;  %3939 = vmatprep.mubr.msk.bf16.mxu0 %vm4585_vm1, %v4584_v2 }
 0x7d5   : > { %3949 = vmatprep.subr.bf16.mxu0 %v4584_v2 }
 0x7db   : > { %3940 = vmatmul.mubr.msk.bf16.vlgmr.msra.gmra.mrb[40].mxu0 %vm936_vm2, %v2083_v48 }
 0x7dc   : > { %3950 = vmatpush3.bf16.xpose.msra.mxu0 %v2190_v50  ;;  %3951 = vmatprep.mubr.msk.bf16.mxu0 %vm4585_vm1, %v4584_v2 }
 0x7dd   : > { %3961 = vmatprep.subr.bf16.mxu0 %v4584_v2 }
 0x7e3   : > { %3952 = vmatmul.mubr.msk.bf16.vlgmr.msra.gmra.mrb[44].mxu0 %vm936_vm2, %v2183_v51 }
 0x7e4   : > { %3963 = vmatprep.mubr.msk.bf16.mxu0 %vm4585_vm1, %v4584_v2 }
 0x853   : > { %v1685_v56 = vpop.f32.mrb[32].mxu1 }
 0x854   : > { %v3895_v57 = vpop.f32.mrb[33].mxu1  ;;  %3917 = vmatprep.mubr.msk.f32.mxu1 %vm936_vm2, %v1685_v56 }
 0x855   : > { %v1688_v58 = vpop.f32.mrb[34].mxu1 }
 0x856   : > { %v3896_v59 = vpop.f32.mrb[35].mxu1 }
 0x862   : > { %v1783_v60 = vpop.f32.mrb[36].mxu1 }
 0x863   : > { %v3907_v61 = vpop.f32.mrb[37].mxu1 }
 0x864   : > { %v1786_v63 = vpop.f32.mrb[38].mxu1 }
 0x865   : > { %v1734_v0 = vpop.f32.mrb[28].mxu0  ;;  %v3908_v3 = vpop.f32.mrb[39].mxu1 }
 0x866   : > { %v3901_v4 = vpop.f32.mrb[29].mxu0  ;;  %3918 = vmatmul.mubr.msk.f32.vlgmr.msra.gmra.mrb[40].mxu1 %vm936_vm2, %v1734_v0 }
 0x867   : > { %v1737_v5 = vpop.f32.mrb[30].mxu0  ;;  %3920 = vmatprep.mubr.msk.f32.mxu1 %vm936_vm2, %v1783_v60  ;;  %3924 = vmatpush3.msra.mxu1 %v3682_v55 }
 0x868   : > { %v3902_v8 = vpop.f32.mrb[31].mxu0  ;;  %3943 = vmatprep.subr.bf16.mxu1 %v4584_v2 }
 0x89e   : > { %v1832_v9 = vpop.f32.mrb[32].mxu0 }
 0x89f   : > { %v3913_v13 = vpop.f32.mrb[33].mxu0  ;;  %3921 = vmatmul.mubr.msk.f32.gmra.mrb[42].mxu1 %vm936_vm2, %v1832_v9 }
 0x8a0   : > { %v1835_v14 = vpop.f32.mrb[34].mxu0  ;;  %3925 = vmatprep.mubr.msk.f32.mxu1 %vm936_vm2, %v5174_v42 }
 0x8a1   : > { %v3914_v15 = vpop.f32.mrb[35].mxu0 }
 0x8a3   : > { %3926 = vmatmul.mubr.msk.f32.vlgmr.msra.gmra.mrb[40].mxu1 %vm936_vm2, %v5176_v49 }
 0x8a4   : > { %3944 = vmatpush3.bf16.xpose.msra.mxu1 %v2140_v6  ;;  %3928 = vmatprep.mubr.msk.f32.mxu1 %vm936_vm2, %v5178_v54 }
 0x8a5   : > { %3955 = vmatprep.subr.bf16.mxu1 %v4584_v2 }
 0x8a6   : > { %v2076_v11 = vpop.f32.mrb[36].mxu0 }
 0x8a7   : > { %v2232_v16 = vsel %vm5080_vm7, -1e+30, %v2076_v11  ;;  %3929 = vmatmul.mubr.msk.f32.gmra.mrb[42].mxu1 %vm936_vm2, %v5186_v12  ;;  %v3935_v42 = vpop.f32.mrb[37].mxu0 }
 0x8a8   : > { %v2079_v17 = vpop.f32.mrb[38].mxu0  ;;  %v2236_v18 = vsel %vm936_vm2, %v2232_v16, -inf  ;;  %3945 = vmatprep.mubr.msk.bf16.mxu1 %vm4585_vm1, %v4584_v2  ;;  %v5316_v42 = vld [vmem:[#allocation8 + $0x8] sm:$0xff]  }
 0x8a9   : > { %2237 = vmax.xlane.f32.xlu0 %v2236_v18  ;;  %v3936_v49 = vpop.f32.mrb[39].mxu0 }
 0x8ab   : > { %3946 = vmatmul.mubr.msk.bf16.vlgmr.msra.gmra.mrb[44].mxu1 %vm936_vm2, %v2133_v20  ;;  %v3686_v20 = vunpack.c.l.bf16 %v5316_v42 }
 0x8ac   : > { %3957 = vmatprep.mubr.msk.bf16.mxu1 %vm4585_vm1, %v4584_v2 }
 0x8ae   : > { %v2126_v54 = vpop.f32.mrb[40].mxu0 }
 0x8af   : > { %v2233_v23 = vsel %vm5084_vm9, -1e+30, %v2126_v54  ;;  %v3941_v12 = vpop.f32.mrb[41].mxu0 }
 0x8b0   : > { %v2129_v24 = vpop.f32.mrb[42].mxu0  ;;  %v2239_v25 = vsel %vm936_vm2, %v2233_v23, -inf }
 0x8b1   : > { %2240 = vmax.xlane.f32.xlu1 %v2239_v25  ;;  %v3942_v27 = vpop.f32.mrb[43].mxu0 }
 0x8b6   : > { %v2226_v28 = vpop.f32.mrb[44].mxu0 }
 0x8b7   : > { %v3953_v29 = vpop.f32.mrb[45].mxu0  ;;  %v2235_v56 = vsel %vm5098_vm11, -1e+30, %v2226_v28 }
 0x8b8   : > { %v2229_v30 = vpop.f32.mrb[46].mxu0  ;;  %v2245_v58 = vsel %vm936_vm2, %v2235_v56, -inf }
 0x8b9   : > { %v3954_v31 = vpop.f32.mrb[47].mxu0 }
 0x936   : > { %v2238_v41 = vpop.xlane.xlu0 %2237 }
 0x937   : > { %v2248_v44 = vsub.f32 %v2232_v16, %v2238_v41 }
 0x939   : > { %v2252_v48 = vmul.f32 1.442695, %v2248_v44 }
 0x93e   : > { %v2241_v33 = vpop.xlane.xlu1 %2240 }
 0x93f   : > { %v2249_v36 = vsub.f32 %v2233_v23, %v2241_v33 }
 0x941   : > { %v2254_v37 = vmul.f32 1.442695, %v2249_v36 }
 0x943   : > { %4243 = vpow2.f32 %v2254_v37 }
 0x944   : > { %4245 = vpow2.f32 %v2252_v48 }
 0x94d   : > { %v4244_v39 = vpop.eup %4243 }
 0x94e   : > { %v2263_v40 = vsel %vm936_vm2, %v4244_v39, 0.0  ;;  %v4246_v59 = vpop.eup %4245 }
 0x94f   : > { %2264 = vadd.xlane.f32.xlu1 %v2263_v40  ;;  %v2260_v60 = vsel %vm936_vm2, %v4246_v59, 0.0 }
 0x97e   : > { %v2176_v50 = vpop.f32.mrb[44].mxu1 }
 0x97f   : > { %v2234_v51 = vsel %vm5094_vm10, -1e+30, %v2176_v50  ;;  %v3947_v52 = vpop.f32.mrb[45].mxu1 }
 0x980   : > { %v2179_v53 = vpop.f32.mrb[46].mxu1  ;;  %v2242_v55 = vsel %vm936_vm2, %v2234_v51, -inf }
 0x981   : > { %2243 = vmax.xlane.f32.xlu0 %v2242_v55  ;;  %v3948_v57 = vpop.f32.mrb[47].mxu1 }
 0x985   : > { %2246 = vmax.xlane.f32.xlu0 %v2245_v58 }
 0x989   : > { %2261 = vadd.xlane.f32.xlu0 %v2260_v60 }
 0xa0e   : > { %v2244_v61 = vpop.xlane.xlu0 %2243 }
 0xa0f   : > { %v2250_v63 = vsub.f32 %v2234_v51, %v2244_v61 }
 0xa11   : > { %v2256_v0 = vmul.f32 1.442695, %v2250_v63 }
 0xa12   : > { %v2247_v3 = vpop.xlane.xlu0 %2246 }
 0xa13   : > { %4247 = vpow2.f32 %v2256_v0  ;;  %v2251_v4 = vsub.f32 %v2235_v56, %v2247_v3 }
 0xa15   : > { %v2258_v5 = vmul.f32 1.442695, %v2251_v4 }
 0xa17   : > { %4249 = vpow2.f32 %v2258_v5 }
 0xa1d   : > { %v4248_v8 = vpop.eup %4247 }
 0xa1e   : > { %v2266_v9 = vsel %vm936_vm2, %v4248_v8, 0.0 }
 0xa1f   : > { %2267 = vadd.xlane.f32.xlu0 %v2266_v9 }
 0xa21   : > { %v4250_v13 = vpop.eup %4249 }
 0xa22   : > { %v2269_v14 = vsel %vm936_vm2, %v4250_v13, 0.0 }
 0xa23   : > { %2270 = vadd.xlane.f32.xlu1 %v2269_v14 }
 0xa34   : > { %2332 = vrot.lane.b32.xlu1 %v5058_v46, %s4588_s12 }
 0xa35   : > { %2284 = vrot.lane.b32.xlu0 %v5053_v43, %s4588_s12 }
 0xa38   : > { %2380 = vrot.lane.b32.xlu1 %v5130_v7, %s4588_s12 }
 0xa39   : > { %2579 = vrot.lane.b32.xlu0 %v5022_v22, %s4589_s26  ;;  %v2262_v22 = vpop.xlane.xlu0 %2261 }
 0xa3a   : > { %4251 = vrcp.f32 %v2262_v22 }
 0xa3c   : > { %2428 = vrot.lane.b32.xlu1 %v5134_v10, %s4588_s12  ;;  %s4590_s12 = smov [#allocation14]  }
 0xa3d   : > { %2577 = vrot.lane.b32.xlu0 %v5034_v34, %s4589_s26  ;;  %v2265_v34 = vpop.xlane.xlu1 %2264 }
 0xa3e   : > { %4253 = vrcp.f32 %v2265_v34 }
 0xa40   : > { %2629 = vrot.lane.b32.xlu1 %v5024_v26, %s4589_s26 }
 0xa41   : > { %2627 = vrot.lane.b32.xlu0 %v5038_v38, %s4589_s26 }
 0xa44   : > { %2679 = vrot.lane.b32.xlu1 %v5031_v32, %s4589_s26  ;;  %v4252_v26 = vpop.eup %4251 }
 0xa45   : > { %2677 = vrot.lane.b32.xlu0 %v5056_v45, %s4589_s26  ;;  %v2276_v38 = vmul.f32 %v4252_v26, %v4246_v59 }
 0xa48   : > { %2729 = vrot.lane.b32.xlu1 %v5036_v35, %s4589_s26  ;;  %v4254_v6 = vpop.eup %4253  ;;  %v2280_v35 = vpack.c.bf16 %v2276_v38, %v2276_v38 }
 0xa49   : > { %v2277_v16 = vmul.f32 %v4254_v6, %v4244_v39 }
 0xa4b   : > { %v2281_v49 = vpack.c.bf16 %v2277_v16, %v2277_v16 }
 0xa4c   : > { %2727 = vrot.lane.b32.xlu1 %v5060_v47, %s4589_s26 }
 0xaac   : > { %v2268_v15 = vpop.xlane.xlu0 %2267 }
 0xaad   : > { %4255 = vrcp.f32 %v2268_v15 }
 0xab0   : > { %v2271_v11 = vpop.xlane.xlu1 %2270  ;;  %v2285_v32 = vpop.permute.xlu0 %2284 }
 0xab1   : > { %4257 = vrcp.f32 %v2271_v11  ;;  %v2290_v45 = vsel %vm1200_vm3, %v2285_v32, 0 }
 0xab2   : > { %3956 = vmatpush3.bf16.msra.mxu1 %v2290_v45 }
 0xab3   : > { %3967 = vmatprep.subr.bf16.mxu1 %v4584_v2 }
 0xab4   : > { %v2333_v47 = vpop.permute.xlu1 %2332  ;;  %v2580_v31 = vpop.permute.xlu0 %2579 }
 0xab5   : > { %v2338_v17 = vsel %vm1200_vm3, %v2333_v47, 0  ;;  %3958 = vmatmul.mubr.msk.bf16.vlgmr.msra.gmra.mrb[48].mxu1 %vm936_vm2, %v2280_v35  ;;  %v2585_v36 = vsel %vm936_vm2, %v2580_v31, 0 }
 0xab6   : > { %3962 = vmatpush3.bf16.msra.mxu0 %v2338_v17  ;;  %3969 = vmatprep.mubr.msk.bf16.mxu1 %vm4585_vm1, %v4584_v2 }
 0xab7   : > { %v4256_v18 = vpop.eup %4255  ;;  %3973 = vmatprep.subr.bf16.mxu0 %v4584_v2 }
 0xab8   : > { %v2278_v54 = vmul.f32 %v4256_v18, %v4248_v8  ;;  %v2381_v23 = vpop.permute.xlu1 %2380  ;;  %v2578_v37 = vpop.permute.xlu0 %2577 }
 0xab9   : > { %v2386_v12 = vsel %vm1200_vm3, %v2381_v23, 0  ;;  %3964 = vmatmul.mubr.msk.bf16.vlgmr.msra.gmra.mrb[48].mxu0 %vm936_vm2, %v2281_v49 }
 0xaba   : > { %3968 = vmatpush3.bf16.msra.mxu1 %v2386_v12  ;;  %v2282_v24 = vpack.c.bf16 %v2278_v54, %v2278_v54  ;;  %3975 = vmatprep.mubr.msk.bf16.mxu0 %vm4585_vm1, %v4584_v2 }
 0xabb   : > { %v4258_v25 = vpop.eup %4257  ;;  %3979 = vmatprep.subr.mxu1 %v3686_v20 }
 0xabc   : > { %v2279_v27 = vmul.f32 %v4258_v25, %v4250_v13  ;;  %v2429_v28 = vpop.permute.xlu1 %2428  ;;  %v2628_v41 = vpop.permute.xlu0 %2627 }
 0xabd   : > { %v2434_v29 = vsel %vm1200_vm3, %v2429_v28, 0  ;;  %3970 = vmatmul.mubr.msk.bf16.vlgmr.msra.gmra.mrb[52].mxu1 %vm936_vm2, %v2282_v24 }
 0xabe   : > { %3974 = vmatpush3.bf16.msra.mxu0 %v2434_v29  ;;  %v2283_v30 = vpack.c.bf16 %v2279_v27, %v2279_v27  ;;  %3980 = vmatpush3.msra.mxu1 %v3686_v20 }
 0xabf   : > { %3987 = vmatprep.subr.bf16.mxu0 %v4584_v2  ;;  %3993 = vmatprep.subr.bf16.mxu1 %v4584_v2 }
 0xac0   : > { %v2630_v33 = vpop.permute.xlu1 %2629  ;;  %v2678_v44 = vpop.permute.xlu0 %2677 }
 0xac1   : > { %3976 = vmatmul.mubr.msk.bf16.vlgmr.msra.gmra.mrb[52].mxu0 %vm936_vm2, %v2283_v30  ;;  %v2635_v55 = vsel %vm936_vm2, %v2630_v33, 0 }
 0xac2   : > { %3989 = vmatprep.mubr.msk.bf16.mxu0 %vm4585_vm1, %v4584_v2 }
 0xac4   : > { %v2680_v39 = vpop.permute.xlu1 %2679 }
 0xac5   : > { %v2685_v40 = vsel %vm936_vm2, %v2680_v39, 0 }
 0xac7   : > { %3988 = vmatpush3.bf16.xpose.msra.mxu0 %v2585_v36 }
 0xac8   : > { %3999 = vmatprep.subr.bf16.mxu0 %v4584_v2  ;;  %v2730_v4 = vpop.permute.xlu1 %2729 }
 0xac9   : > { %v2735_v9 = vsel %vm936_vm2, %v2730_v4, 0 }
 0xacc   : > { %v2728_v13 = vpop.permute.xlu1 %2727 }
 0xace   : > { %3990 = vmatmul.mubr.msk.bf16.vlgmr.msra.gmra.mrb[56].mxu0 %vm936_vm2, %v2578_v37 }
 0xacf   : > { %4000 = vmatpush3.bf16.xpose.msra.mxu0 %v2685_v40  ;;  %4001 = vmatprep.mubr.msk.bf16.mxu0 %vm4585_vm1, %v4584_v2 }
 0xad0   : > { %4011 = vmatprep.subr.bf16.mxu0 %v4584_v2 }
 0xad6   : > { %4002 = vmatmul.mubr.msk.bf16.vlgmr.msra.gmra.mrb[60].mxu0 %vm936_vm2, %v2678_v44 }
 0xad7   : > { %4013 = vmatprep.mubr.msk.bf16.mxu0 %vm4585_vm1, %v4584_v2 }
 0xb88   : > { %v2326_v48 = vpop.f32.mrb[48].mxu1 }
 0xb89   : > { %v3959_v50 = vpop.f32.mrb[49].mxu1  ;;  %3981 = vmatprep.mubr.msk.f32.mxu1 %vm936_vm2, %v2326_v48 }
 0xb8a   : > { %v2329_v51 = vpop.f32.mrb[50].mxu1 }
 0xb8b   : > { %v3960_v52 = vpop.f32.mrb[51].mxu1 }
 0xb8c   : > { %v2374_v53 = vpop.f32.mrb[48].mxu0 }
 0xb8d   : > { %v3965_v56 = vpop.f32.mrb[49].mxu0  ;;  %3982 = vmatmul.mubr.msk.f32.vlgmr.msra.gmra.mrb[40].mxu1 %vm936_vm2, %v2374_v53 }
 0xb8e   : > { %3994 = vmatpush3.bf16.xpose.msra.mxu1 %v2635_v55  ;;  %v2377_v57 = vpop.f32.mrb[50].mxu0 }
 0xb8f   : > { %v3966_v58 = vpop.f32.mrb[51].mxu0  ;;  %4005 = vmatprep.subr.bf16.mxu1 %v4584_v2 }
 0xb90   : > { %v2422_v59 = vpop.f32.mrb[52].mxu1 }
 0xb91   : > { %v3971_v60 = vpop.f32.mrb[53].mxu1  ;;  %3984 = vmatprep.mubr.msk.f32.mxu1 %vm936_vm2, %v2422_v59 }
 0xb92   : > { %v2425_v61 = vpop.f32.mrb[54].mxu1 }
 0xb93   : > { %v3972_v63 = vpop.f32.mrb[55].mxu1 }
 0xb94   : > { %v2470_v0 = vpop.f32.mrb[52].mxu0 }
 0xb95   : > { %v3977_v3 = vpop.f32.mrb[53].mxu0  ;;  %3985 = vmatmul.mubr.msk.f32.gmra.mrb[42].mxu1 %vm936_vm2, %v2470_v0 }
 0xb96   : > { %v2473_v5 = vpop.f32.mrb[54].mxu0  ;;  %3995 = vmatprep.mubr.msk.bf16.mxu1 %vm4585_vm1, %v4584_v2 }
 0xb97   : > { %v3978_v8 = vpop.f32.mrb[55].mxu0 }
 0xb99   : > { %3996 = vmatmul.mubr.msk.bf16.vlgmr.msra.gmra.mrb[56].mxu1 %vm936_vm2, %v2628_v41 }
 0xb9a   : > { %4006 = vmatpush3.bf16.xpose.msra.mxu1 %v2735_v9  ;;  %4007 = vmatprep.mubr.msk.bf16.mxu1 %vm4585_vm1, %v4584_v2 }
 0xb9b   : > { %4017 = vmatprep.subr.bf16.mxu1 %v4584_v2 }
 0xba1   : > { %v2621_v14 = vpop.f32.mrb[56].mxu0  ;;  %4008 = vmatmul.mubr.msk.bf16.vlgmr.msra.gmra.mrb[60].mxu1 %vm936_vm2, %v2728_v13 }
 0xba2   : > { %v2777_v22 = vsel %vm5080_vm7, -1e+30, %v2621_v14  ;;  %v3991_v34 = vpop.f32.mrb[57].mxu0  ;;  %4019 = vmatprep.mubr.msk.bf16.mxu1 %vm4585_vm1, %v4584_v2 }
 0xba3   : > { %v2624_v26 = vpop.f32.mrb[58].mxu0  ;;  %v2781_v15 = vsel %vm936_vm2, %v2777_v22, -inf }
 0xba4   : > { %2782 = vmax.xlane.f32.xlu0 %v2781_v15  ;;  %v3992_v38 = vpop.f32.mrb[59].mxu0  ;;  %v3687_v26 = vunpack.c.h.bf16 %v5316_v42 }
 0xba9   : > { %v2721_v6 = vpop.f32.mrb[60].mxu0 }
 0xbaa   : > { %v2779_v11 = vsel %vm5094_vm10, -1e+30, %v2721_v6  ;;  %v4003_v32 = vpop.f32.mrb[61].mxu0 }
 0xbab   : > { %v2724_v45 = vpop.f32.mrb[62].mxu0  ;;  %v2787_v16 = vsel %vm936_vm2, %v2779_v11, -inf }
 0xbac   : > { %2788 = vmax.xlane.f32.xlu0 %v2787_v16  ;;  %v4004_v62 = vpop.f32.mrb[63].mxu0 }
 0xc31   : > { %v2783_v35 = vpop.xlane.xlu0 %2782 }
 0xc32   : > { %v2793_v47 = vsub.f32 %v2777_v22, %v2783_v35 }
 0xc34   : > { %v2797_v18 = vmul.f32 1.442695, %v2793_v47 }
 0xc36   : > { %4259 = vpow2.f32 %v2797_v18 }
 0xc39   : > { %v2789_v17 = vpop.xlane.xlu0 %2788 }
 0xc3a   : > { %v2795_v49 = vsub.f32 %v2779_v11, %v2789_v17 }
 0xc3c   : > { %v2801_v54 = vmul.f32 1.442695, %v2795_v49 }
 0xc3e   : > { %4261 = vpow2.f32 %v2801_v54 }
 0xc40   : > { %v4260_v33 = vpop.eup %4259 }
 0xc41   : > { %v2805_v1 = vsel %vm936_vm2, %v4260_v33, 0.0 }
 0xc48   : > { %v4262_v37 = vpop.eup %4261 }
 0xc49   : > { %v2811_v39 = vsel %vm936_vm2, %v4262_v37, 0.0 }
 0xc6c   : > { %v2671_v20 = vpop.f32.mrb[56].mxu1 }
 0xc6d   : > { %v2778_v23 = vsel %vm5084_vm9, -1e+30, %v2671_v20  ;;  %v3997_v12 = vpop.f32.mrb[57].mxu1 }
 0xc6e   : > { %v2674_v19 = vpop.f32.mrb[58].mxu1  ;;  %v2784_v24 = vsel %vm936_vm2, %v2778_v23, -inf }
 0xc6f   : > { %2785 = vmax.xlane.f32.xlu1 %v2784_v24  ;;  %v3998_v25 = vpop.f32.mrb[59].mxu1  ;;  %v3657_v24 = vld [vmem:[%s5588_s4] ss:$0 sm:$0xff]  ;;  %s5591_s4 = sld [smem:[#allocation29_spill]] }
 0xc70   : > { %v4283_v25 = vld [vmem:[%s4947_s28 + $0x8] sm:$0xff] }
 0xc74   : > { %v2771_v27 = vpop.f32.mrb[60].mxu1 }
 0xc75   : > { %v2780_v28 = vsel %vm5098_vm11, -1e+30, %v2771_v27  ;;  %v4009_v29 = vpop.f32.mrb[61].mxu1 }
 0xc76   : > { %v2774_v30 = vpop.f32.mrb[62].mxu1  ;;  %v2790_v31 = vsel %vm936_vm2, %v2780_v28, -inf  ;;  %v4284_v29 = vld [vmem:[%s4947_s28] sm:$0xff] }
 0xc77   : > { %2791 = vmax.xlane.f32.xlu0 %v2790_v31  ;;  %v4010_v36 = vpop.f32.mrb[63].mxu1 }
 0xc7b   : > { %2806 = vadd.xlane.f32.xlu0 %v2805_v1 }
 0xc7f   : > { %2812 = vadd.xlane.f32.xlu0 %v2811_v39 }
 0xc80   : > { %2877 = vrot.lane.b32.xlu1 %v5058_v46, %s4589_s26 }
 0xc84   : > { %2925 = vrot.lane.b32.xlu1 %v5130_v7, %s4589_s26 }
 0xc95   : > { %2829 = vrot.lane.b32.xlu0 %v5053_v43, %s4589_s26 }
 0xcfc   : > { %v2786_v21 = vpop.xlane.xlu1 %2785 }
 0xcfd   : > { %v2794_v40 = vsub.f32 %v2778_v23, %v2786_v21  ;;  %v4285_v21 = vld [vmem:[%s4947_s28 + $0x18] sm:$0xff] }
 0xcff   : > { %v2799_v41 = vmul.f32 1.442695, %v2794_v40 }
 0xd00   : > { %v2878_v44 = vpop.permute.xlu1 %2877 }
 0xd01   : > { %4263 = vpow2.f32 %v2799_v41  ;;  %v2883_v48 = vsel %vm1200_vm3, %v2878_v44, 0  ;;  %v4286_v41 = vld [vmem:[%s4947_s28 + $0x10] sm:$0xff] }
 0xd02   : > { %4018 = vmatpush3.bf16.msra.mxu1 %v2883_v48 }
 0xd03   : > { %4029 = vmatprep.subr.bf16.mxu1 %v4584_v2 }
 0xd04   : > { %v2792_v50 = vpop.xlane.xlu0 %2791  ;;  %v2926_v61 = vpop.permute.xlu1 %2925 }
 0xd05   : > { %v2796_v51 = vsub.f32 %v2780_v28, %v2792_v50  ;;  %v2931_v3 = vsel %vm1200_vm3, %v2926_v61, 0 }
 0xd07   : > { %v2803_v52 = vmul.f32 1.442695, %v2796_v51 }
 0xd08   : > { %v2807_v46 = vpop.xlane.xlu0 %2806 }
 0xd09   : > { %4265 = vpow2.f32 %v2803_v52 }
 0xd0a   : > { %4267 = vrcp.f32 %v2807_v46 }
 0xd0b   : > { %v4264_v7 = vpop.eup %4263 }
 0xd0c   : > { %v2813_v53 = vpop.xlane.xlu0 %2812  ;;  %v2808_v43 = vsel %vm936_vm2, %v4264_v7, 0.0 }
 0xd0d   : > { %2809 = vadd.xlane.f32.xlu1 %v2808_v43  ;;  %4269 = vrcp.f32 %v2813_v53 }
 0xd10   : > { %v2830_v55 = vpop.permute.xlu0 %2829 }
 0xd11   : > { %v2835_v56 = vsel %vm1200_vm3, %v2830_v55, 0 }
 0xd12   : > { %4012 = vmatpush3.bf16.msra.mxu0 %v2835_v56 }
 0xd13   : > { %v4266_v57 = vpop.eup %4265  ;;  %4023 = vmatprep.subr.bf16.mxu0 %v4584_v2 }
 0xd14   : > { %v4268_v58 = vpop.eup %4267  ;;  %v2814_v59 = vsel %vm936_vm2, %v4266_v57, 0.0 }
 0xd15   : > { %v2821_v60 = vmul.f32 %v4268_v58, %v4260_v33  ;;  %2815 = vadd.xlane.f32.xlu1 %v2814_v59 }
 0xd17   : > { %v2825_v63 = vpack.c.bf16 %v2821_v60, %v2821_v60  ;;  %v4270_v0 = vpop.eup %4269 }
 0xd18   : > { %v2823_v4 = vmul.f32 %v4270_v0, %v4262_v37 }
 0xd19   : > { %4014 = vmatmul.mubr.msk.bf16.vlgmr.msra.gmra.mrb[64].mxu0 %vm936_vm2, %v2825_v63 }
 0xd1a   : > { %4024 = vmatpush3.bf16.msra.mxu0 %v2931_v3  ;;  %4025 = vmatprep.mubr.msk.bf16.mxu0 %vm4585_vm1, %v4584_v2  ;;  %v2827_v5 = vpack.c.bf16 %v2823_v4, %v2823_v4 }
 0xd21   : > { %4026 = vmatmul.mubr.msk.bf16.vlgmr.msra.gmra.mrb[68].mxu0 %vm936_vm2, %v2827_v5 }
 0xd26   : > { %2973 = vrot.lane.b32.xlu1 %v5134_v10, %s4589_s26  ;;  %s4491_s26 = sshll.u32 %s4590_s12, 4  ;;  %s4492_s26 = int_to_ptr.vmem [resolvable:$false] %s4491_s26 }
 0xd27   : > { %s4493_s18 = scalar_lea.vmem %s4492_s26, 1024  ;;  %p4494_p0 = scmp.lt.s32.totalorder %s5467_s13, %s4492_s26 }
 0xd28   : > { %p4495_p5 = scmp.lt.s32.totalorder %s4493_s18, %s4487_s20 }
 0xd2a   : > { %p4496_p7 = por %p4495_p5, %p4494_p0 }
 0xd2c   : > { %p4497_p8 = pnand %p4496_p7, %p4490_p9 }
 0xd9a   : > { %v2810_v8 = vpop.xlane.xlu1 %2809 }
 0xd9b   : > { %4271 = vrcp.f32 %v2810_v8 }
 0xda2   : > { %v2816_v9 = vpop.xlane.xlu1 %2815 }
 0xda3   : > { %4273 = vrcp.f32 %v2816_v9 }
 0xda5   : > { %v4272_v13 = vpop.eup %4271 }
 0xda6   : > { %v2822_v14 = vmul.f32 %v4272_v13, %v4264_v7  ;;  %v2974_v22 = vpop.permute.xlu1 %2973 }
 0xda7   : > { %v2979_v15 = vsel %vm1200_vm3, %v2974_v22, 0  ;;  %v4197_v22 = vld [vmem:[%s5589_s21] sm:$0xff]  }
 0xda8   : > { %v2826_v34 = vpack.c.bf16 %v2822_v14, %v2822_v14  ;;  %4043 = vmatprep.subr.bf16.mxu0 %v4197_v22 }
 0xda9   : > { %4044 = vmatpush3.bf16.msra.mxu0 %v4197_v22 }
 0xdaa   : > { %4020 = vmatmul.mubr.msk.bf16.vlgmr.msra.gmra.mrb[64].mxu1 %vm936_vm2, %v2826_v34  ;;  %v4198_v34 = vld [vmem:[%s5589_s21 + $0x8] sm:$0xff]  }
 0xdab   : > { %4030 = vmatpush3.bf16.msra.mxu1 %v2979_v15  ;;  %4031 = vmatprep.mubr.msk.bf16.mxu1 %vm4585_vm1, %v4584_v2 }
 0xdac   : > { %4035 = vmatprep.subr.mxu1 %v3687_v26  ;;  %4045 = vmatprep.subr.bf16.mxu0 %v4198_v34 }
 0xdad   : > { %v4274_v10 = vpop.eup %4273  ;;  %4046 = vmatpush3.bf16.msra.mxu0 %v4198_v34 }
 0xdae   : > { %v2824_v38 = vmul.f32 %v4274_v10, %v4266_v57 }
 0xdb0   : > { %v2828_v6 = vpack.c.bf16 %v2824_v38, %v2824_v38 }
 0xdb2   : > { %4032 = vmatmul.mubr.msk.bf16.vlgmr.msra.gmra.mrb[68].mxu1 %vm936_vm2, %v2828_v6 }
 0xdb3   : > { %4036 = vmatpush3.msra.mxu1 %v3687_v26  ;;  %v4199_v26 = vld [vmem:[%s5590_s11] sm:$0xff]  }
 0xdb4   : > { %4051 = vmatprep.subr.bf16.mxu0 %v4199_v26 }
 0xdec   : > { %v2871_v11 = vpop.f32.mrb[64].mxu0 }
 0xded   : > { %v4015_v32 = vpop.f32.mrb[65].mxu0  ;;  %4037 = vmatprep.mubr.msk.f32.mxu1 %vm936_vm2, %v2871_v11 }
 0xdee   : > { %v2874_v42 = vpop.f32.mrb[66].mxu0 }
 0xdef   : > { %v4016_v45 = vpop.f32.mrb[67].mxu0 }
 0xdf4   : > { %v2967_v16 = vpop.f32.mrb[68].mxu0 }
 0xdf5   : > { %v4027_v62 = vpop.f32.mrb[69].mxu0 }
 0xdf6   : > { %v2970_v35 = vpop.f32.mrb[70].mxu0 }
 0xdf7   : > { %v4028_v47 = vpop.f32.mrb[71].mxu0 }
 0xe7d   : > { %v2919_v17 = vpop.f32.mrb[64].mxu1 }
 0xe7e   : > { %v4021_v2 = vpop.f32.mrb[65].mxu1  ;;  %4038 = vmatmul.mubr.msk.f32.vlgmr.msra.gmra.mrb[40].mxu1 %vm936_vm2, %v2919_v17  ;;  %v3658_v17 = vld [vmem:[#allocation11] ss:$0 sm:$0xff] }
 0xe7f   : > { %v2922_v18 = vpop.f32.mrb[66].mxu1  ;;  %4040 = vmatprep.mubr.msk.f32.mxu1 %vm936_vm2, %v2967_v16 }
 0xe80   : > { %v4022_v49 = vpop.f32.mrb[67].mxu1 }
 0xe85   : > { %v3015_v20 = vpop.f32.mrb[68].mxu1 }
 0xe86   : > { %v4033_v54 = vpop.f32.mrb[69].mxu1  ;;  %4041 = vmatmul.mubr.msk.f32.gmra.mrb[42].mxu1 %vm936_vm2, %v3015_v20 }
 0xe87   : > { %v3018_v23 = vpop.f32.mrb[70].mxu1  ;;  %v3659_v54 = vld [vmem:[#allocation13] ss:$0 sm:$0xff] }
 0xe88   : > { %v4034_v12 = vpop.f32.mrb[71].mxu1 }
 0xf51   : > { %v4039_v19 = vpop.f32.mrb[40].mxu1 }
 0xf52   : > { %v3123_v27 = vadd.f32 %v4283_v25, %v4039_v19  ;;  %v3099_v28 = vpop.f32.mrb[41].mxu1 }
 0xf53   : > { %v3122_v30 = vadd.f32 %v4284_v29, %v3099_v28 }
 0xf54   : > { %v5409_v31 = vadd.f32 %v3657_v24, %v3123_v27 }
 0xf55   : > { %v5411_v33 = vadd.f32 %v3657_v24, %v3122_v30 }
 0xf56   : > { %v3142_v36 = vsel %vm602_vm0, %v5409_v31, 0.0 }
 0xf57   : > { %3143 = vadd.xlane.f32.xlu1 %v3142_v36  ;;  %v3139_v1 = vsel %vm602_vm0, %v5411_v33, 0.0 }
 0xf58   : > { %3140 = vadd.xlane.f32.xlu0 %v3139_v1 }
 0xf59   : > { %v4042_v37 = vpop.f32.mrb[42].mxu1 }
 0xf5a   : > { %v3109_v39 = vpop.f32.mrb[43].mxu1  ;;  %v3125_v40 = vadd.f32 %v4285_v21, %v4042_v37 }
 0xf5b   : > { %v3124_v44 = vadd.f32 %v4286_v41, %v3109_v39  ;;  %v4201_v41 = vld [vmem:[%s5590_s11 + $0x10] sm:$0xff]  }
 0xf5c   : > { %v5421_v50 = vadd.f32 %v3657_v24, %v3125_v40  ;;  %v4200_v40 = vld [vmem:[%s5590_s11 + $0x8] sm:$0xff]  }
 0xf5d   : > { %v5419_v48 = vadd.f32 %v3657_v24, %v3124_v44  ;;  %v4202_v44 = vld [vmem:[%s5590_s11 + $0x18] sm:$0xff]  }
 0xf5e   : > { %v3148_v52 = vsel %vm602_vm0, %v5421_v50, 0.0 }
 0xf5f   : > { %v3145_v51 = vsel %vm602_vm0, %v5419_v48, 0.0 }
 0xf60   : > { %3146 = vadd.xlane.f32.xlu0 %v3145_v51  ;;  %v3660_v51 = vld [vmem:[%s5591_s4] ss:$0 sm:$0xff] }
 0xf64   : > { %3149 = vadd.xlane.f32.xlu0 %v3148_v52 }
 0xfe4   : > { %v3144_v46 = vpop.xlane.xlu1 %3143 }
 0xfe5   : > { %v3152_v7 = vmul.f32 0.03125, %v3144_v46  ;;  %v3141_v53 = vpop.xlane.xlu0 %3140 }
 0xfe6   : > { %v3151_v43 = vmul.f32 0.03125, %v3141_v53 }
 0xfe7   : > { %v3156_v55 = vsub.f32 %v5409_v31, %v3152_v7 }
 0xfe8   : > { %v3155_v56 = vsub.f32 %v5411_v33, %v3151_v43 }
 0xfe9   : > { %v3160_v57 = vmul.f32 %v3156_v55, %v3156_v55 }
 0xfea   : > { %v3159_v58 = vmul.f32 %v3155_v56, %v3155_v56 }
 0xfeb   : > { %v3166_v59 = vsel %vm602_vm0, %v3160_v57, 0.0 }
 0xfec   : > { %3167 = vadd.xlane.f32.xlu1 %v3166_v59  ;;  %v3163_v60 = vsel %vm602_vm0, %v3159_v58, 0.0 }
 0xfed   : > { %3164 = vadd.xlane.f32.xlu0 %v3163_v60  ;;  %v3147_v61 = vpop.xlane.xlu0 %3146 }
 0xfee   : > { %v3153_v63 = vmul.f32 0.03125, %v3147_v61 }
 0xff0   : > { %v3157_v0 = vsub.f32 %v5419_v48, %v3153_v63 }
 0xff1   : > { %v3150_v3 = vpop.xlane.xlu0 %3149 }
 0xff2   : > { %v3154_v4 = vmul.f32 0.03125, %v3150_v3  ;;  %v3161_v5 = vmul.f32 %v3157_v0, %v3157_v0 }
 0xff4   : > { %v3158_v8 = vsub.f32 %v5421_v50, %v3154_v4  ;;  %v3169_v9 = vsel %vm602_vm0, %v3161_v5, 0.0  ;;  %v3671_v4 = vld [vmem:[%s5592_s27] ss:$0 sm:$0xff] }
 0xff5   : > { %3170 = vadd.xlane.f32.xlu0 %v3169_v9 }
 0xff6   : > { %v3162_v13 = vmul.f32 %v3158_v8, %v3158_v8 }
 0xff8   : > { %v3172_v14 = vsel %vm602_vm0, %v3162_v13, 0.0 }
 0xff9   : > { %3173 = vadd.xlane.f32.xlu1 %v3172_v14 }
0x1079   : > { %v3168_v15 = vpop.xlane.xlu1 %3167 }
0x107a   : > { %v3176_v10 = vmul.f32 0.03125, %v3168_v15  ;;  %v3165_v38 = vpop.xlane.xlu0 %3164 }
0x107b   : > { %v3175_v6 = vmul.f32 0.03125, %v3165_v38 }
0x107c   : > { %v3180_v11 = vadd.f32 1e-05, %v3176_v10 }
0x107d   : > { %v3179_v32 = vadd.f32 1e-05, %v3175_v6 }
0x107e   : > { %4275 = vrsqrt.f32 %v3180_v11 }
0x107f   : > { %4277 = vrsqrt.f32 %v3179_v32 }
0x1082   : > { %v3171_v42 = vpop.xlane.xlu0 %3170 }
0x1083   : > { %v3177_v45 = vmul.f32 0.03125, %v3171_v42 }
0x1085   : > { %v3181_v16 = vadd.f32 1e-05, %v3177_v45 }
0x1086   : > { %v3174_v62 = vpop.xlane.xlu1 %3173 }
0x1087   : > { %4279 = vrsqrt.f32 %v3181_v16  ;;  %v3178_v35 = vmul.f32 0.03125, %v3174_v62 }
0x1088   : > { %v4276_v47 = vpop.eup %4275 }
0x1089   : > { %v4278_v2 = vpop.eup %4277  ;;  %v3188_v18 = vmul.f32 %v4276_v47, %v3156_v55  ;;  %v3182_v49 = vadd.f32 1e-05, %v3178_v35 }
0x108a   : > { %v3187_v20 = vmul.f32 %v4278_v2, %v3155_v56 }
0x108b   : > { %4281 = vrsqrt.f32 %v3182_v49  ;;  %v3198_v23 = vmul.f32 %v3658_v17, %v3188_v18 }
0x108c   : > { %v3197_v12 = vmul.f32 %v3658_v17, %v3187_v20 }
0x108d   : > { %v3208_v19 = vadd.f32 %v3659_v54, %v3198_v23 }
0x108e   : > { %v3207_v24 = vadd.f32 %v3659_v54, %v3197_v12 }
0x1090   : > { %v3211_v25 = vpack.c.bf16 %v3208_v19, %v3207_v24 }
0x1091   : > { %v4280_v27 = vpop.eup %4279 }
0x1092   : > { %v3189_v28 = vmul.f32 %v4280_v27, %v3157_v0  ;;  %4047 = vmatprep.mubr.msk.bf16.mxu0 %vm602_vm0, %v3211_v25 }
0x1094   : > { %v3199_v30 = vmul.f32 %v3658_v17, %v3189_v28 }
0x1095   : > { %v4282_v29 = vpop.eup %4281 }
0x1096   : > { %v3190_v36 = vmul.f32 %v4282_v29, %v3158_v8  ;;  %v3209_v37 = vadd.f32 %v3659_v54, %v3199_v30 }
0x1098   : > { %v3200_v1 = vmul.f32 %v3658_v17, %v3190_v36 }
0x109a   : > { %v3210_v39 = vadd.f32 %v3659_v54, %v3200_v1 }
0x109c   : > { %v3212_v21 = vpack.c.bf16 %v3210_v39, %v3209_v37 }
0x109e   : > { %4048 = vmatmul.mubr.msk.bf16.vlgmr.msra.gmra.mrb[72].mxu0 %vm602_vm0, %v3212_v21 }
0x109f   : > { %4052 = vmatpush3.bf16.msra.mxu0 %v4199_v26 }
0x10a0   : > { %4053 = vmatprep.subr.bf16.mxu0 %v4200_v40 }
0x10a3   : > { %4054 = vmatpush3.bf16.msra.mxu0 %v4200_v40 }
0x10a4   : > { %4055 = vmatprep.subr.bf16.mxu0 %v4201_v41 }
0x10a7   : > { %4056 = vmatpush3.bf16.msra.mxu0 %v4201_v41 }
0x10a8   : > { %4057 = vmatprep.subr.bf16.mxu0 %v4202_v44 }
0x10ab   : > { %4058 = vmatpush3.bf16.msra.mxu0 %v4202_v44 }
0x1171   : > { %v4049_v52 = vpop.f32.mrb[72].mxu0 }
0x1172   : > { %v3285_v46 = vadd.f32 %v4049_v52, %v3660_v51  ;;  %v3276_v7 = vpop.f32.mrb[73].mxu0 }
0x1173   : > { %v3277_v53 = vadd.f32 %v3660_v51, %v3276_v7  ;;  %v4050_v43 = vpop.f32.mrb[74].mxu0 }
0x1174   : > { %v3288_v55 = vadd.f32 %v4050_v43, %v3660_v51  ;;  %v3279_v56 = vpop.f32.mrb[75].mxu0  ;;  %v3293_v58 = vmax.f32 %v3285_v46, 0.0 }
0x1175   : > { %v3280_v57 = vadd.f32 %v3660_v51, %v3279_v56  ;;  %v3291_v60 = vmax.f32 %v3277_v53, 0.0 }
0x1176   : > { %v3294_v59 = vmax.f32 %v3288_v55, 0.0 }
0x1177   : > { %v3292_v61 = vmax.f32 %v3280_v57, 0.0 }
0x1178   : > { %v3296_v63 = vpack.c.bf16 %v3294_v59, %v3293_v58 }
0x1179   : > { %v3295_v0 = vpack.c.bf16 %v3292_v61, %v3291_v60 }
0x117b   : > { %4059 = vmatprep.mubr.msk.bf16.mxu0 %vm3329_vm12, %v3295_v0 }
0x117c   : > { %4060 = vmatmul.mubr.msk.bf16.vlgmr.msra.gmra.mrb[76].mxu0 %vm3329_vm12, %v3296_v63 }
0x124f   : > { %v4061_v3 = vpop.f32.mrb[76].mxu0 }
0x1250   : > { %v3387_v5 = vadd.f32 %v4061_v3, %v5419_v48  ;;  %v3370_v8 = vpop.f32.mrb[77].mxu0 }
0x1251   : > { %v3385_v9 = vadd.f32 %v3370_v8, %v5411_v33  ;;  %v4062_v13 = vpop.f32.mrb[78].mxu0 }
0x1252   : > { %v3398_v14 = vadd.f32 %v3671_v4, %v3387_v5  ;;  %v3388_v22 = vadd.f32 %v4062_v13, %v5421_v50  ;;  %v3373_v34 = vpop.f32.mrb[79].mxu0 }
0x1253   : > { %v3396_v26 = vadd.f32 %v3671_v4, %v3385_v9  ;;  %v3386_v48 = vadd.f32 %v3373_v34, %v5409_v31 }
0x1254   : > { %3402 = vst.msk [vmem:[%s591_s25 + $0x10] sm:$0xff] %vm602_vm0, %v3398_v14  ;;  %v3399_v15 = vadd.f32 %v3671_v4, %v3388_v22 }
0x1255   : > { %3400 = vst.msk [vmem:[%s591_s25] sm:$0xff] %vm602_vm0, %v3396_v26  ;;  %v3397_v33 = vadd.f32 %v3671_v4, %v3386_v48 }
0x1256   : > { %3403 = vst.msk [vmem:[%s591_s25 + $0x18] sm:$0xff] %vm602_vm0, %v3399_v15 }
0x1257   : > { %3401 = vst.msk [vmem:[%s591_s25 + $0x8] sm:$0xff] %vm602_vm0, %v3397_v33 }
0x1258   : > { %4500 = shalt.err (!%p4497_p8)
}
0x1259   : > { %s4501_s3 = scalar_lea.hbm %s5474_s19, 512  ;;  %s4505_s5 = scalar_lea.hbm %s5593_s7, 1024 }
0x125a   : > { %p4502_p4 = scmp.ne.s32.totalorder %s5474_s19, %s4501_s3  ;;  %p4506_p1 = scmp.lt.u32.totalorder %s5474_s19, %s5593_s7 }
0x125b   : > { %p4507_p11 = scmp.lt.u32.totalorder %s4505_s5, %s4501_s3  ;;  %p4509_p2 = scmp.lt.u32.totalorder %s4501_s3, %s5474_s19 }
0x125c   : > { %p4503_p3 = pnand %p4502_p4, %p5594_p13 }
0x125d   : > { %p4508_p12 = por %p4507_p11, %p4506_p1 }
0x125e   : > { %p4504_p10 = pneg %p4503_p3 }
0x125f   : > { %p4510_p6 = por %p4509_p2, %p4508_p12 }
0x1261   : > { %p4511_p9 = pnand %p4510_p6, %p4504_p10 }
0x1263   : > { %4514 = shalt.err (!%p4511_p9)
}
0x1264   : > { %s4591_s9 = smov 128   ;;  %s4592_s24 = smov 8  }
0x1265   : > { %4099 = dma.vmem_to_hbm [thread:$0]  (%p5594_p13), %s5467_s13, 512, %s5474_s19, %s3405_s8, %s4591_s9, %s4591_s9, %s4592_s24  }
0x1266 PF: > { %s3433_s0 = sand.u32 1, %s4557_s29   ;;  %p5595_p0 = scmp.ne.s32.totalorder %s5567_s10, 0 }
0x1267   : > { %p5596_p5 = scmp.ge.s32.totalorder %s4569_s16, 2  ;;  %s3434_s20 = scalar_lea.sflag [#allocation4], %s3433_s0 }
0x1269   : > { %p4125_p7 = pnand %p5596_p5, %p5595_p0 }
0x126b   : > { %4552 = dma.done.wait (!%p4125_p7), %s3434_s20, 512  }
0x126c   : > { %4554 = vsyncadd (!%p4125_p7), %s3434_s20, 4294966784  ;;  %p32_p8 = scmp.ge.s32.totalorder %s4826_s23, 4   ;;  %s5597_s29 = smov %s4561_s30 }
0x126d   : > { %s5598_s30 = smov %s4565_s15  ;;  %s5599_s15 = smov %s4838_s14 }
0x126e   : > { %s5600_s16 = smov %s4826_s23  ;;  %34 = sbr.rel (!%p32_p8) target bundleno = 22 (0x16), region = 158 }
0x1275   :  { %3439 = vsyncpa [#allocation3], 1 }
0x1276   :  { %3441 = vsyncpa [#allocation3 + $0x1], 1 }
0x1277   :  { %3442 = vsyncpa [#allocation6], 1 }
0x1278   :  { %3444 = vsyncpa [#allocation6 + $0x1], 1 }
0x1279   :  { %3445 = vsyncpa [#allocation9], 1 }
0x127a   :  { %3446 = vsyncpa [#allocation12], 1 }
0x127b   :  { %3447 = vsyncpa [#allocation4], 1 }
0x127c   :  { %3449 = vsyncpa [#allocation4 + $0x1], 1 }

</bundles_post_ra>
